<compile_context>
chip_gen: v7x
topology: tpu7x:2x2x1
jax: 0.10.0
libtpu: 0.0.40
codegen_flags: <defaults>
</compile_context>

<pallas_src>
import functools

import jax
import jax.numpy as jnp
from jax import lax
from jax.experimental import pallas as pl
from jax.experimental.pallas import tpu as pltpu

N = 8        # vehicles (graph nodes) per graph
F_DIM = 8    # per-vehicle feature length
HID = 32     # hidden width used throughout the module
A_DIM = 4    # number of selectable actions
G = 16       # graphs per grid block -> G * N = 128 rows per matmul

# ---- packed parameter slab layout: (P_ROWS, 128) f32, weights stored (in, out) ----
R_W1 = 0       # encoder_1 weight        (F_DIM, HID)   lanes [0:HID]
R_W2 = 8       # encoder_2 weight        (HID, HID)     lanes [0:HID]
R_WLR = 40     # GATv2 [lin_l | lin_r]   (HID, 2*HID)   lanes [0:2*HID]
R_WD = 72      # GraphConv_Dense weight  (HID, HID)     lanes [0:HID]
R_WP1 = 104    # policy_1 weight         (2*HID, HID): rows 0:HID act on X_graph, HID:2*HID on X
R_WP2 = 168    # policy_2 weight         (HID, HID)     lanes [0:HID]
R_WVA = 200    # [advantage | value]     (HID, A_DIM+1) lanes [0:A_DIM+1]
R_B1 = 232     # biases / att vector, one per row, lane offset 0
R_B2 = 233
R_BLR = 234    # [bias_l | bias_r]       lanes [0:2*HID]
R_BG = 235
R_BD = 236
R_BP1 = 237
R_BP2 = 238
R_BVA = 239    # [bias_adv | bias_val]   lanes [0:A_DIM+1]
R_ATT = 240    # GATv2 attention vector  lanes [0:HID]
P_ROWS = 248
P_COLS = 128


def graph_block_kernel(x_ref, adjt_ref, mask_ref, p_ref, q_ref):
    f32 = jnp.float32
    relu = lambda v: jnp.maximum(v, 0.0)
    dot = functools.partial(jnp.dot, preferred_element_type=f32)
    p = p_ref

    x = x_ref[...]                                           # (G*N, F_DIM)

    # --- encoder MLP: Linear(F,32)+ReLU, Linear(32,32)+ReLU ---
    h = relu(dot(x, p[R_W1:R_W1 + F_DIM, :HID]) + p[R_B1:R_B1 + 1, :HID])
    h = relu(dot(h, p[R_W2:R_W2 + HID, :HID]) + p[R_B2:R_B2 + 1, :HID])

    # --- GATv2Conv(32,32), 1 head, negative_slope=0.2, add_self_loops ---
    # fused lin_l | lin_r: one (32,64) matmul, then lane-slice
    xlr = dot(h, p[R_WLR:R_WLR + HID, :2 * HID]) + p[R_BLR:R_BLR + 1, :2 * HID]
    xl = xlr[:, :HID]                                        # source transform
    xr = xlr[:, HID:2 * HID]                                 # target transform

    xl_g = xl.reshape(G, N, HID)                             # tile-aligned split (free)
    xr_g = xr.reshape(G, N, HID)
    att = p[R_ATT:R_ATT + 1, :HID]                           # (1, HID)

    # target-major attention logits e[g, tgt, src]
    s = xr_g[:, :, None, :] + xl_g[:, None, :, :]            # (G, N, N, HID)
    s = jnp.where(s > 0, s, 0.2 * s)                         # leaky_relu(., 0.2)
    e = jnp.sum(s * att[None, None, :, :], axis=-1)          # (G, N, N)

    adj_t = adjt_ref[...]                                    # adj_t[g, tgt, src]
    rid = lax.broadcasted_iota(jnp.int32, (G, N, N), 1)
    cid = lax.broadcasted_iota(jnp.int32, (G, N, N), 2)
    connected = jnp.logical_or(adj_t != 0.0, rid == cid)     # edges + forced self-loops
    e = jnp.where(connected, e, jnp.float32(-1e30))
    e = e - jnp.max(e, axis=-1, keepdims=True)               # softmax over sources
    w = jnp.exp(e)                                           # masked entries underflow to 0
    alpha = w / jnp.sum(w, axis=-1, keepdims=True)           # (G, N_tgt, N_src)

    # aggregation: no transpose needed in target-major form
    xg = jnp.einsum('gts,gsh->gth', alpha, xl_g, preferred_element_type=f32)
    xg = relu(xg.reshape(G * N, HID) + p[R_BG:R_BG + 1, :HID])

    # --- GraphConv_Dense: Linear(32,32)+ReLU ---
    xg = relu(dot(xg, p[R_WD:R_WD + HID, :HID]) + p[R_BD:R_BD + 1, :HID])

    # --- policy head; cat((X_graph, X), 1) expressed as split matmul (no lane concat) ---
    xp = relu(dot(xg, p[R_WP1:R_WP1 + HID, :HID])
              + dot(h, p[R_WP1 + HID:R_WP1 + 2 * HID, :HID])
              + p[R_BP1:R_BP1 + 1, :HID])
    xp = relu(dot(xp, p[R_WP2:R_WP2 + HID, :HID]) + p[R_BP2:R_BP2 + 1, :HID])

    # --- fused value/advantage head + dueling combine ---
    va = dot(xp, p[R_WVA:R_WVA + HID, :A_DIM + 1]) + p[R_BVA:R_BVA + 1, :A_DIM + 1]
    adv = va[:, :A_DIM]                                      # (G*N, A)
    val = va[:, A_DIM:A_DIM + 1]                             # (G*N, 1)
    q = val + adv - jnp.mean(adv, axis=-1, keepdims=True)
    q_ref[...] = q * mask_ref[...]                           # RL_indice mask


def init_params(key):
    def dense(k, fan_in, fan_out):
        kw, kb = jax.random.split(k)
        scale = 1.0 / jnp.sqrt(fan_in)
        w = jax.random.uniform(kw, (fan_in, fan_out), jnp.float32, -scale, scale)
        b = jax.random.uniform(kb, (fan_out,), jnp.float32, -scale, scale)
        return w, b

    keys = jax.random.split(key, 10)
    p = {}
    p['w1'], p['b1'] = dense(keys[0], F_DIM, HID)            # encoder_1
    p['w2'], p['b2'] = dense(keys[1], HID, HID)              # encoder_2
    p['wl'], p['bl'] = dense(keys[2], HID, HID)              # GATv2 lin_l
    p['wr'], p['br'] = dense(keys[3], HID, HID)              # GATv2 lin_r
    p['att'] = jax.random.normal(keys[4], (HID,), jnp.float32) * 0.1
    p['bg'] = jnp.zeros((HID,), jnp.float32)                 # GATv2 output bias
    p['wd'], p['bd'] = dense(keys[5], HID, HID)              # GraphConv_Dense
    p['wp1'], p['bp1'] = dense(keys[6], 2 * HID, HID)        # policy_1 (input = concat 64)
    p['wp2'], p['bp2'] = dense(keys[7], HID, HID)            # policy_2
    p['wv'], p['bv'] = dense(keys[8], HID, 1)                # policy_value
    p['wa'], p['ba'] = dense(keys[9], HID, A_DIM)            # policy_advantage
    return p


def pack_params(p):
    """Pack all weights/biases into one lane-dense (P_ROWS, 128) f32 slab."""
    slab = jnp.zeros((P_ROWS, P_COLS), jnp.float32)

    def put(s, row, val):
        val = jnp.asarray(val, jnp.float32)
        if val.ndim == 1:
            val = val[None, :]
        return s.at[row:row + val.shape[0], :val.shape[1]].set(val)

    slab = put(slab, R_W1, p['w1'])
    slab = put(slab, R_W2, p['w2'])
    slab = put(slab, R_WLR, jnp.concatenate([p['wl'], p['wr']], axis=1))
    slab = put(slab, R_WD, p['wd'])
    slab = put(slab, R_WP1, p['wp1'])
    slab = put(slab, R_WP2, p['wp2'])
    slab = put(slab, R_WVA, jnp.concatenate([p['wa'], p['wv']], axis=1))
    slab = put(slab, R_B1, p['b1'])
    slab = put(slab, R_B2, p['b2'])
    slab = put(slab, R_BLR, jnp.concatenate([p['bl'], p['br']]))
    slab = put(slab, R_BG, p['bg'])
    slab = put(slab, R_BD, p['bd'])
    slab = put(slab, R_BP1, p['bp1'])
    slab = put(slab, R_BP2, p['bp2'])
    slab = put(slab, R_BVA, jnp.concatenate([p['ba'], p['bv']]))
    slab = put(slab, R_ATT, p['att'])
    return slab


def graph_model_forward(x, adj, mask, param_slab):
    """x: (B, N, F) node features, adj: (B, N, N) dense adjacency (adj[b, src, tgt]),
    mask: (B, N) RL_indice.  Returns (B, N, A) dueling Q values."""
    B = x.shape[0]
    Bp = ((B + G - 1) // G) * G
    if Bp != B:  # pad batch to a whole number of G-graph blocks (padded graphs masked out)
        pad = Bp - B
        x = jnp.concatenate([x, jnp.zeros((pad, N, F_DIM), x.dtype)], axis=0)
        adj = jnp.concatenate([adj, jnp.zeros((pad, N, N), adj.dtype)], axis=0)
        mask = jnp.concatenate([mask, jnp.zeros((pad, N), mask.dtype)], axis=0)

    x2d = x.reshape(Bp * N, F_DIM)
    adj_t = jnp.swapaxes(adj, 1, 2)          # target-major adjacency (layout plumbing)
    mask2d = mask.reshape(Bp * N, 1)

    out = pl.pallas_call(
        graph_block_kernel,
        out_shape=jax.ShapeDtypeStruct((Bp * N, A_DIM), jnp.float32),
        grid=(Bp // G,),
        in_specs=[
            pl.BlockSpec((G * N, F_DIM), lambda i: (i, 0)),
            pl.BlockSpec((G, N, N), lambda i: (i, 0, 0)),
            pl.BlockSpec((G * N, 1), lambda i: (i, 0)),
            pl.BlockSpec((P_ROWS, P_COLS), lambda i: (0, 0)),   # params: constant block
        ],
        out_specs=pl.BlockSpec((G * N, A_DIM), lambda i: (i, 0)),
        compiler_params=pltpu.CompilerParams(
            dimension_semantics=("parallel",)),
    )(x2d, adj_t, mask2d, param_slab)
    return out.reshape(Bp, N, A_DIM)[:B]


def reference_forward(x, adj, mask, p):
    relu = jax.nn.relu

    def single(xg, ag, mg):
        h = relu(xg @ p['w1'] + p['b1'])
        h = relu(h @ p['w2'] + p['b2'])
        xl = h @ p['wl'] + p['bl']
        xr = h @ p['wr'] + p['br']
        s = xl[:, None, :] + xr[None, :, :]                  # (src, tgt, HID)
        s = jnp.where(s > 0, s, 0.2 * s)
        e = jnp.sum(s * p['att'][None, None, :], axis=-1)    # (src, tgt)
        connected = jnp.logical_or(ag != 0.0, jnp.eye(N, dtype=bool))
        e = jnp.where(connected, e, -1e30)
        e = e - e.max(axis=0, keepdims=True)                 # softmax over sources
        w = jnp.exp(e)
        alpha = w / w.sum(axis=0, keepdims=True)
        out = relu(alpha.T @ xl + p['bg'])
        out = relu(out @ p['wd'] + p['bd'])
        xp = relu(jnp.concatenate([out, h], axis=1) @ p['wp1'] + p['bp1'])
        xp = relu(xp @ p['wp2'] + p['bp2'])
        v = xp @ p['wv'] + p['bv']
        a = xp @ p['wa'] + p['ba']
        q = v + a - a.mean(axis=1, keepdims=True)
        return q * mg.reshape(N, 1)

    return jax.vmap(single)(x, adj, mask)


if __name__ == "__main__":
    key = jax.random.PRNGKey(0)
    kx, kadj, kmask, kparam = jax.random.split(key, 4)

    B = 32  # 32 independent graphs -> 2 parallel grid blocks of 128 rows each
    x = jax.random.normal(kx, (B, N, F_DIM), jnp.float32)                  # X_in
    adj = (jax.random.uniform(kadj, (B, N, N)) > 0.5).astype(jnp.float32)  # A_in_Dense
    mask = (jax.random.uniform(kmask, (B, N)) > 0.3).astype(jnp.float32)   # RL_indice

    params = init_params(kparam)
    slab = pack_params(params)            # packed once, reused every forward

    fwd = jax.jit(graph_model_forward)
    q = fwd(x, adj, mask, slab)
    jax.block_until_ready(q)

    q_ref = reference_forward(x, adj, mask, params)
    assert q.shape == (B, N, A_DIM)
    assert jnp.allclose(q, q_ref, atol=1e-4, rtol=1e-4), "mismatch vs reference"

    print("KERNEL_OK")
</pallas_src>

<mosaic_0001>
module attributes {stable_mosaic.version = 11 : i64} {
  func.func @graph_block_kernel(%arg0: i32, %arg1: memref<128x8xf32, #tpu.memory_space<vmem>>, %arg2: memref<16x8x8xf32, #tpu.memory_space<vmem>>, %arg3: memref<128x1xf32, #tpu.memory_space<vmem>>, %arg4: memref<248x128xf32, #tpu.memory_space<vmem>>, %arg5: memref<128x4xf32, #tpu.memory_space<vmem>>) attributes {dimension_semantics = [#tpu.dimension_semantics<parallel>], iteration_bounds = array<i64: 2>, scalar_prefetch = 0 : i64, scratch_operands = 0 : i64, tpu.core_type = #tpu.core_type<tc>, window_params = [{transform_indices = @transform_0, window_bounds = array<i64: 128, 8>}, {transform_indices = @transform_1, window_bounds = array<i64: 16, 8, 8>}, {transform_indices = @transform_2, window_bounds = array<i64: 128, 1>}, {pipeline_mode = #tpu.pipeline_mode<synchronous>, transform_indices = @transform_3, window_bounds = array<i64: 248, 128>}, {transform_indices = @transform_4, window_bounds = array<i64: 128, 4>}]} {
    %c0 = arith.constant 0 : index
    %c0_0 = arith.constant 0 : index
    %0 = vector.load %arg1[%c0, %c0_0] : memref<128x8xf32, #tpu.memory_space<vmem>>, vector<128x8xf32>
    %c0_1 = arith.constant 0 : index
    %c0_2 = arith.constant 0 : index
    %1 = vector.load %arg4[%c0_1, %c0_2] : memref<248x128xf32, #tpu.memory_space<vmem>>, vector<8x32xf32>
    %cst = arith.constant dense<0.000000e+00> : vector<128x32xf32>
    %2 = tpu.matmul %0, %1, %cst {dimension_numbers = #tpu.dot_dimension_numbers<[1], [0], [0], [1], [0, 0, 1, 1], [], []>} : vector<128x8xf32>, vector<8x32xf32>, vector<128x32xf32> -> vector<128x32xf32>
    %c232 = arith.constant 232 : index
    %c0_3 = arith.constant 0 : index
    %3 = vector.load %arg4[%c232, %c0_3] : memref<248x128xf32, #tpu.memory_space<vmem>>, vector<1x32xf32>
    %4 = vector.broadcast %3 : vector<1x32xf32> to vector<128x32xf32>
    %5 = arith.addf %2, %4 : vector<128x32xf32>
    %cst_4 = arith.constant 0.000000e+00 : f32
    %6 = vector.broadcast %cst_4 : f32 to vector<128x32xf32>
    %7 = arith.maximumf %5, %6 : vector<128x32xf32>
    %c8 = arith.constant 8 : index
    %c0_5 = arith.constant 0 : index
    %8 = vector.load %arg4[%c8, %c0_5] : memref<248x128xf32, #tpu.memory_space<vmem>>, vector<32x32xf32>
    %cst_6 = arith.constant dense<0.000000e+00> : vector<128x32xf32>
    %9 = tpu.matmul %7, %8, %cst_6 {dimension_numbers = #tpu.dot_dimension_numbers<[1], [0], [0], [1], [0, 0, 1, 1], [], []>} : vector<128x32xf32>, vector<32x32xf32>, vector<128x32xf32> -> vector<128x32xf32>
    %c233 = arith.constant 233 : index
    %c0_7 = arith.constant 0 : index
    %10 = vector.load %arg4[%c233, %c0_7] : memref<248x128xf32, #tpu.memory_space<vmem>>, vector<1x32xf32>
    %11 = vector.broadcast %10 : vector<1x32xf32> to vector<128x32xf32>
    %12 = arith.addf %9, %11 : vector<128x32xf32>
    %cst_8 = arith.constant 0.000000e+00 : f32
    %13 = vector.broadcast %cst_8 : f32 to vector<128x32xf32>
    %14 = arith.maximumf %12, %13 : vector<128x32xf32>
    %c40 = arith.constant 40 : index
    %c0_9 = arith.constant 0 : index
    %15 = vector.load %arg4[%c40, %c0_9] : memref<248x128xf32, #tpu.memory_space<vmem>>, vector<32x64xf32>
    %cst_10 = arith.constant dense<0.000000e+00> : vector<128x64xf32>
    %16 = tpu.matmul %14, %15, %cst_10 {dimension_numbers = #tpu.dot_dimension_numbers<[1], [0], [0], [1], [0, 0, 1, 1], [], []>} : vector<128x32xf32>, vector<32x64xf32>, vector<128x64xf32> -> vector<128x64xf32>
    %c234 = arith.constant 234 : index
    %c0_11 = arith.constant 0 : index
    %17 = vector.load %arg4[%c234, %c0_11] : memref<248x128xf32, #tpu.memory_space<vmem>>, vector<1x64xf32>
    %18 = vector.broadcast %17 : vector<1x64xf32> to vector<128x64xf32>
    %19 = arith.addf %16, %18 : vector<128x64xf32>
    %20 = vector.extract_strided_slice %19 {offsets = [0, 0], sizes = [128, 32], strides = [1, 1]} : vector<128x64xf32> to vector<128x32xf32>
    %21 = vector.extract_strided_slice %19 {offsets = [0, 32], sizes = [128, 32], strides = [1, 1]} : vector<128x64xf32> to vector<128x32xf32>
    %22 = vector.shape_cast %20 : vector<128x32xf32> to vector<16x8x32xf32>
    %23 = vector.shape_cast %21 : vector<128x32xf32> to vector<16x8x32xf32>
    %c240 = arith.constant 240 : index
    %c0_12 = arith.constant 0 : index
    %24 = vector.load %arg4[%c240, %c0_12] : memref<248x128xf32, #tpu.memory_space<vmem>>, vector<1x32xf32>
    %25 = vector.shape_cast %23 : vector<16x8x32xf32> to vector<16x8x1x32xf32>
    %26 = vector.shape_cast %22 : vector<16x8x32xf32> to vector<16x1x8x32xf32>
    %27 = vector.broadcast %25 : vector<16x8x1x32xf32> to vector<16x8x8x32xf32>
    %28 = vector.broadcast %26 : vector<16x1x8x32xf32> to vector<16x8x8x32xf32>
    %29 = arith.addf %27, %28 : vector<16x8x8x32xf32>
    %cst_13 = arith.constant 0.000000e+00 : f32
    %30 = vector.broadcast %cst_13 : f32 to vector<16x8x8x32xf32>
    %31 = arith.cmpf ogt, %29, %30 : vector<16x8x8x32xf32>
    %cst_14 = arith.constant 2.000000e-01 : f32
    %32 = vector.broadcast %cst_14 : f32 to vector<16x8x8x32xf32>
    %33 = arith.mulf %32, %29 : vector<16x8x8x32xf32>
    %34 = arith.select %31, %29, %33 : vector<16x8x8x32xi1>, vector<16x8x8x32xf32>
    %35 = vector.shape_cast %24 : vector<1x32xf32> to vector<1x1x1x32xf32>
    %36 = vector.broadcast %35 : vector<1x1x1x32xf32> to vector<16x8x8x32xf32>
    %37 = arith.mulf %34, %36 : vector<16x8x8x32xf32>
    %cst_15 = arith.constant dense<0.000000e+00> : vector<16x8x8xf32>
    %38 = vector.multi_reduction <add>, %37, %cst_15 [3] : vector<16x8x8x32xf32> to vector<16x8x8xf32>
    %c0_16 = arith.constant 0 : index
    %c0_17 = arith.constant 0 : index
    %c0_18 = arith.constant 0 : index
    %39 = vector.load %arg2[%c0_16, %c0_17, %c0_18] : memref<16x8x8xf32, #tpu.memory_space<vmem>>, vector<16x8x8xf32>
    %40 = tpu.iota {dimensions = array<i32: 1>} : vector<16x8x8xi32>
    %41 = tpu.iota {dimensions = array<i32: 2>} : vector<16x8x8xi32>
    %cst_19 = arith.constant 0.000000e+00 : f32
    %42 = vector.broadcast %cst_19 : f32 to vector<16x8x8xf32>
    %43 = arith.cmpf one, %39, %42 : vector<16x8x8xf32>
    %44 = arith.cmpi eq, %40, %41 : vector<16x8x8xi32>
    %45 = arith.ori %43, %44 : vector<16x8x8xi1>
    %cst_20 = arith.constant -1.000000e+30 : f32
    %46 = vector.broadcast %cst_20 : f32 to vector<16x8x8xf32>
    %47 = arith.select %45, %38, %46 : vector<16x8x8xi1>, vector<16x8x8xf32>
    %cst_21 = arith.constant dense<0xFF800000> : vector<16x8xf32>
    %48 = vector.multi_reduction <maximumf>, %47, %cst_21 [2] : vector<16x8x8xf32> to vector<16x8xf32>
    %49 = vector.shape_cast %48 : vector<16x8xf32> to vector<16x8x1xf32>
    %50 = vector.broadcast %49 : vector<16x8x1xf32> to vector<16x8x8xf32>
    %51 = arith.subf %47, %50 : vector<16x8x8xf32>
    %52 = math.exp %51 : vector<16x8x8xf32>
    %cst_22 = arith.constant dense<0.000000e+00> : vector<16x8xf32>
    %53 = vector.multi_reduction <add>, %52, %cst_22 [2] : vector<16x8x8xf32> to vector<16x8xf32>
    %54 = vector.shape_cast %53 : vector<16x8xf32> to vector<16x8x1xf32>
    %55 = vector.broadcast %54 : vector<16x8x1xf32> to vector<16x8x8xf32>
    %56 = arith.divf %52, %55 : vector<16x8x8xf32>
    "tpu.trace_start"() <{level = 10 : i32, message = "gts,gsh->gth"}> : () -> ()
    %cst_23 = arith.constant dense<0.000000e+00> : vector<16x8x32xf32>
    %57 = tpu.matmul %56, %22, %cst_23 {dimension_numbers = #tpu.dot_dimension_numbers<[2], [1], [1], [2], [0, 0, 0, 1, 1, 2], [0], [0]>} : vector<16x8x8xf32>, vector<16x8x32xf32>, vector<16x8x32xf32> -> vector<16x8x32xf32>
    "tpu.trace_stop"() : () -> ()
    %58 = vector.shape_cast %57 : vector<16x8x32xf32> to vector<128x32xf32>
    %c235 = arith.constant 235 : index
    %c0_24 = arith.constant 0 : index
    %59 = vector.load %arg4[%c235, %c0_24] : memref<248x128xf32, #tpu.memory_space<vmem>>, vector<1x32xf32>
    %60 = vector.broadcast %59 : vector<1x32xf32> to vector<128x32xf32>
    %61 = arith.addf %58, %60 : vector<128x32xf32>
    %cst_25 = arith.constant 0.000000e+00 : f32
    %62 = vector.broadcast %cst_25 : f32 to vector<128x32xf32>
    %63 = arith.maximumf %61, %62 : vector<128x32xf32>
    %c72 = arith.constant 72 : index
    %c0_26 = arith.constant 0 : index
    %64 = vector.load %arg4[%c72, %c0_26] : memref<248x128xf32, #tpu.memory_space<vmem>>, vector<32x32xf32>
    %cst_27 = arith.constant dense<0.000000e+00> : vector<128x32xf32>
    %65 = tpu.matmul %63, %64, %cst_27 {dimension_numbers = #tpu.dot_dimension_numbers<[1], [0], [0], [1], [0, 0, 1, 1], [], []>} : vector<128x32xf32>, vector<32x32xf32>, vector<128x32xf32> -> vector<128x32xf32>
    %c236 = arith.constant 236 : index
    %c0_28 = arith.constant 0 : index
    %66 = vector.load %arg4[%c236, %c0_28] : memref<248x128xf32, #tpu.memory_space<vmem>>, vector<1x32xf32>
    %67 = vector.broadcast %66 : vector<1x32xf32> to vector<128x32xf32>
    %68 = arith.addf %65, %67 : vector<128x32xf32>
    %cst_29 = arith.constant 0.000000e+00 : f32
    %69 = vector.broadcast %cst_29 : f32 to vector<128x32xf32>
    %70 = arith.maximumf %68, %69 : vector<128x32xf32>
    %c104 = arith.constant 104 : index
    %c0_30 = arith.constant 0 : index
    %71 = vector.load %arg4[%c104, %c0_30] : memref<248x128xf32, #tpu.memory_space<vmem>>, vector<32x32xf32>
    %cst_31 = arith.constant dense<0.000000e+00> : vector<128x32xf32>
    %72 = tpu.matmul %70, %71, %cst_31 {dimension_numbers = #tpu.dot_dimension_numbers<[1], [0], [0], [1], [0, 0, 1, 1], [], []>} : vector<128x32xf32>, vector<32x32xf32>, vector<128x32xf32> -> vector<128x32xf32>
    %c136 = arith.constant 136 : index
    %c0_32 = arith.constant 0 : index
    %73 = vector.load %arg4[%c136, %c0_32] : memref<248x128xf32, #tpu.memory_space<vmem>>, vector<32x32xf32>
    %cst_33 = arith.constant dense<0.000000e+00> : vector<128x32xf32>
    %74 = tpu.matmul %14, %73, %cst_33 {dimension_numbers = #tpu.dot_dimension_numbers<[1], [0], [0], [1], [0, 0, 1, 1], [], []>} : vector<128x32xf32>, vector<32x32xf32>, vector<128x32xf32> -> vector<128x32xf32>
    %75 = arith.addf %72, %74 : vector<128x32xf32>
    %c237 = arith.constant 237 : index
    %c0_34 = arith.constant 0 : index
    %76 = vector.load %arg4[%c237, %c0_34] : memref<248x128xf32, #tpu.memory_space<vmem>>, vector<1x32xf32>
    %77 = vector.broadcast %76 : vector<1x32xf32> to vector<128x32xf32>
    %78 = arith.addf %75, %77 : vector<128x32xf32>
    %cst_35 = arith.constant 0.000000e+00 : f32
    %79 = vector.broadcast %cst_35 : f32 to vector<128x32xf32>
    %80 = arith.maximumf %78, %79 : vector<128x32xf32>
    %c168 = arith.constant 168 : index
    %c0_36 = arith.constant 0 : index
    %81 = vector.load %arg4[%c168, %c0_36] : memref<248x128xf32, #tpu.memory_space<vmem>>, vector<32x32xf32>
    %cst_37 = arith.constant dense<0.000000e+00> : vector<128x32xf32>
    %82 = tpu.matmul %80, %81, %cst_37 {dimension_numbers = #tpu.dot_dimension_numbers<[1], [0], [0], [1], [0, 0, 1, 1], [], []>} : vector<128x32xf32>, vector<32x32xf32>, vector<128x32xf32> -> vector<128x32xf32>
    %c238 = arith.constant 238 : index
    %c0_38 = arith.constant 0 : index
    %83 = vector.load %arg4[%c238, %c0_38] : memref<248x128xf32, #tpu.memory_space<vmem>>, vector<1x32xf32>
    %84 = vector.broadcast %83 : vector<1x32xf32> to vector<128x32xf32>
    %85 = arith.addf %82, %84 : vector<128x32xf32>
    %cst_39 = arith.constant 0.000000e+00 : f32
    %86 = vector.broadcast %cst_39 : f32 to vector<128x32xf32>
    %87 = arith.maximumf %85, %86 : vector<128x32xf32>
    %c200 = arith.constant 200 : index
    %c0_40 = arith.constant 0 : index
    %88 = vector.load %arg4[%c200, %c0_40] : memref<248x128xf32, #tpu.memory_space<vmem>>, vector<32x5xf32>
    %cst_41 = arith.constant dense<0.000000e+00> : vector<128x5xf32>
    %89 = tpu.matmul %87, %88, %cst_41 {dimension_numbers = #tpu.dot_dimension_numbers<[1], [0], [0], [1], [0, 0, 1, 1], [], []>} : vector<128x32xf32>, vector<32x5xf32>, vector<128x5xf32> -> vector<128x5xf32>
    %c239 = arith.constant 239 : index
    %c0_42 = arith.constant 0 : index
    %90 = vector.load %arg4[%c239, %c0_42] : memref<248x128xf32, #tpu.memory_space<vmem>>, vector<1x5xf32>
    %91 = vector.broadcast %90 : vector<1x5xf32> to vector<128x5xf32>
    %92 = arith.addf %89, %91 : vector<128x5xf32>
    %93 = vector.extract_strided_slice %92 {offsets = [0, 0], sizes = [128, 4], strides = [1, 1]} : vector<128x5xf32> to vector<128x4xf32>
    %94 = vector.extract_strided_slice %92 {offsets = [0, 4], sizes = [128, 1], strides = [1, 1]} : vector<128x5xf32> to vector<128x1xf32>
    %95 = vector.broadcast %94 : vector<128x1xf32> to vector<128x4xf32>
    %96 = arith.addf %95, %93 : vector<128x4xf32>
    %cst_43 = arith.constant dense<0.000000e+00> : vector<128xf32>
    %97 = vector.multi_reduction <add>, %93, %cst_43 [1] : vector<128x4xf32> to vector<128xf32>
    %98 = vector.shape_cast %97 : vector<128xf32> to vector<128x1xf32>
    %cst_44 = arith.constant 4.000000e+00 : f32
    %99 = vector.broadcast %cst_44 : f32 to vector<128x1xf32>
    %100 = arith.divf %98, %99 : vector<128x1xf32>
    %101 = vector.broadcast %100 : vector<128x1xf32> to vector<128x4xf32>
    %102 = arith.subf %96, %101 : vector<128x4xf32>
    %c0_45 = arith.constant 0 : index
    %c0_46 = arith.constant 0 : index
    %103 = vector.load %arg3[%c0_45, %c0_46] : memref<128x1xf32, #tpu.memory_space<vmem>>, vector<128x1xf32>
    %104 = vector.broadcast %103 : vector<128x1xf32> to vector<128x4xf32>
    %105 = arith.mulf %102, %104 : vector<128x4xf32>
    %c0_47 = arith.constant 0 : index
    %c0_48 = arith.constant 0 : index
    %106 = vector.load %arg5[%c0_47, %c0_48] : memref<128x4xf32, #tpu.memory_space<vmem>>, vector<128x4xf32>
    tpu.vector_store %arg5[%c0_47, %c0_48], %105 {strides = array<i32>} : memref<128x4xf32, #tpu.memory_space<vmem>>, vector<128x4xf32>,
    return
  }
  func.func @transform_0(%arg0: i32) -> (i32, i32) {
    %c0_i32 = arith.constant 0 : i32
    %c0_i32_0 = arith.constant 0 : i32
    return %arg0, %c0_i32 : i32, i32
  }
  func.func @transform_1(%arg0: i32) -> (i32, i32, i32) {
    %c0_i32 = arith.constant 0 : i32
    %c0_i32_0 = arith.constant 0 : i32
    %c0_i32_1 = arith.constant 0 : i32
    return %arg0, %c0_i32, %c0_i32_0 : i32, i32, i32
  }
  func.func @transform_2(%arg0: i32) -> (i32, i32) {
    %c0_i32 = arith.constant 0 : i32
    %c0_i32_0 = arith.constant 0 : i32
    return %arg0, %c0_i32 : i32, i32
  }
  func.func @transform_3(%arg0: i32) -> (i32, i32) {
    %c0_i32 = arith.constant 0 : i32
    %c0_i32_0 = arith.constant 0 : i32
    %c0_i32_1 = arith.constant 0 : i32
    return %c0_i32, %c0_i32_0 : i32, i32
  }
  func.func @transform_4(%arg0: i32) -> (i32, i32) {
    %c0_i32 = arith.constant 0 : i32
    %c0_i32_0 = arith.constant 0 : i32
    return %arg0, %c0_i32 : i32, i32
  }
}

</mosaic_0001>

<bundles_post_ra>
// kernel: graph_model_forward.1
= control target key start
LH: loop header
LB: loop body
LE: loop exit
PB: predicated region body
PF: predicated region fallthrough
CT: control target
= control target key end

     0   :  { %s8451_s15 = smov 0   ;;  %s11236_s0 = inlined_call_operand.vmem [shape: f32[256,8], index: 0, kind: input, shape index: {}]   ;;  %s11237_s1 = inlined_call_operand.vmem [shape: f32[32,8,8], index: 1, kind: input, shape index: {}]   ;;  %s11238_s2 = inlined_call_operand.vmem [shape: f32[256,1], index: 2, kind: input, shape index: {}]   ;;  %s11239_s3 = inlined_call_operand.vmem [shape: f32[248,128], index: 3, kind: input, shape index: {}]   ;;  %s11240_s4 = inlined_call_operand.vmem [shape: f32[256,4], index: 4, kind: output, shape index: {}]  }
   0x1 LB: > { %s7563_s16 = sadd.s32 4294967295, %s8417_s15   ;;  %p7567_p0 = scmp.ge.s32.totalorder %s8417_s15, 1  ;;  %s8417_s15 = sphi %s8451_s15, %s14_s15  }
   0x2   : > { %p185_p1 = scmp.lt.s32.totalorder %s8417_s15, 3 }
   0x4   : > { %p186_p2 = pnand %p7567_p0, %p185_p1 }
   0x6   : > { %189 = sbr.rel (%p186_p2) target bundleno = 3302 (0xce6), region = 36 }
   0xd   : > { %v261_v0 = vld [vmem:[%s11239_s3] sm:$0xff]  ;;  %s7568_s19 = sshll.u32 %s7563_s16, 4  ;;  %v477_v1 = vld [vmem:[%s11239_s3 + $0x8] sm:$0xff]  ;;  %v478_v2 = vld [vmem:[%s11239_s3 + $0x10] sm:$0xff]  ;;  %vm267_vm0 = vcmask 64512   ;;  %vm486_vm1 = vcmask 261120  }
   0xe   : > { %7920 = vmatprep.subr.mxu0 %v261_v0  ;;  %p222_p3 = scmp.lt.s32.totalorder %s7568_s19, 31  ;;  %v8250_v3 = vpack.c.bf16 %v478_v2, %v477_v1  ;;  %v479_v4 = vld [vmem:[%s11239_s3 + $0x18] sm:$0xff]  ;;  %v480_v5 = vld [vmem:[%s11239_s3 + $0x20] sm:$0xff]  ;;  %v696_v23 = vld [vmem:[%s11239_s3 + $0x28] sm:$0xff]  ;;  %s8422_s24 = smov 96  }
   0xf   : > { %7921 = vmatpush3.msra.mxu0 %v261_v0  ;;  %v8254_v6 = vpack.c.bf16 %v480_v5, %v479_v4  ;;  %v697_v24 = vld [vmem:[%s11239_s3 + $0x30] sm:$0xff]  ;;  %v7576_v26 = vld [vmem:[%s11239_s3 + $0xe8] ss:$0 sm:$0xff] }
  0x10   : > { %s11435_s19 = smov (!%p222_p3, %s7568_s19), 31  ;;  %8251 = vmatprep.subr.bf16.mxu0 %v8250_v3  ;;  %8306 = vmatprep.subr.bf16.mxu1 %v8250_v3  ;;  %v8258_v25 = vpack.c.bf16 %v697_v24, %v696_v23 }
  0x11   : > { %8308 = vmatpush3.bf16.msra.mxu1 %v8250_v3  ;;  %s8474_s28 = sshll.u32 %s11435_s19, 3  ;;  %s8419_s19 = smov 32  }
  0x12   : > { %8307 = vmatprep.subr.bf16.mxu1 %v8254_v6  ;;  %s8480_s5 = scalar_lea.vmem %s11236_s0, %s8474_s28  ;;  %s10211_s27 = scalar_lea.vmem %s11237_s1, %s8474_s28 }
  0x13   : > { %v245_v7 = vld [vmem:[%s8480_s5] sm:$0xff]  ;;  %v246_v8 = vld [vmem:[%s8480_s5 + $0x8] sm:$0xff]  ;;  %v247_v9 = vld [vmem:[%s8480_s5 + $0x10] sm:$0xff]  ;;  %s11141_s10 = scalar_lea.vmem %s11240_s4, %s8474_s28 }
  0x14   : > { %7922 = vmatprep.mubr.msk.f32.mxu0 %vm267_vm0, %v245_v7  ;;  %v248_v10 = vld [vmem:[%s8480_s5 + $0x18] sm:$0xff]  ;;  %v249_v11 = vld [vmem:[%s8480_s5 + $0x20] sm:$0xff]  ;;  %v250_v12 = vld [vmem:[%s8480_s5 + $0x28] sm:$0xff] }
  0x15   : > { %8309 = vmatpush3.bf16.msra.mxu1 %v8254_v6  ;;  %7923 = vmatmul.mubr.msk.f32.vlgmr.msra.gmra.mrb[0].mxu0 %vm267_vm0, %v246_v8  ;;  %v251_v13 = vld [vmem:[%s8480_s5 + $0x30] sm:$0xff]  ;;  %v252_v14 = vld [vmem:[%s8480_s5 + $0x38] sm:$0xff]  ;;  %v253_v15 = vld [vmem:[%s8480_s5 + $0x40] sm:$0xff] }
  0x16   : > { %7925 = vmatprep.mubr.msk.f32.mxu0 %vm267_vm0, %v247_v9  ;;  %8253 = vmatpush3.bf16.msra.mxu0 %v8250_v3  ;;  %v254_v16 = vld [vmem:[%s8480_s5 + $0x48] sm:$0xff]  ;;  %v255_v17 = vld [vmem:[%s8480_s5 + $0x50] sm:$0xff]  ;;  %v256_v18 = vld [vmem:[%s8480_s5 + $0x58] sm:$0xff] }
  0x17   : > { %8255 = vmatprep.subr.bf16.mxu0 %v8254_v6  ;;  %v257_v19 = vld [vmem:[%s8480_s5 + $0x60] sm:$0xff]  ;;  %v258_v20 = vld [vmem:[%s8480_s5 + $0x68] sm:$0xff]  ;;  %v259_v21 = vld [vmem:[%s8480_s5 + $0x70] sm:$0xff] }
  0x18   : > { %v260_v22 = vld [vmem:[%s8480_s5 + $0x78] sm:$0xff]  ;;  %s11005_s5 = scalar_lea.vmem %s11238_s2, %s8474_s28 }
  0x19   : > { %7926 = vmatmul.mubr.msk.f32.gmra.mrb[2].mxu0 %vm267_vm0, %v248_v10 }
  0x1a   : > { %7928 = vmatprep.mubr.msk.f32.mxu0 %vm267_vm0, %v249_v11  ;;  %8257 = vmatpush3.bf16.msra.mxu0 %v8254_v6  ;;  %v698_v11 = vld [vmem:[%s11239_s3 + $0x38] sm:$0xff] }
  0x1b   : > { %8259 = vmatprep.subr.bf16.mxu0 %v8258_v25 }
  0x1d   : > { %7929 = vmatmul.mubr.msk.f32.gmra.mrb[4].mxu0 %vm267_vm0, %v250_v12  ;;  %v699_v12 = vld [vmem:[%s11239_s3 + $0x40] sm:$0xff] }
  0x1e   : > { %7931 = vmatprep.mubr.msk.f32.mxu0 %vm267_vm0, %v251_v13  ;;  %v8262_v13 = vpack.c.bf16 %v699_v12, %v698_v11 }
  0x21   : > { %7932 = vmatmul.mubr.msk.f32.gmra.mrb[6].mxu0 %vm267_vm0, %v252_v14  ;;  %v7627_v14 = vld [vmem:[%s11239_s3 + $0xf0] ss:$0 sm:$0xff] }
  0x22   : > { %7934 = vmatprep.mubr.msk.f32.mxu0 %vm267_vm0, %v253_v15  ;;  %2904 = vrot.lane.b32.xlu1 %v7627_v14, %s8419_s19  ;;  %v7593_v15 = vld [vmem:[%s11239_s3 + $0xe9] ss:$0 sm:$0xff] }
  0x25   : > { %7935 = vmatmul.mubr.msk.f32.gmra.mrb[8].mxu0 %vm267_vm0, %v254_v16 }
  0x26   : > { %7937 = vmatprep.mubr.msk.f32.mxu0 %vm267_vm0, %v255_v17 }
  0x29   : > { %7938 = vmatmul.mubr.msk.f32.gmra.mrb[10].mxu0 %vm267_vm0, %v256_v18 }
  0x2a   : > { %7940 = vmatprep.mubr.msk.f32.mxu0 %vm267_vm0, %v257_v19 }
  0x2d   : > { %7941 = vmatmul.mubr.msk.f32.gmra.mrb[12].mxu0 %vm267_vm0, %v258_v20 }
  0x2e   : > { %7943 = vmatprep.mubr.msk.f32.mxu0 %vm267_vm0, %v259_v21 }
  0x31   : > { %7944 = vmatmul.mubr.msk.f32.gmra.mrb[14].mxu0 %vm267_vm0, %v260_v22 }
  0xe8   : > { %v7924_v27 = vpop.f32.mrb[0].mxu0 }
  0xe9   : > { %v388_v28 = vadd.f32 %v7924_v27, %v7576_v26  ;;  %v382_v29 = vpop.f32.mrb[1].mxu0 }
  0xea   : > { %v383_v30 = vadd.f32 %v7576_v26, %v382_v29 }
  0xeb   : > { %v462_v33 = vmax.f32 %v388_v28, 0.0 }
  0xec   : > { %v461_v31 = vmax.f32 %v383_v30, 0.0  ;;  %v7927_v32 = vpop.f32.mrb[2].mxu0 }
  0xed   : > { %v398_v34 = vadd.f32 %v7927_v32, %v7576_v26  ;;  %v392_v35 = vpop.f32.mrb[3].mxu0 }
  0xee   : > { %v393_v36 = vadd.f32 %v7576_v26, %v392_v35  ;;  %7954 = vmatprep.mubr.msk.f32.mxu0 %vm486_vm1, %v461_v31 }
  0xef   : > { %v464_v37 = vmax.f32 %v398_v34, 0.0  ;;  %7955 = vmatmul.mubr.msk.f32.vlgmr.msra.gmra.mrb[16].mxu0 %vm486_vm1, %v462_v33 }
  0xf0   : > { %v463_v38 = vmax.f32 %v393_v36, 0.0  ;;  %v7930_v39 = vpop.f32.mrb[4].mxu0  ;;  %8261 = vmatpush3.bf16.msra.mxu0 %v8258_v25 }
  0xf1   : > { %v408_v40 = vadd.f32 %v7930_v39, %v7576_v26  ;;  %v402_v41 = vpop.f32.mrb[5].mxu0  ;;  %8263 = vmatprep.subr.bf16.mxu0 %v8262_v13 }
  0xf2   : > { %v403_v42 = vadd.f32 %v7576_v26, %v402_v41  ;;  %7957 = vmatprep.mubr.msk.f32.mxu0 %vm486_vm1, %v463_v38 }
  0xf3   : > { %v466_v43 = vmax.f32 %v408_v40, 0.0  ;;  %7958 = vmatmul.mubr.msk.f32.gmra.mrb[18].mxu0 %vm486_vm1, %v464_v37 }
  0xf4   : > { %v465_v44 = vmax.f32 %v403_v42, 0.0  ;;  %v7933_v45 = vpop.f32.mrb[6].mxu0  ;;  %8265 = vmatpush3.bf16.msra.mxu0 %v8262_v13 }
  0xf5   : > { %v418_v46 = vadd.f32 %v7933_v45, %v7576_v26  ;;  %v412_v47 = vpop.f32.mrb[7].mxu0 }
  0xf6   : > { %v413_v48 = vadd.f32 %v7576_v26, %v412_v47  ;;  %7960 = vmatprep.mubr.msk.f32.mxu0 %vm486_vm1, %v465_v44 }
  0xf7   : > { %v468_v49 = vmax.f32 %v418_v46, 0.0  ;;  %7961 = vmatmul.mubr.msk.f32.gmra.mrb[20].mxu0 %vm486_vm1, %v466_v43 }
  0xf8   : > { %v467_v50 = vmax.f32 %v413_v48, 0.0  ;;  %v7936_v51 = vpop.f32.mrb[8].mxu0 }
  0xf9   : > { %v428_v52 = vadd.f32 %v7936_v51, %v7576_v26  ;;  %v422_v53 = vpop.f32.mrb[9].mxu0 }
  0xfa   : > { %v423_v54 = vadd.f32 %v7576_v26, %v422_v53  ;;  %7963 = vmatprep.mubr.msk.f32.mxu1 %vm486_vm1, %v467_v50 }
  0xfb   : > { %v470_v55 = vmax.f32 %v428_v52, 0.0  ;;  %7964 = vmatmul.mubr.msk.f32.vlgmr.msra.gmra.mrb[0].mxu1 %vm486_vm1, %v468_v49 }
  0xfc   : > { %v469_v56 = vmax.f32 %v423_v54, 0.0  ;;  %v7939_v57 = vpop.f32.mrb[10].mxu0 }
  0xfd   : > { %v438_v58 = vadd.f32 %v7939_v57, %v7576_v26  ;;  %v432_v59 = vpop.f32.mrb[11].mxu0 }
  0xfe   : > { %v433_v60 = vadd.f32 %v7576_v26, %v432_v59  ;;  %7966 = vmatprep.mubr.msk.f32.mxu1 %vm486_vm1, %v469_v56 }
  0xff   : > { %v472_v61 = vmax.f32 %v438_v58, 0.0  ;;  %7967 = vmatmul.mubr.msk.f32.gmra.mrb[2].mxu1 %vm486_vm1, %v470_v55 }
 0x100   : > { %v471_v62 = vmax.f32 %v433_v60, 0.0  ;;  %v7942_v63 = vpop.f32.mrb[12].mxu0 }
 0x101   : > { %v448_v0 = vadd.f32 %v7942_v63, %v7576_v26  ;;  %v442_v1 = vpop.f32.mrb[13].mxu0 }
 0x102   : > { %v443_v2 = vadd.f32 %v7576_v26, %v442_v1  ;;  %7969 = vmatprep.mubr.msk.f32.mxu1 %vm486_vm1, %v471_v62  ;;  %v7610_v1 = vld [vmem:[%s11239_s3 + $0xea] ss:$0 sm:$0xff] }
 0x103   : > { %v474_v3 = vmax.f32 %v448_v0, 0.0  ;;  %7970 = vmatmul.mubr.msk.f32.gmra.mrb[4].mxu1 %vm486_vm1, %v472_v61  ;;  %v11257_v0 = vmov 0.0  }
 0x104   : > { %v473_v4 = vmax.f32 %v443_v2, 0.0  ;;  %v7945_v5 = vpop.f32.mrb[14].mxu0  ;;  %8015 = vmatprep.subr.mxu1 %v11257_v0  ;;  %8010 = vmatprep.subr.mxu0 %v11257_v0 }
 0x105   : > { %v458_v6 = vadd.f32 %v7945_v5, %v7576_v26  ;;  %v452_v7 = vpop.f32.mrb[15].mxu0 }
 0x106   : > { %v453_v8 = vadd.f32 %v7576_v26, %v452_v7  ;;  %7972 = vmatprep.mubr.msk.f32.mxu1 %vm486_vm1, %v473_v4 }
 0x107   : > { %v476_v9 = vmax.f32 %v458_v6, 0.0  ;;  %7973 = vmatmul.mubr.msk.f32.gmra.mrb[6].mxu1 %vm486_vm1, %v474_v3 }
 0x108   : > { %v475_v10 = vmax.f32 %v453_v8, 0.0 }
 0x10a   : > { %7975 = vmatprep.mubr.msk.f32.mxu1 %vm486_vm1, %v475_v10 }
 0x10b   : > { %7976 = vmatmul.mubr.msk.f32.gmra.mrb[8].mxu1 %vm486_vm1, %v476_v9 }
 0x1c2   : > { %v7956_v16 = vpop.f32.mrb[16].mxu0 }
 0x1c3   : > { %v8552_v17 = vadd.f32 %v7956_v16, %v7593_v15  ;;  %v601_v18 = vpop.f32.mrb[17].mxu0 }
 0x1c4   : > { %v8554_v19 = vadd.f32 %v7593_v15, %v601_v18 }
 0x1c5   : > { %11292 = vst [vmem:[#allocation2_spill] sm:$0xff] %v8552_v17  ;;  %v11255_v22 = vmax.f32 %v8552_v17, 0.0 }
 0x1c6   : > { %11293 = vst [vmem:[#allocation3_spill] sm:$0xff] %v8554_v19  ;;  %v11256_v20 = vmax.f32 %v8554_v19, 0.0  ;;  %v7959_v21 = vpop.f32.mrb[18].mxu0 }
 0x1c7   : > { %v8558_v23 = vadd.f32 %v7959_v21, %v7593_v15  ;;  %v611_v24 = vpop.f32.mrb[19].mxu0 }
 0x1c8   : > { %v8560_v25 = vadd.f32 %v7593_v15, %v611_v24  ;;  %7986 = vmatprep.mubr.msk.f32.mxu0 %vm486_vm1, %v11256_v20 }
 0x1c9   : > { %11294 = vst [vmem:[#allocation4_spill] sm:$0xff] %v8558_v23  ;;  %v11253_v26 = vmax.f32 %v8558_v23, 0.0  ;;  %7987 = vmatmul.mubr.msk.f32.vlgmr.msra.gmra.mrb[22].mxu0 %vm486_vm1, %v11255_v22 }
 0x1ca   : > { %11295 = vst [vmem:[#allocation5_spill] sm:$0xff] %v8560_v25  ;;  %v11254_v27 = vmax.f32 %v8560_v25, 0.0  ;;  %v7962_v28 = vpop.f32.mrb[20].mxu0 }
 0x1cb   : > { %v8570_v29 = vadd.f32 %v7962_v28, %v7593_v15  ;;  %v621_v30 = vpop.f32.mrb[21].mxu0 }
 0x1cc   : > { %v8572_v31 = vadd.f32 %v7593_v15, %v621_v30  ;;  %7989 = vmatprep.mubr.msk.f32.mxu0 %vm486_vm1, %v11254_v27 }
 0x1cd   : > { %11296 = vst [vmem:[#allocation6_spill] sm:$0xff] %v8570_v29  ;;  %v11251_v32 = vmax.f32 %v8570_v29, 0.0  ;;  %7990 = vmatmul.mubr.msk.f32.gmra.mrb[24].mxu0 %vm486_vm1, %v11253_v26 }
 0x1ce   : > { %11297 = vst [vmem:[#allocation7_spill] sm:$0xff] %v8572_v31  ;;  %v11252_v33 = vmax.f32 %v8572_v31, 0.0  ;;  %v7965_v34 = vpop.f32.mrb[0].mxu1 }
 0x1cf   : > { %v8582_v35 = vadd.f32 %v7965_v34, %v7593_v15  ;;  %v631_v36 = vpop.f32.mrb[1].mxu1 }
 0x1d0   : > { %v8584_v37 = vadd.f32 %v7593_v15, %v631_v36  ;;  %7992 = vmatprep.mubr.msk.f32.mxu0 %vm486_vm1, %v11252_v33 }
 0x1d1   : > { %11298 = vst [vmem:[#allocation8_spill] sm:$0xff] %v8582_v35  ;;  %v11249_v38 = vmax.f32 %v8582_v35, 0.0  ;;  %7993 = vmatmul.mubr.msk.f32.gmra.mrb[26].mxu0 %vm486_vm1, %v11251_v32 }
 0x1d2   : > { %11299 = vst [vmem:[#allocation9_spill] sm:$0xff] %v8584_v37  ;;  %v11250_v39 = vmax.f32 %v8584_v37, 0.0  ;;  %v7968_v40 = vpop.f32.mrb[2].mxu1 }
 0x1d3   : > { %v8594_v41 = vadd.f32 %v7968_v40, %v7593_v15  ;;  %v641_v42 = vpop.f32.mrb[3].mxu1 }
 0x1d4   : > { %v8596_v43 = vadd.f32 %v7593_v15, %v641_v42  ;;  %7995 = vmatprep.mubr.msk.f32.mxu0 %vm486_vm1, %v11250_v39 }
 0x1d5   : > { %11300 = vst [vmem:[#allocation10_spill] sm:$0xff] %v8594_v41  ;;  %v11247_v44 = vmax.f32 %v8594_v41, 0.0  ;;  %7996 = vmatmul.mubr.msk.f32.gmra.mrb[28].mxu0 %vm486_vm1, %v11249_v38 }
 0x1d6   : > { %11301 = vst [vmem:[#allocation11_spill] sm:$0xff] %v8596_v43  ;;  %v11248_v45 = vmax.f32 %v8596_v43, 0.0  ;;  %v7971_v46 = vpop.f32.mrb[4].mxu1 }
 0x1d7   : > { %v8606_v47 = vadd.f32 %v7971_v46, %v7593_v15  ;;  %v651_v48 = vpop.f32.mrb[5].mxu1 }
 0x1d8   : > { %v8608_v49 = vadd.f32 %v7593_v15, %v651_v48  ;;  %7998 = vmatprep.mubr.msk.f32.mxu0 %vm486_vm1, %v11248_v45 }
 0x1d9   : > { %11302 = vst [vmem:[#allocation12_spill] sm:$0xff] %v8606_v47  ;;  %v11245_v50 = vmax.f32 %v8606_v47, 0.0  ;;  %7999 = vmatmul.mubr.msk.f32.gmra.mrb[30].mxu0 %vm486_vm1, %v11247_v44 }
 0x1da   : > { %11303 = vst [vmem:[#allocation13_spill] sm:$0xff] %v8608_v49  ;;  %v11246_v51 = vmax.f32 %v8608_v49, 0.0  ;;  %v7974_v52 = vpop.f32.mrb[6].mxu1 }
 0x1db   : > { %v8618_v53 = vadd.f32 %v7974_v52, %v7593_v15  ;;  %v661_v54 = vpop.f32.mrb[7].mxu1 }
 0x1dc   : > { %v8620_v55 = vadd.f32 %v7593_v15, %v661_v54  ;;  %8001 = vmatprep.mubr.msk.f32.mxu0 %vm486_vm1, %v11246_v51 }
 0x1dd   : > { %11304 = vst [vmem:[#allocation14_spill] sm:$0xff] %v8618_v53  ;;  %v11243_v56 = vmax.f32 %v8618_v53, 0.0  ;;  %8002 = vmatmul.mubr.msk.f32.gmra.mrb[32].mxu0 %vm486_vm1, %v11245_v50 }
 0x1de   : > { %11305 = vst [vmem:[#allocation15_spill] sm:$0xff] %v8620_v55  ;;  %v11244_v57 = vmax.f32 %v8620_v55, 0.0  ;;  %v7977_v58 = vpop.f32.mrb[8].mxu1 }
 0x1df   : > { %v8630_v59 = vadd.f32 %v7977_v58, %v7593_v15  ;;  %v671_v60 = vpop.f32.mrb[9].mxu1 }
 0x1e0   : > { %v8632_v61 = vadd.f32 %v7593_v15, %v671_v60  ;;  %8004 = vmatprep.mubr.msk.f32.mxu0 %vm486_vm1, %v11244_v57 }
 0x1e1   : > { %11306 = vst [vmem:[#allocation16_spill] sm:$0xff] %v8630_v59  ;;  %v11241_v62 = vmax.f32 %v8630_v59, 0.0  ;;  %8005 = vmatmul.mubr.msk.f32.gmra.mrb[34].mxu0 %vm486_vm1, %v11243_v56 }
 0x1e2   : > { %11307 = vst [vmem:[#allocation17_spill] sm:$0xff] %v8632_v61  ;;  %v11242_v63 = vmax.f32 %v8632_v61, 0.0 }
 0x1e4   : > { %8007 = vmatprep.mubr.msk.f32.mxu0 %vm486_vm1, %v11242_v63 }
 0x1e5   : > { %8008 = vmatmul.mubr.msk.f32.gmra.mrb[36].mxu0 %vm486_vm1, %v11241_v62 }
 0x29c   : > { %v7988_v2 = vpop.f32.mrb[22].mxu0 }
 0x29d   : > { %v825_v3 = vadd.f32 %v7988_v2, %v7610_v1  ;;  %v819_v4 = vpop.f32.mrb[23].mxu0 }
 0x29e   : > { %v8653_v5 = vadd.f32 %v7610_v1, %v819_v4 }
 0x29f   : > { %2341 = vrot.lane.b32.xlu0 %v825_v3, %s8419_s19  ;;  %8016 = vmatpush3.msra.mxu1 %v825_v3 }
 0x2a0   : > { %v7991_v6 = vpop.f32.mrb[24].mxu0  ;;  %2339 = vrot.lane.b32.xlu1 %v8653_v5, %s8419_s19  ;;  %8011 = vmatpush3.msra.mxu0 %v8653_v5 }
 0x2a1   : > { %v8659_v7 = vadd.f32 %v7991_v6, %v7610_v1  ;;  %v829_v8 = vpop.f32.mrb[25].mxu0  ;;  %8020 = vmatprep.subr.mxu1 %v11257_v0  ;;  %8045 = vmatprep.subr.mxu0 %v11257_v0  ;;  %v8421_v6 = vmov 1966171168  }
 0x2a2   : > { %v8665_v9 = vadd.f32 %v7610_v1, %v829_v8  ;;  %v917_v8 = vunpack.c.l.s4 %v8421_v6 }
 0x2a3   : > { %11308 = vst [vmem:[#allocation18_spill] sm:$0xff] %v8659_v7  ;;  %2345 = vrot.lane.b32.xlu0 %v8659_v7, %s8419_s19 }
 0x2a4   : > { %11309 = vst [vmem:[#allocation19_spill] sm:$0xff] %v8665_v9  ;;  %v7994_v10 = vpop.f32.mrb[26].mxu0 }
 0x2a5   : > { %v839_v11 = vpop.f32.mrb[27].mxu0  ;;  %v8669_v13 = vadd.f32 %v7994_v10, %v7610_v1  ;;  %v11259_v10 = vlaneseq }
 0x2a6   : > { %v8667_v12 = vadd.f32 %v7610_v1, %v839_v11  ;;  %v918_v11 = vunpack.c.0.s8 %v917_v8 }
 0x2a7   : > { %11311 = vst [vmem:[#allocation21_spill] sm:$0xff] %v8669_v13  ;;  %2343 = vrot.lane.b32.xlu0 %v8665_v9, %s8419_s19 }
 0x2a8   : > { %11310 = vst [vmem:[#allocation20_spill] sm:$0xff] %v8667_v12  ;;  %v7997_v14 = vpop.f32.mrb[28].mxu0  ;;  %2347 = vrot.lane.b32.xlu1 %v8667_v12, %s8419_s19 }
 0x2a9   : > { %v849_v15 = vpop.f32.mrb[29].mxu0  ;;  %v8677_v16 = vadd.f32 %v7997_v14, %v7610_v1  ;;  %v8718_v14 = vshrl.u32 %v11259_v10, 7 }
 0x2aa   : > { %v8679_v18 = vadd.f32 %v7610_v1, %v849_v15 }
 0x2ab   : > { %2349 = vrot.lane.b32.xlu0 %v8669_v13, %s8419_s19  ;;  %11312 = vst [vmem:[#allocation22_spill] sm:$0xff] %v8677_v16  ;;  %11322 = vst [vmem:[#allocation32_spill] sm:$0xff] %v8718_v14  ;;  %v8721_v15 = vsub.s32 %v918_v11, %v8718_v14 }
 0x2ac   : > { %11313 = vst [vmem:[#allocation23_spill] sm:$0xff] %v8679_v18  ;;  %v8000_v21 = vpop.f32.mrb[30].mxu0  ;;  %2351 = vrot.lane.b32.xlu1 %v8679_v18, %s8419_s19 }
 0x2ad   : > { %v859_v24 = vpop.f32.mrb[31].mxu0  ;;  %v8685_v34 = vadd.f32 %v8000_v21, %v7610_v1  ;;  %v971_v21 = vrot.slane %v825_v3, %v8721_v15 }
 0x2ae   : > { %v8687_v36 = vadd.f32 %v7610_v1, %v859_v24  ;;  %v964_v24 = vcombine.high %v825_v3, %v825_v3 }
 0x2af   : > { %2353 = vrot.lane.b32.xlu0 %v8677_v16, %s8419_s19  ;;  %11314 = vst [vmem:[#allocation24_spill] sm:$0xff] %v8685_v34 }
 0x2b0   : > { %v8003_v28 = vpop.f32.mrb[32].mxu0  ;;  %11315 = vst [vmem:[#allocation25_spill] sm:$0xff] %v8687_v36  ;;  %2355 = vrot.lane.b32.xlu1 %v8687_v36, %s8419_s19 }
 0x2b1   : > { %v869_v30 = vpop.f32.mrb[33].mxu0  ;;  %v8693_v46 = vadd.f32 %v8003_v28, %v7610_v1  ;;  %v979_v28 = vcombine.high %v971_v21, %v971_v21 }
 0x2b2   : > { %v8695_v48 = vadd.f32 %v7610_v1, %v869_v30  ;;  %v915_v30 = vcombine.high %v8653_v5, %v8653_v5 }
 0x2b3   : > { %2357 = vrot.lane.b32.xlu0 %v8685_v34, %s8419_s19  ;;  %11316 = vst [vmem:[#allocation26_spill] sm:$0xff] %v8693_v46 }
 0x2b4   : > { %v8006_v40 = vpop.f32.mrb[34].mxu0  ;;  %11317 = vst [vmem:[#allocation27_spill] sm:$0xff] %v8695_v48  ;;  %2359 = vrot.lane.b32.xlu1 %v8695_v48, %s8419_s19  ;;  %v8732_v6 = vrot.slane %v915_v30, %v8721_v15  ;;  %v8751_v30 = vpop.permute.xlu1 %2904 }
 0x2b5   : > { %v879_v42 = vpop.f32.mrb[35].mxu0  ;;  %v8701_v58 = vadd.f32 %v8006_v40, %v7610_v1  ;;  %v922_v40 = vrot.slane %v8653_v5, %v8721_v15 }
 0x2b6   : > { %v8699_v52 = vadd.f32 %v7610_v1, %v879_v42  ;;  %v987_v42 = vrot.slane %v971_v21, %v8721_v15  ;;  %v931_v63 = vcombine.high %v8732_v6, %v8732_v6 }
 0x2b7   : > { %11319 = vst [vmem:[#allocation29_spill] sm:$0xff] %v8701_v58  ;;  %2361 = vrot.lane.b32.xlu0 %v8693_v46, %s8419_s19  ;;  %v930_v3 = vcombine.high %v922_v40, %v922_v40  ;;  %v8741_v5 = vrot.slane %v922_v40, %v8721_v15 }
 0x2b8   : > { %11318 = vst [vmem:[#allocation28_spill] sm:$0xff] %v8699_v52  ;;  %v8009_v54 = vpop.f32.mrb[36].mxu0  ;;  %2363 = vrot.lane.b32.xlu1 %v8699_v52, %s8419_s19  ;;  %v1009_v11 = vcombine.high %v987_v42, %v987_v42 }
 0x2b9   : > { %v889_v60 = vpop.f32.mrb[37].mxu0  ;;  %v8709_v2 = vadd.f32 %v8009_v54, %v7610_v1  ;;  %v1001_v54 = vrot.slane %v979_v28, %v8721_v15  ;;  %v8745_v28 = vrot.slane %v930_v3, %v8721_v15 }
 0x2ba   : > { %v8713_v4 = vadd.f32 %v7610_v1, %v889_v60  ;;  %v978_v1 = vrot.slane %v964_v24, %v8721_v15  ;;  %v8736_v24 = vsub.s32 0, %v8718_v14 }
 0x2bb   : > { %2365 = vrot.lane.b32.xlu0 %v8701_v58, %s8419_s19  ;;  %11320 = vst [vmem:[#allocation30_spill] sm:$0xff] %v8709_v2  ;;  %v1011_v62 = vcombine.high %v1001_v54, %v1001_v54 }
 0x2bc   : > { %11321 = vst [vmem:[#allocation31_spill] sm:$0xff] %v8713_v4  ;;  %2367 = vrot.lane.b32.xlu1 %v8713_v4, %s8419_s19  ;;  %v980_v60 = vcombine.high %v978_v1, %v978_v1  ;;  %v994_v8 = vrot.slane %v978_v1, %v8721_v15  ;;  %v8749_v1 = vrot.slane %v8659_v7, %v8721_v15 }
 0x2bd   : > { %v1738_v57 = vrot.slane %v1001_v54, %v8736_v24  ;;  %v1734_v50 = vrot.slane %v987_v42, %v8736_v24  ;;  %v1746_v51 = vrot.slane %v1011_v62, %v8736_v24  ;;  %v1742_v40 = vrot.slane %v1009_v11, %v8736_v24 }
 0x2be   : > { %v1008_v21 = vrot.slane %v980_v60, %v8721_v15  ;;  %v1010_v56 = vcombine.high %v994_v8, %v994_v8  ;;  %v8758_v60 = vrot.slane %v931_v63, %v8721_v15  ;;  %v1750_v45 = vrot.slane %v994_v8, %v8736_v24 }
 0x2bf   : > { %2369 = vrot.lane.b32.xlu0 %v8709_v2, %s8419_s19  ;;  %v1702_v38 = vrot.slane %v8741_v5, %v8736_v24 }
 0x2c0   : > { %v1754_v44 = vrot.slane %v1008_v21, %v8736_v24  ;;  %v1758_v62 = vrot.slane %v1010_v56, %v8736_v24  ;;  %v1012_v11 = vcombine.high %v1008_v21, %v1008_v21 }
 0x311   : > { %v2342_v3 = vpop.permute.xlu0 %2341 }
 0x312   : > { %v2396_v39 = vadd.f32 %v2342_v3, %v1738_v57  ;;  %v2395_v32 = vadd.f32 %v2342_v3, %v1734_v50  ;;  %v2398_v54 = vadd.f32 %v2342_v3, %v1746_v51  ;;  %v2397_v33 = vadd.f32 %v2342_v3, %v1742_v40  ;;  %v8765_v22 = vpop.permute.xlu1 %2339 }
 0x313   : > { %v2400_v42 = vadd.f32 %v2342_v3, %v1754_v44  ;;  %v2399_v26 = vadd.f32 %v2342_v3, %v1750_v45  ;;  %v2401_v50 = vadd.f32 %v2342_v3, %v1758_v62  ;;  %v962_v44 = vcombine.high %v8745_v28, %v8745_v28 }
 0x314   : > { %vm2524_vm2 = vcmp.gt.f32.partialorder %v2396_v39, 0.0  ;;  %v2652_v63 = vmul.f32 0.2, %v2396_v39  ;;  %vm2523_vm3 = vcmp.gt.f32.partialorder %v2395_v32, 0.0  ;;  %v2651_v27 = vmul.f32 0.2, %v2395_v32 }
 0x315   : > { %vm2526_vm4 = vcmp.gt.f32.partialorder %v2398_v54, 0.0  ;;  %v2654_v8 = vmul.f32 0.2, %v2398_v54  ;;  %vm2525_vm5 = vcmp.gt.f32.partialorder %v2397_v33, 0.0  ;;  %v2653_v20 = vmul.f32 0.2, %v2397_v33 }
 0x316   : > { %v2780_v0 = vsel %vm2524_vm2, %v2396_v39, %v2652_v63  ;;  %v2779_v57 = vsel %vm2523_vm3, %v2395_v32, %v2651_v27  ;;  %v2656_v21 = vmul.f32 0.2, %v2400_v42  ;;  %vm2528_vm6 = vcmp.gt.f32.partialorder %v2400_v42, 0.0 }
 0x317   : > { %v2916_v45 = vmul.f32 %v8751_v30, %v2780_v0  ;;  %v2915_v51 = vmul.f32 %v8751_v30, %v2779_v57  ;;  %v2782_v56 = vsel %vm2526_vm4, %v2398_v54, %v2654_v8  ;;  %v2781_v40 = vsel %vm2525_vm5, %v2397_v33, %v2653_v20 }
 0x318   : > { %v2387_v10 = vadd.f32 %v8765_v22, %v1702_v38  ;;  %vm2527_vm7 = vcmp.gt.f32.partialorder %v2399_v26, 0.0  ;;  %v2655_v27 = vmul.f32 0.2, %v2399_v26  ;;  %v1762_v32 = vrot.slane %v1012_v11, %v8736_v24 }
 0x319   : > { %3181 = vrot.lane.b32.xlu0 %v2916_v45, %s8422_s24  ;;  %3179 = vrot.lane.b32.xlu1 %v2915_v51, %s8422_s24  ;;  %v1077_v39 = vcombine.high %v8749_v1, %v8749_v1  ;;  %v2918_v0 = vmul.f32 %v8751_v30, %v2782_v56  ;;  %v1714_v54 = vrot.slane %v962_v44, %v8736_v24  ;;  %v2657_v62 = vmul.f32 0.2, %v2401_v50 }
 0x31a   : > { %v963_v20 = vcombine.high %v8758_v60, %v8758_v60  ;;  %v2917_v33 = vmul.f32 %v8751_v30, %v2781_v40  ;;  %v2784_v38 = vsel %vm2528_vm6, %v2400_v42, %v2656_v21  ;;  %v2402_v63 = vadd.f32 %v2342_v3, %v1762_v32 }
 0x31b   : > { %v2783_v8 = vsel %vm2527_vm7, %v2399_v26, %v2655_v27  ;;  %vm2529_vm8 = vcmp.gt.f32.partialorder %v2401_v50, 0.0  ;;  %v2643_v57 = vmul.f32 0.2, %v2387_v10  ;;  %v2390_v11 = vadd.f32 %v8765_v22, %v1714_v54  ;;  %v8800_v54 = vpop.permute.xlu0 %2345 }
 0x31c   : > { %v960_v45 = vcombine.high %v8741_v5, %v8741_v5  ;;  %v1062_v51 = vcombine.high %v8659_v7, %v8659_v7  ;;  %vm2515_vm9 = vcmp.gt.f32.partialorder %v2387_v10, 0.0  ;;  %v1706_v42 = vrot.slane %v8745_v28, %v8736_v24 }
 0x31d   : > { %3185 = vrot.lane.b32.xlu0 %v2918_v0, %s8422_s24  ;;  %3183 = vrot.lane.b32.xlu1 %v2917_v33, %s8422_s24  ;;  %v1099_v26 = vrot.slane %v1077_v39, %v8721_v15  ;;  %v2920_v3 = vmul.f32 %v8751_v30, %v2784_v38  ;;  %v1730_v44 = vrot.slane %v963_v20, %v8736_v24  ;;  %v2658_v21 = vmul.f32 0.2, %v2402_v63 }
 0x31e   : > { %v2919_v56 = vmul.f32 %v8751_v30, %v2783_v8  ;;  %v2785_v5 = vsel %vm2529_vm8, %v2401_v50, %v2657_v62  ;;  %v2388_v40 = vadd.f32 %v8765_v22, %v1706_v42  ;;  %v2771_v27 = vsel %vm2515_vm9, %v2387_v10, %v2643_v57 }
 0x31f   : > { %vm2530_vm10 = vcmp.gt.f32.partialorder %v2402_v63, 0.0  ;;  %v2646_v32 = vmul.f32 0.2, %v2390_v11  ;;  %v2394_v0 = vadd.f32 %v8765_v22, %v1730_v44  ;;  %v945_v28 = vrot.slane %v8732_v6, %v8721_v15 }
 0x320   : > { %v1076_v39 = vrot.slane %v1062_v51, %v8721_v15  ;;  %vm2518_vm11 = vcmp.gt.f32.partialorder %v2390_v11, 0.0  ;;  %v1710_v50 = vrot.slane %v960_v45, %v8736_v24  ;;  %v2921_v10 = vmul.f32 %v8751_v30, %v2785_v5 }
 0x321   : > { %3189 = vrot.lane.b32.xlu0 %v2920_v3, %s8422_s24  ;;  %3187 = vrot.lane.b32.xlu1 %v2919_v56, %s8422_s24  ;;  %v1802_v20 = vrot.slane %v1099_v26, %v8736_v24  ;;  %v1109_v33 = vcombine.high %v1099_v26, %v1099_v26  ;;  %v2907_v38 = vmul.f32 %v8751_v30, %v2771_v27  ;;  %v2644_v6 = vmul.f32 0.2, %v2388_v40 }
 0x322   : > { %v2786_v62 = vsel %vm2530_vm10, %v2402_v63, %v2658_v21  ;;  %v2389_v8 = vadd.f32 %v8765_v22, %v1710_v50  ;;  %v2774_v57 = vsel %vm2518_vm11, %v2390_v11, %v2646_v32  ;;  %vm2516_vm12 = vcmp.gt.f32.partialorder %v2388_v40, 0.0 }
 0x323   : > { %v2650_v51 = vmul.f32 0.2, %v2394_v0  ;;  %v2412_v42 = vadd.f32 %v8800_v54, %v1802_v20  ;;  %v1078_v3 = vcombine.high %v1076_v39, %v1076_v39  ;;  %vm2522_vm13 = vcmp.gt.f32.partialorder %v2394_v0, 0.0 }
 0x324   : > { %v1718_v45 = vrot.slane %v945_v28, %v8736_v24  ;;  %v1092_v26 = vrot.slane %v1076_v39, %v8721_v15  ;;  %v2922_v63 = vmul.f32 %v8751_v30, %v2786_v62  ;;  %v1810_v44 = vrot.slane %v1109_v33, %v8736_v24 }
 0x325   : > { %3191 = vrot.lane.b32.xlu1 %v2921_v10, %s8422_s24  ;;  %3163 = vrot.lane.b32.xlu0 %v2907_v38, %s8422_s24  ;;  %v961_v56 = vcombine.high %v945_v28, %v945_v28  ;;  %v2910_v11 = vmul.f32 %v8751_v30, %v2774_v57  ;;  %v2772_v5 = vsel %vm2516_vm12, %v2388_v40, %v2644_v6  ;;  %v2645_v21 = vmul.f32 0.2, %v2389_v8 }
 0x326   : > { %v2391_v27 = vadd.f32 %v8765_v22, %v1718_v45  ;;  %v2778_v32 = vsel %vm2522_vm13, %v2394_v0, %v2650_v51  ;;  %vm2517_vm14 = vcmp.gt.f32.partialorder %v2389_v8, 0.0  ;;  %v2668_v50 = vmul.f32 0.2, %v2412_v42 }
 0x327   : > { %v2414_v10 = vadd.f32 %v8800_v54, %v1810_v44  ;;  %v1020_v20 = vrot.slane %v8665_v9, %v8721_v15  ;;  %vm2540_vm15 = vcmp.gt.f32.partialorder %v2412_v42, 0.0  ;;  %v1722_v28 = vrot.slane %v8758_v60, %v8736_v24 }
 0x328   : > { %v2908_v40 = vmul.f32 %v8751_v30, %v2772_v5  ;;  %v1814_v39 = vrot.slane %v1092_v26, %v8736_v24  ;;  %v1726_v0 = vrot.slane %v961_v56, %v8736_v24  ;;  %v8829_v33 = vrot.slane %v1078_v3, %v8721_v15 }
 0x329   : > { %3193 = vrot.lane.b32.xlu1 %v2922_v63, %s8422_s24  ;;  %3169 = vrot.lane.b32.xlu0 %v2910_v11, %s8422_s24  ;;  %v2914_v38 = vmul.f32 %v8751_v30, %v2778_v32  ;;  %v2773_v62 = vsel %vm2517_vm14, %v2389_v8, %v2645_v21  ;;  %v2647_v6 = vmul.f32 0.2, %v2391_v27  ;;  %v2392_v57 = vadd.f32 %v8765_v22, %v1722_v28 }
 0x32a   : > { %v2796_v51 = vsel %vm2540_vm15, %v2412_v42, %v2668_v50  ;;  %vm2519_vm2 = vcmp.gt.f32.partialorder %v2391_v27, 0.0  ;;  %v2670_v45 = vmul.f32 0.2, %v2414_v10  ;;  %v2415_v60 = vadd.f32 %v8800_v54, %v1814_v39 }
 0x32b   : > { %v1085_v63 = vrot.slane %v8749_v1, %v8721_v15  ;;  %v1013_v44 = vcombine.high %v8665_v9, %v8665_v9  ;;  %vm2542_vm3 = vcmp.gt.f32.partialorder %v2414_v10, 0.0  ;;  %v1028_v8 = vcombine.high %v1020_v20, %v1020_v20 }
 0x32c   : > { %v2393_v3 = vadd.f32 %v8765_v22, %v1726_v0  ;;  %v1818_v42 = vrot.slane %v8829_v33, %v8736_v24  ;;  %v1108_v56 = vcombine.high %v1092_v26, %v1092_v26  ;;  %v2909_v11 = vmul.f32 %v8751_v30, %v2773_v62 }
 0x32d   : > { %3165 = vrot.lane.b32.xlu1 %v2908_v40, %s8422_s24  ;;  %3177 = vrot.lane.b32.xlu0 %v2914_v38, %s8422_s24  ;;  %v2932_v5 = vmul.f32 %v8751_v30, %v2796_v51  ;;  %v2775_v1 = vsel %vm2519_vm2, %v2391_v27, %v2647_v6  ;;  %v2648_v21 = vmul.f32 0.2, %v2392_v57  ;;  %v2798_v32 = vsel %vm2542_vm3, %v2414_v10, %v2670_v45 }
 0x32e   : > { %vm2520_vm4 = vcmp.gt.f32.partialorder %v2392_v57, 0.0  ;;  %v2671_v50 = vmul.f32 0.2, %v2415_v60  ;;  %v2416_v28 = vadd.f32 %v8800_v54, %v1818_v42  ;;  %v1107_v40 = vcombine.high %v1085_v63, %v1085_v63  ;;  %v8859_v42 = vpop.permute.xlu0 %2343 }
 0x32f   : > { %v1027_v39 = vrot.slane %v1013_v44, %v8721_v15  ;;  %vm2543_vm5 = vcmp.gt.f32.partialorder %v2415_v60, 0.0  ;;  %v1798_v22 = vrot.slane %v1085_v63, %v8736_v24  ;;  %v8851_v26 = vrot.slane %v1020_v20, %v8721_v15 }
 0x330   : > { %v1050_v27 = vrot.slane %v1028_v8, %v8721_v15  ;;  %v2911_v10 = vmul.f32 %v8751_v30, %v2775_v1  ;;  %v1822_v0 = vrot.slane %v1108_v56, %v8736_v24  ;;  %v2934_v38 = vmul.f32 %v8751_v30, %v2798_v32 }
 0x331   : > { %3167 = vrot.lane.b32.xlu1 %v2909_v11, %s8422_s24  ;;  %3213 = vrot.lane.b32.xlu0 %v2932_v5, %s8422_s24  ;;  %v2776_v62 = vsel %vm2520_vm4, %v2392_v57, %v2648_v21  ;;  %v2649_v6 = vmul.f32 0.2, %v2393_v3  ;;  %v2411_v51 = vadd.f32 %v8800_v54, %v1798_v22  ;;  %v2799_v45 = vsel %vm2543_vm5, %v2415_v60, %v2671_v50 }
 0x332   : > { %vm2521_vm6 = vcmp.gt.f32.partialorder %v2393_v3, 0.0  ;;  %v2672_v44 = vmul.f32 0.2, %v2416_v28  ;;  %v2417_v63 = vadd.f32 %v8800_v54, %v1822_v0  ;;  %vm2544_vm7 = vcmp.gt.f32.partialorder %v2416_v28, 0.0 }
 0x333   : > { %v1806_v20 = vrot.slane %v1107_v40, %v8736_v24  ;;  %v1110_v57 = vcombine.high %v8829_v33, %v8829_v33  ;;  %v1029_v8 = vcombine.high %v1027_v39, %v1027_v39  ;;  %v1058_v60 = vcombine.high %v8851_v26, %v8851_v26 }
 0x334   : > { %v2912_v56 = vmul.f32 %v8751_v30, %v2776_v62  ;;  %v1770_v11 = vrot.slane %v1050_v27, %v8736_v24  ;;  %v2935_v5 = vmul.f32 %v8751_v30, %v2799_v45  ;;  %v2777_v1 = vsel %vm2521_vm6, %v2393_v3, %v2649_v6 }
 0x335   : > { %3171 = vrot.lane.b32.xlu1 %v2911_v10, %s8422_s24  ;;  %3217 = vrot.lane.b32.xlu0 %v2934_v38, %s8422_s24  ;;  %v2667_v21 = vmul.f32 0.2, %v2411_v51  ;;  %v2413_v32 = vadd.f32 %v8800_v54, %v1806_v20  ;;  %v2800_v50 = vsel %vm2544_vm7, %v2416_v28, %v2672_v44  ;;  %vm2539_vm8 = vcmp.gt.f32.partialorder %v2411_v51, 0.0 }
 0x336   : > { %v2673_v40 = vmul.f32 0.2, %v2417_v63  ;;  %v2404_v22 = vadd.f32 %v8859_v42, %v1770_v11  ;;  %vm2545_vm9 = vcmp.gt.f32.partialorder %v2417_v63, 0.0  ;;  %v1826_v33 = vrot.slane %v1110_v57, %v8736_v24 }
 0x337   : > { %v2913_v10 = vmul.f32 %v8751_v30, %v2777_v1  ;;  %v1774_v0 = vrot.slane %v1058_v60, %v8736_v24  ;;  %v1060_v3 = vcombine.high %v1050_v27, %v1050_v27  ;;  %v1057_v38 = vrot.slane %v1029_v8, %v8721_v15 }
 0x338   : > { %v2936_v28 = vmul.f32 %v8751_v30, %v2800_v50  ;;  %v2795_v62 = vsel %vm2539_vm8, %v2411_v51, %v2667_v21  ;;  %v2669_v6 = vmul.f32 0.2, %v2413_v32  ;;  %v2418_v45 = vadd.f32 %v8800_v54, %v1826_v33 }
 0x339   : > { %3173 = vrot.lane.b32.xlu1 %v2912_v56, %s8422_s24  ;;  %3219 = vrot.lane.b32.xlu0 %v2935_v5, %s8422_s24  ;;  %v2801_v44 = vsel %vm2545_vm9, %v2417_v63, %v2673_v40  ;;  %vm2541_vm10 = vcmp.gt.f32.partialorder %v2413_v32, 0.0  ;;  %v2660_v20 = vmul.f32 0.2, %v2404_v22  ;;  %v2405_v56 = vadd.f32 %v8859_v42, %v1774_v0 }
 0x33a   : > { %v1043_v57 = vrot.slane %v1027_v39, %v8721_v15  ;;  %v1160_v11 = vcombine.high %v8669_v13, %v8669_v13  ;;  %v1167_v27 = vrot.slane %v8669_v13, %v8721_v15  ;;  %vm2532_vm11 = vcmp.gt.f32.partialorder %v2404_v22, 0.0 }
 0x33b   : > { %v2931_v54 = vmul.f32 %v8751_v30, %v2795_v62  ;;  %v1766_v51 = vrot.slane %v8851_v26, %v8736_v24  ;;  %v1778_v63 = vrot.slane %v1060_v3, %v8736_v24  ;;  %v1061_v8 = vcombine.high %v1057_v38, %v1057_v38 }
 0x33c   : > { %v2937_v39 = vmul.f32 %v8751_v30, %v2801_v44  ;;  %v2797_v60 = vsel %vm2541_vm10, %v2413_v32, %v2669_v6  ;;  %vm2546_vm12 = vcmp.gt.f32.partialorder %v2418_v45, 0.0  ;;  %v2674_v5 = vmul.f32 0.2, %v2418_v45 }
 0x33d   : > { %3175 = vrot.lane.b32.xlu1 %v2913_v10, %s8422_s24  ;;  %3221 = vrot.lane.b32.xlu0 %v2936_v28, %s8422_s24  ;;  %v2788_v1 = vsel %vm2532_vm11, %v2404_v22, %v2660_v20  ;;  %v2661_v21 = vmul.f32 0.2, %v2405_v56  ;;  %v2403_v50 = vadd.f32 %v8859_v42, %v1766_v51  ;;  %v2406_v40 = vadd.f32 %v8859_v42, %v1778_v63 }
 0x33e   : > { %vm2533_vm13 = vcmp.gt.f32.partialorder %v2405_v56, 0.0  ;;  %v1782_v26 = vrot.slane %v1043_v57, %v8736_v24  ;;  %v1059_v33 = vcombine.high %v1043_v57, %v1043_v57  ;;  %v1174_v10 = vrot.slane %v1160_v11, %v8721_v15 }
 0x33f   : > { %v1175_v0 = vcombine.high %v1167_v27, %v1167_v27  ;;  %v1786_v32 = vrot.slane %v1057_v38, %v8736_v24  ;;  %v1794_v22 = vrot.slane %v1061_v8, %v8736_v24  ;;  %v2933_v3 = vmul.f32 %v8751_v30, %v2797_v60 }
 0x340   : > { %v2924_v28 = vmul.f32 %v8751_v30, %v2788_v1  ;;  %v2802_v62 = vsel %vm2546_vm12, %v2418_v45, %v2674_v5  ;;  %v2407_v6 = vadd.f32 %v8859_v42, %v1782_v26  ;;  %v2789_v44 = vsel %vm2533_vm13, %v2405_v56, %v2661_v21 }
 0x341   : > { %3211 = vrot.lane.b32.xlu1 %v2931_v54, %s8422_s24  ;;  %3223 = vrot.lane.b32.xlu0 %v2937_v39, %s8422_s24  ;;  %v2659_v20 = vmul.f32 0.2, %v2403_v50  ;;  %v2662_v54 = vmul.f32 0.2, %v2406_v40  ;;  %v2408_v57 = vadd.f32 %v8859_v42, %v1786_v32  ;;  %v1183_v11 = vrot.slane %v1167_v27, %v8721_v15  ;;  %v8916_v27 = vpop.permute.xlu0 %2349 }
 0x342   : > { %vm2531_vm14 = vcmp.gt.f32.partialorder %v2403_v50, 0.0  ;;  %vm2534_vm15 = vcmp.gt.f32.partialorder %v2406_v40, 0.0  ;;  %v1790_v38 = vrot.slane %v1059_v33, %v8736_v24  ;;  %v1197_v51 = vrot.slane %v1175_v0, %v8721_v15 }
 0x343   : > { %v2410_v45 = vadd.f32 %v8859_v42, %v1794_v22  ;;  %v2938_v56 = vmul.f32 %v8751_v30, %v2802_v62  ;;  %v2925_v63 = vmul.f32 %v8751_v30, %v2789_v44  ;;  %v2663_v8 = vmul.f32 0.2, %v2407_v6 }
 0x344   : > { %v2409_v39 = vadd.f32 %v8859_v42, %v1790_v38  ;;  %v2787_v60 = vsel %vm2531_vm14, %v2403_v50, %v2659_v20  ;;  %v2790_v5 = vsel %vm2534_vm15, %v2406_v40, %v2662_v54  ;;  %vm2535_vm2 = vcmp.gt.f32.partialorder %v2407_v6, 0.0 }
 0x345   : > { %3215 = vrot.lane.b32.xlu1 %v2933_v3, %s8422_s24  ;;  %3197 = vrot.lane.b32.xlu0 %v2924_v28, %s8422_s24  ;;  %v2664_v1 = vmul.f32 0.2, %v2408_v57  ;;  %v1190_v21 = vrot.slane %v1174_v10, %v8721_v15  ;;  %vm2536_vm3 = vcmp.gt.f32.partialorder %v2408_v57, 0.0  ;;  %v1862_v26 = vrot.slane %v1183_v11, %v8736_v24 }
 0x346   : > { %v1176_v33 = vcombine.high %v1174_v10, %v1174_v10  ;;  %v1205_v0 = vcombine.high %v1183_v11, %v1183_v11  ;;  %v2666_v32 = vmul.f32 0.2, %v2410_v45  ;;  %v1866_v42 = vrot.slane %v1197_v51, %v8736_v24 }
 0x347   : > { %v2923_v22 = vmul.f32 %v8751_v30, %v2787_v60  ;;  %v2926_v50 = vmul.f32 %v8751_v30, %v2790_v5  ;;  %v2791_v40 = vsel %vm2535_vm2, %v2407_v6, %v2663_v8  ;;  %v2427_v3 = vadd.f32 %v8916_v27, %v1862_v26 }
 0x348   : > { %v2792_v28 = vsel %vm2536_vm3, %v2408_v57, %v2664_v1  ;;  %vm2538_vm4 = vcmp.gt.f32.partialorder %v2410_v45, 0.0  ;;  %v2665_v62 = vmul.f32 0.2, %v2409_v39  ;;  %v2428_v44 = vadd.f32 %v8916_v27, %v1866_v42 }
 0x349   : > { %3225 = vrot.lane.b32.xlu1 %v2938_v56, %s8422_s24  ;;  %3199 = vrot.lane.b32.xlu0 %v2925_v63, %s8422_s24  ;;  %v1118_v20 = vrot.slane %v8667_v12, %v8721_v15  ;;  %vm2537_vm5 = vcmp.gt.f32.partialorder %v2409_v39, 0.0  ;;  %v1878_v10 = vrot.slane %v1190_v21, %v8736_v24  ;;  %v1206_v54 = vcombine.high %v1190_v21, %v1190_v21 }
 0x34a   : > { %v1204_v6 = vrot.slane %v1176_v33, %v8721_v15  ;;  %v2927_v11 = vmul.f32 %v8751_v30, %v2791_v40  ;;  %v1870_v57 = vrot.slane %v1205_v0, %v8736_v24  ;;  %v1207_v38 = vcombine.high %v1197_v51, %v1197_v51 }
 0x34b   : > { %v2928_v56 = vmul.f32 %v8751_v30, %v2792_v28  ;;  %v2794_v63 = vsel %vm2538_vm4, %v2410_v45, %v2666_v32  ;;  %v2683_v8 = vmul.f32 0.2, %v2427_v3  ;;  %v2431_v60 = vadd.f32 %v8916_v27, %v1878_v10 }
 0x34c   : > { %v2793_v5 = vsel %vm2537_vm5, %v2409_v39, %v2665_v62  ;;  %vm2555_vm6 = vcmp.gt.f32.partialorder %v2427_v3, 0.0  ;;  %v2684_v1 = vmul.f32 0.2, %v2428_v44  ;;  %v2429_v26 = vadd.f32 %v8916_v27, %v1870_v57 }
 0x34d   : > { %3195 = vrot.lane.b32.xlu1 %v2923_v22, %s8422_s24  ;;  %3201 = vrot.lane.b32.xlu0 %v2926_v50, %s8422_s24  ;;  %v1111_v21 = vcombine.high %v8667_v12, %v8667_v12  ;;  %v1126_v33 = vcombine.high %v1118_v20, %v1118_v20  ;;  %vm2556_vm7 = vcmp.gt.f32.partialorder %v2428_v44, 0.0  ;;  %v1886_v51 = vrot.slane %v1206_v54, %v8736_v24 }
 0x34e   : > { %v1134_v45 = vrot.slane %v1118_v20, %v8721_v15  ;;  %v2930_v0 = vmul.f32 %v8751_v30, %v2794_v63  ;;  %v1874_v39 = vrot.slane %v1207_v38, %v8736_v24  ;;  %v1208_v32 = vcombine.high %v1204_v6, %v1204_v6 }
 0x34f   : > { %v2929_v42 = vmul.f32 %v8751_v30, %v2793_v5  ;;  %v2811_v22 = vsel %vm2555_vm6, %v2427_v3, %v2683_v8  ;;  %v2687_v50 = vmul.f32 0.2, %v2431_v60  ;;  %v2433_v40 = vadd.f32 %v8916_v27, %v1886_v51  ;;  %v8959_v5 = vpop.permute.xlu1 %2347 }
 0x350   : > { %v2812_v28 = vsel %vm2556_vm7, %v2428_v44, %v2684_v1  ;;  %vm2559_vm8 = vcmp.gt.f32.partialorder %v2431_v60, 0.0  ;;  %v2685_v62 = vmul.f32 0.2, %v2429_v26  ;;  %v2430_v10 = vadd.f32 %v8916_v27, %v1874_v39 }
 0x351   : > { %3203 = vrot.lane.b32.xlu1 %v2927_v11, %s8422_s24  ;;  %3205 = vrot.lane.b32.xlu0 %v2928_v56, %s8422_s24  ;;  %v1125_v54 = vrot.slane %v1111_v21, %v8721_v15  ;;  %v1148_v20 = vrot.slane %v1126_v33, %v8721_v15  ;;  %v1258_v11 = vcombine.high %v8677_v16, %v8677_v16  ;;  %vm2557_vm9 = vcmp.gt.f32.partialorder %v2429_v26, 0.0 }
 0x352   : > { %v1156_v3 = vcombine.high %v1134_v45, %v1134_v45  ;;  %v2947_v57 = vmul.f32 %v8751_v30, %v2811_v22  ;;  %v1890_v44 = vrot.slane %v1208_v32, %v8736_v24  ;;  %v1882_v38 = vrot.slane %v1204_v6, %v8736_v24 }
 0x353   : > { %v2948_v56 = vmul.f32 %v8751_v30, %v2812_v28  ;;  %v2815_v63 = vsel %vm2559_vm8, %v2431_v60, %v2687_v50  ;;  %vm2561_vm10 = vcmp.gt.f32.partialorder %v2433_v40, 0.0  ;;  %v2689_v8 = vmul.f32 0.2, %v2433_v40 }
 0x354   : > { %v2813_v1 = vsel %vm2557_vm9, %v2429_v26, %v2685_v62  ;;  %v2686_v21 = vmul.f32 0.2, %v2430_v10  ;;  %v2434_v33 = vadd.f32 %v8916_v27, %v1890_v44  ;;  %v2432_v51 = vadd.f32 %v8916_v27, %v1882_v38 }
 0x355   : > { %3209 = vrot.lane.b32.xlu1 %v2930_v0, %s8422_s24  ;;  %3207 = vrot.lane.b32.xlu0 %v2929_v42, %s8422_s24  ;;  %v1127_v0 = vcombine.high %v1125_v54, %v1125_v54  ;;  %v8965_v39 = vrot.slane %v8677_v16, %v8721_v15  ;;  %vm2558_vm11 = vcmp.gt.f32.partialorder %v2430_v10, 0.0  ;;  %v1830_v6 = vrot.slane %v1134_v45, %v8736_v24 }
 0x356   : > { %v1141_v60 = vrot.slane %v1125_v54, %v8721_v15  ;;  %v1834_v26 = vrot.slane %v1148_v20, %v8736_v24  ;;  %v1838_v32 = vrot.slane %v1156_v3, %v8736_v24  ;;  %v1158_v42 = vcombine.high %v1148_v20, %v1148_v20 }
 0x357   : > { %v2951_v27 = vmul.f32 %v8751_v30, %v2815_v63  ;;  %v2949_v22 = vmul.f32 %v8751_v30, %v2813_v1  ;;  %v2817_v50 = vsel %vm2561_vm10, %v2433_v40, %v2689_v8  ;;  %v2419_v28 = vadd.f32 %v8959_v5, %v1830_v6 }
 0x358   : > { %v2814_v62 = vsel %vm2558_vm11, %v2430_v10, %v2686_v21  ;;  %v2688_v44 = vmul.f32 0.2, %v2432_v51  ;;  %v2420_v45 = vadd.f32 %v8959_v5, %v1834_v26  ;;  %v8979_v54 = vrot.slane %v1258_v11, %v8721_v15 }
 0x359   : > { %3243 = vrot.lane.b32.xlu1 %v2947_v57, %s8422_s24  ;;  %3245 = vrot.lane.b32.xlu0 %v2948_v56, %s8422_s24  ;;  %v2690_v57 = vmul.f32 0.2, %v2434_v33  ;;  %v1273_v3 = vcombine.high %v8965_v39, %v8965_v39  ;;  %vm2562_vm12 = vcmp.gt.f32.partialorder %v2434_v33, 0.0  ;;  %vm2560_vm13 = vcmp.gt.f32.partialorder %v2432_v51, 0.0 }
 0x35a   : > { %v1216_v40 = vrot.slane %v8679_v18, %v8721_v15  ;;  %v2421_v10 = vadd.f32 %v8959_v5, %v1838_v32  ;;  %v1842_v20 = vrot.slane %v1158_v42, %v8736_v24  ;;  %v1155_v38 = vrot.slane %v1127_v0, %v8721_v15 }
 0x35b   : > { %v2953_v11 = vmul.f32 %v8751_v30, %v2817_v50  ;;  %v2950_v56 = vmul.f32 %v8751_v30, %v2814_v62  ;;  %vm2547_vm14 = vcmp.gt.f32.partialorder %v2419_v28, 0.0  ;;  %v2675_v63 = vmul.f32 0.2, %v2419_v28 }
 0x35c   : > { %v2818_v8 = vsel %vm2562_vm12, %v2434_v33, %v2690_v57  ;;  %v2816_v1 = vsel %vm2560_vm13, %v2432_v51, %v2688_v44  ;;  %v2676_v21 = vmul.f32 0.2, %v2420_v45  ;;  %v2422_v6 = vadd.f32 %v8959_v5, %v1842_v20 }
 0x35d   : > { %3251 = vrot.lane.b32.xlu1 %v2951_v27, %s8422_s24  ;;  %3247 = vrot.lane.b32.xlu0 %v2949_v22, %s8422_s24  ;;  %v8995_v26 = vrot.slane %v8979_v54, %v8721_v15  ;;  %v8998_v32 = vrot.slane %v1273_v3, %v8721_v15  ;;  %vm2548_vm15 = vcmp.gt.f32.partialorder %v2420_v45, 0.0  ;;  %v1157_v0 = vcombine.high %v1141_v60, %v1141_v60 }
 0x35e   : > { %vm2549_vm2 = vcmp.gt.f32.partialorder %v2421_v10, 0.0  ;;  %v1846_v33 = vrot.slane %v1141_v60, %v8736_v24  ;;  %v1850_v51 = vrot.slane %v1155_v38, %v8736_v24  ;;  %v1159_v42 = vcombine.high %v1155_v38, %v1155_v38 }
 0x35f   : > { %v2954_v27 = vmul.f32 %v8751_v30, %v2818_v8  ;;  %v2952_v22 = vmul.f32 %v8751_v30, %v2816_v1  ;;  %v2803_v50 = vsel %vm2547_vm14, %v2419_v28, %v2675_v63  ;;  %v2677_v62 = vmul.f32 0.2, %v2421_v10 }
 0x360   : > { %v2804_v57 = vsel %vm2548_vm15, %v2420_v45, %v2676_v21  ;;  %v2678_v44 = vmul.f32 0.2, %v2422_v6  ;;  %v2423_v3 = vadd.f32 %v8959_v5, %v1846_v33  ;;  %v2424_v20 = vadd.f32 %v8959_v5, %v1850_v51 }
 0x361   : > { %3255 = vrot.lane.b32.xlu1 %v2953_v11, %s8422_s24  ;;  %3249 = vrot.lane.b32.xlu0 %v2950_v56, %s8422_s24  ;;  %v9009_v11 = vpop.permute.xlu0 %2353  ;;  %vm2550_vm3 = vcmp.gt.f32.partialorder %v2422_v6, 0.0  ;;  %v1854_v60 = vrot.slane %v1157_v0, %v8736_v24  ;;  %v1304_v38 = vcombine.high %v8995_v26, %v8995_v26  ;;  %v1224_v28 = vcombine.high %v1216_v40, %v1216_v40 }
 0x362   : > { %v1930_v45 = vrot.slane %v8998_v32, %v8736_v24  ;;  %v1858_v56 = vrot.slane %v1159_v42, %v8736_v24  ;;  %v2939_v63 = vmul.f32 %v8751_v30, %v2803_v50  ;;  %v2940_v8 = vmul.f32 %v8751_v30, %v2804_v57 }
 0x363   : > { %v2805_v1 = vsel %vm2549_vm2, %v2421_v10, %v2677_v62  ;;  %v2425_v21 = vadd.f32 %v8959_v5, %v1854_v60  ;;  %v2806_v33 = vsel %vm2550_vm3, %v2422_v6, %v2678_v44  ;;  %v2679_v51 = vmul.f32 0.2, %v2423_v3 }
 0x364   : > { %v2680_v0 = vmul.f32 0.2, %v2424_v20  ;;  %vm2551_vm4 = vcmp.gt.f32.partialorder %v2423_v3, 0.0  ;;  %vm2552_vm5 = vcmp.gt.f32.partialorder %v2424_v20, 0.0  ;;  %v1950_v42 = vrot.slane %v1304_v38, %v8736_v24  ;;  %v9037_v38 = vpop.permute.xlu1 %2351 }
 0x365   : > { %3257 = vrot.lane.b32.xlu1 %v2954_v27, %s8422_s24  ;;  %3253 = vrot.lane.b32.xlu0 %v2952_v22, %s8422_s24  ;;  %v2444_v27 = vadd.f32 %v9009_v11, %v1930_v45  ;;  %v1281_v22 = vrot.slane %v8965_v39, %v8721_v15  ;;  %v9030_v10 = vrot.slane %v1216_v40, %v8721_v15  ;;  %v2681_v39 = vmul.f32 0.2, %v2425_v21 }
 0x366   : > { %v1246_v6 = vrot.slane %v1224_v28, %v8721_v15  ;;  %v2426_v50 = vadd.f32 %v8959_v5, %v1858_v56  ;;  %v2941_v62 = vmul.f32 %v8751_v30, %v2805_v1  ;;  %v2942_v57 = vmul.f32 %v8751_v30, %v2806_v33 }
 0x367   : > { %v2449_v44 = vadd.f32 %v9009_v11, %v1950_v42  ;;  %v2807_v60 = vsel %vm2551_vm4, %v2423_v3, %v2679_v51  ;;  %v2808_v45 = vsel %vm2552_vm5, %v2424_v20, %v2680_v0  ;;  %vm2553_vm6 = vcmp.gt.f32.partialorder %v2425_v21, 0.0 }
 0x368   : > { %vm2572_vm7 = vcmp.gt.f32.partialorder %v2444_v27, 0.0  ;;  %v1926_v5 = vrot.slane %v1281_v22, %v8736_v24  ;;  %v1209_v40 = vcombine.high %v8679_v18, %v8679_v18  ;;  %v1254_v28 = vcombine.high %v9030_v10, %v9030_v10 }
 0x369   : > { %3227 = vrot.lane.b32.xlu1 %v2939_v63, %s8422_s24  ;;  %3229 = vrot.lane.b32.xlu0 %v2940_v8, %s8422_s24  ;;  %v2700_v63 = vmul.f32 0.2, %v2444_v27  ;;  %v1303_v8 = vcombine.high %v1281_v22, %v1281_v22  ;;  %v2682_v3 = vmul.f32 0.2, %v2426_v50  ;;  %v1898_v20 = vrot.slane %v1246_v6, %v8736_v24 }
 0x36a   : > { %v2943_v56 = vmul.f32 %v8751_v30, %v2807_v60  ;;  %v2944_v1 = vmul.f32 %v8751_v30, %v2808_v45  ;;  %v2809_v33 = vsel %vm2553_vm6, %v2425_v21, %v2681_v39  ;;  %v2443_v51 = vadd.f32 %v9009_v11, %v1926_v5 }
 0x36b   : > { %v2828_v0 = vsel %vm2572_vm7, %v2444_v27, %v2700_v63  ;;  %vm2554_vm8 = vcmp.gt.f32.partialorder %v2426_v50, 0.0  ;;  %v2705_v42 = vmul.f32 0.2, %v2449_v44  ;;  %v2436_v22 = vadd.f32 %v9037_v38, %v1898_v20 }
 0x36c   : > { %vm2577_vm9 = vcmp.gt.f32.partialorder %v2449_v44, 0.0  ;;  %v1223_v60 = vrot.slane %v1209_v40, %v8721_v15  ;;  %v2945_v21 = vmul.f32 %v8751_v30, %v2809_v33  ;;  %v1902_v27 = vrot.slane %v1254_v28, %v8736_v24  ;;  %v9064_v40 = vpop.permute.xlu1 %2355  ;;  %v9066_v33 = vpop.permute.xlu0 %2357 }
 0x36d   : > { %3231 = vrot.lane.b32.xlu1 %v2941_v62, %s8422_s24  ;;  %3233 = vrot.lane.b32.xlu0 %v2942_v57, %s8422_s24  ;;  %v1934_v62 = vrot.slane %v1303_v8, %v8736_v24  ;;  %v1305_v57 = vcombine.high %v8998_v32, %v8998_v32  ;;  %v1256_v39 = vcombine.high %v1246_v6, %v1246_v6  ;;  %v2699_v5 = vmul.f32 0.2, %v2443_v51 }
 0x36e   : > { %v2964_v45 = vmul.f32 %v8751_v30, %v2828_v0  ;;  %v2810_v63 = vsel %vm2554_vm8, %v2426_v50, %v2682_v3  ;;  %vm2571_vm10 = vcmp.gt.f32.partialorder %v2443_v51, 0.0  ;;  %v2437_v8 = vadd.f32 %v9037_v38, %v1902_v27 }
 0x36f   : > { %v2445_v20 = vadd.f32 %v9009_v11, %v1934_v62  ;;  %v1274_v32 = vcombine.high %v8979_v54, %v8979_v54  ;;  %vm2564_vm11 = vcmp.gt.f32.partialorder %v2436_v22, 0.0  ;;  %v1938_v6 = vrot.slane %v1305_v57, %v8736_v24 }
 0x370   : > { %v1225_v50 = vcombine.high %v1223_v60, %v1223_v60  ;;  %v2946_v28 = vmul.f32 %v8751_v30, %v2810_v63  ;;  %v1906_v3 = vrot.slane %v1256_v39, %v8736_v24  ;;  %v2827_v0 = vsel %vm2571_vm10, %v2443_v51, %v2699_v5  ;;  %v9089_v5 = vpop.permute.xlu1 %2359 }
 0x371   : > { %3235 = vrot.lane.b32.xlu1 %v2943_v56, %s8422_s24  ;;  %3237 = vrot.lane.b32.xlu0 %v2944_v1, %s8422_s24  ;;  %v2833_v56 = vsel %vm2577_vm9, %v2449_v44, %v2705_v42  ;;  %v2692_v1 = vmul.f32 0.2, %v2436_v22  ;;  %v1239_v44 = vrot.slane %v1223_v60, %v8721_v15  ;;  %v2701_v42 = vmul.f32 0.2, %v2445_v20 }
 0x372   : > { %v2969_v54 = vmul.f32 %v8751_v30, %v2833_v56  ;;  %v2446_v62 = vadd.f32 %v9009_v11, %v1938_v6  ;;  %vm2573_vm12 = vcmp.gt.f32.partialorder %v2445_v20, 0.0  ;;  %vm2565_vm13 = vcmp.gt.f32.partialorder %v2437_v8, 0.0  ;;  %v9091_v56 = vpop.permute.xlu0 %2361 }
 0x373   : > { %v2820_v27 = vsel %vm2564_vm11, %v2436_v22, %v2692_v1  ;;  %v1942_v57 = vrot.slane %v8995_v26, %v8736_v24  ;;  %v1302_v60 = vrot.slane %v1274_v32, %v8721_v15  ;;  %v1363_v51 = vrot.slane %v8685_v34, %v8721_v15 }
 0x374   : > { %v2963_v39 = vmul.f32 %v8751_v30, %v2827_v0  ;;  %v1910_v22 = vrot.slane %v1239_v44, %v8736_v24  ;;  %v9087_v63 = vrot.slane %v1225_v50, %v8721_v15  ;;  %v2956_v1 = vmul.f32 %v8751_v30, %v2820_v27  ;;  %v9110_v55 = vpop.permute.xlu1 %2363 }
 0x375   : > { %3239 = vrot.lane.b32.xlu1 %v2945_v21, %s8422_s24  ;;  %3277 = vrot.lane.b32.xlu0 %v2964_v45, %s8422_s24  ;;  %v2693_v21 = vmul.f32 0.2, %v2437_v8  ;;  %v2438_v45 = vadd.f32 %v9037_v38, %v1906_v3  ;;  %v2829_v6 = vsel %vm2573_vm12, %v2445_v20, %v2701_v42  ;;  %v2702_v26 = vmul.f32 0.2, %v2446_v62 }
 0x376   : > { %v2447_v32 = vadd.f32 %v9009_v11, %v1942_v57  ;;  %vm2574_vm14 = vcmp.gt.f32.partialorder %v2446_v62, 0.0  ;;  %v1356_v0 = vcombine.high %v8685_v34, %v8685_v34  ;;  %v1946_v50 = vrot.slane %v1302_v60, %v8736_v24 }
 0x377   : > { %v2694_v3 = vmul.f32 0.2, %v2438_v45  ;;  %vm2566_vm15 = vcmp.gt.f32.partialorder %v2438_v45, 0.0  ;;  %v1306_v27 = vcombine.high %v1302_v60, %v1302_v60  ;;  %v1371_v20 = vcombine.high %v1363_v51, %v1363_v51 }
 0x378   : > { %v2965_v42 = vmul.f32 %v8751_v30, %v2829_v6  ;;  %v2703_v59 = vmul.f32 0.2, %v2447_v32  ;;  %v2448_v61 = vadd.f32 %v9009_v11, %v1946_v50  ;;  %vm2575_vm2 = vcmp.gt.f32.partialorder %v2447_v32, 0.0  ;;  %v9112_v6 = vpop.permute.xlu0 %2365 }
 0x379   : > { %3241 = vrot.lane.b32.xlu1 %v2946_v28, %s8422_s24  ;;  %3287 = vrot.lane.b32.xlu0 %v2969_v54, %s8422_s24  ;;  %v2821_v28 = vsel %vm2565_vm13, %v2437_v8, %v2693_v21  ;;  %v2439_v54 = vadd.f32 %v9037_v38, %v1910_v22  ;;  %v1914_v8 = vrot.slane %v9087_v63, %v8736_v24 }
 0x37a   : > { %v1255_v21 = vcombine.high %v1239_v44, %v1239_v44  ;;  %v2957_v57 = vmul.f32 %v8751_v30, %v2821_v28  ;;  %v2830_v22 = vsel %vm2574_vm14, %v2446_v62, %v2702_v26  ;;  %v9108_v60 = vrot.slane %v1356_v0, %v8721_v15 }
 0x37b   : > { %v2440_v53 = vadd.f32 %v9037_v38, %v1914_v8  ;;  %vm2567_vm3 = vcmp.gt.f32.partialorder %v2439_v54, 0.0  ;;  %v1954_v44 = vrot.slane %v1306_v27, %v8736_v24  ;;  %v9118_v62 = vrot.slane %v1363_v51, %v8721_v15 }
 0x37c   : > { %v2966_v26 = vmul.f32 %v8751_v30, %v2830_v22  ;;  %v1918_v28 = vrot.slane %v1255_v21, %v8736_v24  ;;  %v2831_v0 = vsel %vm2575_vm2, %v2447_v32, %v2703_v59  ;;  %v2704_v50 = vmul.f32 0.2, %v2448_v61  ;;  %v9143_v21 = vpop.permute.xlu1 %2367  ;;  %v9145_v22 = vpop.permute.xlu0 %2369 }
 0x37d   : > { %3275 = vrot.lane.b32.xlu1 %v2963_v39, %s8422_s24  ;;  %3261 = vrot.lane.b32.xlu0 %v2956_v1, %s8422_s24  ;;  %v2822_v39 = vsel %vm2566_vm15, %v2438_v45, %v2694_v3  ;;  %v2695_v1 = vmul.f32 0.2, %v2439_v54  ;;  %v9121_v45 = vrot.slane %v1371_v20, %v8721_v15  ;;  %vm2576_vm4 = vcmp.gt.f32.partialorder %v2448_v61, 0.0 }
 0x37e   : > { %v2958_v3 = vmul.f32 %v8751_v30, %v2822_v39  ;;  %v2441_v27 = vadd.f32 %v9037_v38, %v1918_v28  ;;  %vm2568_vm5 = vcmp.gt.f32.partialorder %v2440_v53, 0.0  ;;  %v1894_v51 = vrot.slane %v9030_v10, %v8736_v24 }
 0x37f   : > { %v2823_v8 = vsel %vm2567_vm3, %v2439_v54, %v2695_v1  ;;  %v1257_v20 = vcombine.high %v9087_v63, %v9087_v63  ;;  %v9136_v59 = vrot.slane %v9108_v60, %v8721_v15  ;;  %v2967_v32 = vmul.f32 %v8751_v30, %v2831_v0 }
 0x380   : > { %v1994_v54 = vrot.slane %v9121_v45, %v8736_v24  ;;  %v2959_v10 = vmul.f32 %v8751_v30, %v2823_v8  ;;  %v2832_v39 = vsel %vm2576_vm4, %v2448_v61, %v2704_v50  ;;  %v2435_v1 = vadd.f32 %v9037_v38, %v1894_v51 }
 0x381   : > { %3279 = vrot.lane.b32.xlu1 %v2965_v42, %s8422_s24  ;;  %3263 = vrot.lane.b32.xlu0 %v2957_v57, %s8422_s24  ;;  %v2450_v42 = vadd.f32 %v9009_v11, %v1954_v44  ;;  %v2696_v57 = vmul.f32 0.2, %v2440_v53  ;;  %v1401_v11 = vcombine.high %v9118_v62, %v9118_v62  ;;  %vm2569_vm7 = vcmp.gt.f32.partialorder %v2441_v27, 0.0 }
 0x382   : > { %v2460_v28 = vadd.f32 %v9066_v33, %v1994_v54  ;;  %v9155_v0 = vrot.slane %v8687_v36, %v8721_v15  ;;  %v2968_v61 = vmul.f32 %v8751_v30, %v2832_v39  ;;  %v2691_v54 = vmul.f32 0.2, %v2435_v1 }
 0x383   : > { %v2706_v63 = vmul.f32 0.2, %v2450_v42  ;;  %v2824_v44 = vsel %vm2568_vm5, %v2440_v53, %v2696_v57  ;;  %vm2578_vm6 = vcmp.gt.f32.partialorder %v2450_v42, 0.0  ;;  %v1998_v50 = vrot.slane %v1401_v11, %v8736_v24 }
 0x384   : > { %v1402_v53 = vcombine.high %v9136_v59, %v9136_v59  ;;  %v2960_v51 = vmul.f32 %v8751_v30, %v2824_v44  ;;  %vm2563_vm8 = vcmp.gt.f32.partialorder %v2435_v1, 0.0  ;;  %v2716_v47 = vmul.f32 0.2, %v2460_v28 }
 0x385   : > { %3281 = vrot.lane.b32.xlu1 %v2966_v26, %s8422_s24  ;;  %3265 = vrot.lane.b32.xlu0 %v2958_v3, %s8422_s24  ;;  %v2697_v26 = vmul.f32 0.2, %v2441_v27  ;;  %v1922_v3 = vrot.slane %v1257_v20, %v8736_v24  ;;  %v2461_v39 = vadd.f32 %v9066_v33, %v1998_v50  ;;  %vm2588_vm9 = vcmp.gt.f32.partialorder %v2460_v28, 0.0 }
 0x386   : > { %v1990_v11 = vrot.slane %v9118_v62, %v8736_v24  ;;  %v1403_v44 = vcombine.high %v9121_v45, %v9121_v45  ;;  %v2819_v62 = vsel %vm2563_vm8, %v2435_v1, %v2691_v54  ;;  %v1405_v13 = vcombine.high %v8695_v48, %v8695_v48 }
 0x387   : > { %v2442_v20 = vadd.f32 %v9037_v38, %v1922_v3  ;;  %v1330_v38 = vrot.slane %v9155_v0, %v8721_v15  ;;  %v2717_v49 = vmul.f32 0.2, %v2461_v39  ;;  %vm2589_vm11 = vcmp.gt.f32.partialorder %v2461_v39, 0.0 }
 0x388   : > { %v2459_v45 = vadd.f32 %v9066_v33, %v1990_v11 }
 0x389   : > { %3283 = vrot.lane.b32.xlu1 %v2967_v32, %s8422_s24  ;;  %3267 = vrot.lane.b32.xlu0 %v2959_v10, %s8422_s24  ;;  %v2834_v32 = vsel %vm2578_vm6, %v2450_v42, %v2706_v63  ;;  %v2825_v10 = vsel %vm2569_vm7, %v2441_v27, %v2697_v26  ;;  %v1307_v42 = vcombine.high %v8687_v36, %v8687_v36  ;;  %v2698_v50 = vmul.f32 0.2, %v2442_v20 }
 0x38a   : > { %v2970_v27 = vmul.f32 %v8751_v30, %v2834_v32  ;;  %v2014_v63 = vrot.slane %v1402_v53, %v8736_v24  ;;  %vm2570_vm10 = vcmp.gt.f32.partialorder %v2442_v20, 0.0  ;;  %v1372_v32 = vcombine.high %v9108_v60, %v9108_v60 }
 0x38b   : > { %v9161_v8 = vpop.permute.xlu0 %3181  ;;  %v9163_v57 = vpop.permute.xlu1 %3179  ;;  %v2002_v53 = vrot.slane %v1403_v44, %v8736_v24  ;;  %v1321_v1 = vrot.slane %v1307_v42, %v8721_v15  ;;  %v1352_v54 = vcombine.high %v1330_v38, %v1330_v38  ;;  %v2845_v43 = vsel %vm2589_vm11, %v2461_v39, %v2717_v49 }
 0x38c   : > { %v2465_v41 = vadd.f32 %v9066_v33, %v2014_v63  ;;  %v2826_v63 = vsel %vm2570_vm10, %v2442_v20, %v2698_v50  ;;  %vm2587_vm12 = vcmp.gt.f32.partialorder %v2459_v45, 0.0  ;;  %v1400_v20 = vrot.slane %v1372_v32, %v8721_v15 }
 0x38d   : > { %3285 = vrot.lane.b32.xlu1 %v2968_v61, %s8422_s24  ;;  %3269 = vrot.lane.b32.xlu0 %v2960_v51, %s8422_s24  ;;  %v2961_v61 = vmul.f32 %v8751_v30, %v2825_v10  ;;  %v2844_v51 = vsel %vm2588_vm9, %v2460_v28, %v2716_v47  ;;  %v2955_v10 = vmul.f32 %v8751_v30, %v2819_v62 }
 0x38e   : > { %v1958_v47 = vrot.slane %v1330_v38, %v8736_v24  ;;  %v2980_v60 = vmul.f32 %v8751_v30, %v2844_v51  ;;  %v2721_v44 = vmul.f32 0.2, %v2465_v41  ;;  %v1322_v62 = vcombine.high %v9155_v0, %v9155_v0 }
 0x38f   : > { %v9180_v26 = vpop.permute.xlu0 %3185  ;;  %v9182_v3 = vpop.permute.xlu1 %3183  ;;  %vm2593_vm13 = vcmp.gt.f32.partialorder %v2465_v41, 0.0  ;;  %v2006_v38 = vrot.slane %v9136_v59, %v8736_v24  ;;  %v1323_v50 = vcombine.high %v1321_v1, %v1321_v1  ;;  %v1337_v49 = vrot.slane %v1321_v1, %v8721_v15 }
 0x390   : > { %v2451_v42 = vadd.f32 %v9064_v40, %v1958_v47  ;;  %v2962_v39 = vmul.f32 %v8751_v30, %v2826_v63  ;;  %v1966_v51 = vrot.slane %v1352_v54, %v8736_v24  ;;  %v2849_v35 = vsel %vm2593_vm13, %v2465_v41, %v2721_v44 }
 0x391   : > { %3289 = vrot.lane.b32.xlu1 %v2970_v27, %s8422_s24  ;;  %3271 = vrot.lane.b32.xlu0 %v2961_v61, %s8422_s24  ;;  %v2715_v27 = vmul.f32 0.2, %v2459_v45  ;;  %v2462_v61 = vadd.f32 %v9066_v33, %v2002_v53  ;;  %v2463_v59 = vadd.f32 %v9066_v33, %v2006_v38  ;;  %v1461_v63 = vrot.slane %v8693_v46, %v8721_v15 }
 0x392   : > { %v2707_v32 = vmul.f32 0.2, %v2451_v42  ;;  %v2453_v1 = vadd.f32 %v9064_v40, %v1966_v51  ;;  %vm2579_vm15 = vcmp.gt.f32.partialorder %v2451_v42, 0.0  ;;  %v1404_v54 = vcombine.high %v1400_v20, %v1400_v20 }
 0x393   : > { %v9195_v28 = vpop.permute.xlu0 %3189  ;;  %v9197_v11 = vpop.permute.xlu1 %3187  ;;  %v2843_v47 = vsel %vm2587_vm12, %v2459_v45, %v2715_v27  ;;  %vm2590_vm14 = vcmp.gt.f32.partialorder %v2462_v61, 0.0  ;;  %v1344_v45 = vrot.slane %v1322_v62, %v8721_v15  ;;  %v1974_v41 = vrot.slane %v1337_v49, %v8736_v24 }
 0x394   : > { %v2979_v27 = vmul.f32 %v8751_v30, %v2843_v47  ;;  %v9229_v44 = vrot.slane %v1323_v50, %v8721_v15  ;;  %v2719_v37 = vmul.f32 0.2, %v2463_v59  ;;  %v2835_v29 = vsel %vm2579_vm15, %v2451_v42, %v2707_v32 }
 0x395   : > { %3259 = vrot.lane.b32.xlu1 %v2955_v10, %s8422_s24  ;;  %3309 = vrot.lane.b32.xlu0 %v2980_v60, %s8422_s24  ;;  %v2981_v10 = vmul.f32 %v8751_v30, %v2845_v43  ;;  %v2718_v60 = vmul.f32 0.2, %v2462_v61  ;;  %v2010_v43 = vrot.slane %v1400_v20, %v8736_v24  ;;  %vm2591_vm2 = vcmp.gt.f32.partialorder %v2463_v59, 0.0 }
 0x396   : > { %v2709_v62 = vmul.f32 0.2, %v2453_v1  ;;  %v2455_v47 = vadd.f32 %v9064_v40, %v1974_v41  ;;  %v1454_v50 = vcombine.high %v8693_v46, %v8693_v46  ;;  %v1469_v31 = vcombine.high %v1461_v63, %v1461_v63 }
 0x397   : > { %v9212_v53 = vpop.permute.xlu1 %3191  ;;  %v9214_v0 = vpop.permute.xlu0 %3163  ;;  %v2464_v20 = vadd.f32 %v9066_v33, %v2010_v43  ;;  %vm2581_vm3 = vcmp.gt.f32.partialorder %v2453_v1, 0.0  ;;  %v1978_v42 = vrot.slane %v9229_v44, %v8736_v24  ;;  %v1354_v32 = vcombine.high %v1344_v45, %v1344_v45 }
 0x398   : > { %v2971_v23 = vmul.f32 %v8751_v30, %v2835_v29  ;;  %v2837_v17 = vsel %vm2581_vm3, %v2453_v1, %v2709_v62  ;;  %v9256_v19 = vrot.slane %v1454_v50, %v8721_v15  ;;  %vm2583_vm5 = vcmp.gt.f32.partialorder %v2455_v47, 0.0 }
 0x399   : > { %3273 = vrot.lane.b32.xlu1 %v2962_v39, %s8422_s24  ;;  %3311 = vrot.lane.b32.xlu0 %v2981_v10, %s8422_s24  ;;  %v2985_v39 = vmul.f32 %v8751_v30, %v2849_v35  ;;  %v2846_v10 = vsel %vm2590_vm14, %v2462_v61, %v2718_v60  ;;  %v2018_v35 = vrot.slane %v1404_v54, %v8736_v24  ;;  %v2720_v25 = vmul.f32 0.2, %v2464_v20 }
 0x39a   : > { %v2982_v61 = vmul.f32 %v8751_v30, %v2846_v10  ;;  %v1353_v60 = vcombine.high %v1337_v49, %v1337_v49  ;;  %vm2592_vm4 = vcmp.gt.f32.partialorder %v2464_v20, 0.0  ;;  %v2711_v54 = vmul.f32 0.2, %v2455_v47 }
 0x39b   : > { %v9231_v38 = vpop.permute.xlu1 %3193  ;;  %v9233_v51 = vpop.permute.xlu0 %3169  ;;  %v2456_v10 = vadd.f32 %v9064_v40, %v1978_v42  ;;  %v9259_v49 = vrot.slane %v1461_v63, %v8721_v15  ;;  %v1962_v29 = vrot.slane %v1344_v45, %v8736_v24  ;;  %v1970_v1 = vrot.slane %v1354_v32, %v8736_v24 }
 0x39c   : > { %v2973_v50 = vmul.f32 %v8751_v30, %v2837_v17  ;;  %v9284_v17 = vrot.slane %v9256_v19, %v8721_v15 }
 0x39d   : > { %3307 = vrot.lane.b32.xlu1 %v2979_v27, %s8422_s24  ;;  %3319 = vrot.lane.b32.xlu0 %v2985_v39, %s8422_s24  ;;  %v2847_v27 = vsel %vm2591_vm2, %v2463_v59, %v2719_v37  ;;  %v2466_v39 = vadd.f32 %v9066_v33, %v2018_v35  ;;  %v9265_v37 = vrot.slane %v1469_v31, %v8721_v15  ;;  %v2712_v31 = vmul.f32 0.2, %v2456_v10 }
 0x39e   : > { %v2983_v33 = vmul.f32 %v8751_v30, %v2847_v27  ;;  %v1982_v59 = vrot.slane %v1353_v60, %v8736_v24  ;;  %v2452_v45 = vadd.f32 %v9064_v40, %v1962_v29  ;;  %vm2584_vm7 = vcmp.gt.f32.partialorder %v2456_v10, 0.0 }
 0x39f   : > { %v9247_v43 = vpop.permute.xlu1 %3165  ;;  %v9249_v41 = vpop.permute.xlu0 %3177  ;;  %v2722_v35 = vmul.f32 0.2, %v2466_v39  ;;  %vm2594_vm6 = vcmp.gt.f32.partialorder %v2466_v39, 0.0  ;;  %v1355_v60 = vcombine.high %v9229_v44, %v9229_v44  ;;  %v1500_v36 = vcombine.high %v9284_v17, %v9284_v17 }
 0x3a0   : > { %v2457_v42 = vadd.f32 %v9064_v40, %v1982_v59  ;;  %v2840_v59 = vsel %vm2584_vm7, %v2456_v10, %v2712_v31  ;;  %vm2580_vm8 = vcmp.gt.f32.partialorder %v2452_v45, 0.0  ;;  %v1501_v18 = vcombine.high %v9265_v37, %v9265_v37 }
 0x3a1   : > { %3313 = vrot.lane.b32.xlu1 %v2982_v61, %s8422_s24  ;;  %3291 = vrot.lane.b32.xlu0 %v2971_v23, %s8422_s24  ;;  %v2848_v23 = vsel %vm2592_vm4, %v2464_v20, %v2720_v25  ;;  %v2839_v61 = vsel %vm2583_vm5, %v2455_v47, %v2711_v54  ;;  %v1499_v25 = vcombine.high %v9259_v49, %v9259_v49 }
 0x3a2   : > { %v2454_v20 = vadd.f32 %v9064_v40, %v1970_v1  ;;  %v2058_v47 = vrot.slane %v9265_v37, %v8736_v24  ;;  %v2984_v54 = vmul.f32 %v8751_v30, %v2848_v23  ;;  %v2975_v44 = vmul.f32 %v8751_v30, %v2839_v61 }
 0x3a3   : > { %v9270_v62 = vpop.permute.xlu1 %3167  ;;  %v9272_v63 = vpop.permute.xlu0 %3213  ;;  %v2850_v29 = vsel %vm2594_vm6, %v2466_v39, %v2722_v35  ;;  %vm2585_vm9 = vcmp.gt.f32.partialorder %v2457_v42, 0.0  ;;  %v1986_v1 = vrot.slane %v1355_v60, %v8736_v24  ;;  %v2062_v23 = vrot.slane %v1499_v25, %v8736_v24 }
 0x3a4   : > { %v2476_v46 = vadd.f32 %v9091_v56, %v2058_v47  ;;  %v9306_v39 = vrot.slane %v8695_v48, %v8721_v15  ;;  %v2986_v10 = vmul.f32 %v8751_v30, %v2850_v29  ;;  %v2976_v31 = vmul.f32 %v8751_v30, %v2840_v59 }
 0x3a5   : > { %3315 = vrot.lane.b32.xlu1 %v2983_v33, %s8422_s24  ;;  %3295 = vrot.lane.b32.xlu0 %v2973_v50, %s8422_s24  ;;  %v2708_v33 = vmul.f32 0.2, %v2452_v45  ;;  %v2713_v50 = vmul.f32 0.2, %v2457_v42  ;;  %v2458_v60 = vadd.f32 %v9064_v40, %v1986_v1  ;;  %vm2582_vm10 = vcmp.gt.f32.partialorder %v2454_v20, 0.0 }
 0x3a6   : > { %v2732_v34 = vmul.f32 0.2, %v2476_v46  ;;  %v2477_v25 = vadd.f32 %v9091_v56, %v2062_v23  ;;  %v2054_v29 = vrot.slane %v9259_v49, %v8736_v24  ;;  %vm2604_vm11 = vcmp.gt.f32.partialorder %v2476_v46, 0.0 }
 0x3a7   : > { %v9291_v32 = vpop.permute.xlu1 %3171  ;;  %v9293_v27 = vpop.permute.xlu0 %3217  ;;  %v2836_v47 = vsel %vm2580_vm8, %v2452_v45, %v2708_v33  ;;  %v1470_v40 = vcombine.high %v9256_v19, %v9256_v19  ;;  %v1428_v45 = vrot.slane %v9306_v39, %v8721_v15  ;;  %v2078_v37 = vrot.slane %v1500_v36, %v8736_v24 }
 0x3a8   : > { %v2714_v1 = vmul.f32 0.2, %v2458_v60  ;;  %v2475_v23 = vadd.f32 %v9091_v56, %v2054_v29  ;;  %vm2586_vm12 = vcmp.gt.f32.partialorder %v2458_v60, 0.0  ;;  %v2733_v19 = vmul.f32 0.2, %v2477_v25 }
 0x3a9   : > { %3317 = vrot.lane.b32.xlu1 %v2984_v54, %s8422_s24  ;;  %3299 = vrot.lane.b32.xlu0 %v2975_v44, %s8422_s24  ;;  %v2710_v54 = vmul.f32 0.2, %v2454_v20  ;;  %v2841_v44 = vsel %vm2585_vm9, %v2457_v42, %v2713_v50  ;;  %v2972_v42 = vmul.f32 %v8751_v30, %v2836_v47  ;;  %v1419_v47 = vrot.slane %v1405_v13, %v8721_v15 }
 0x3aa   : > { %v2977_v59 = vmul.f32 %v8751_v30, %v2841_v44  ;;  %vm2605_vm13 = vcmp.gt.f32.partialorder %v2477_v25, 0.0  ;;  %v2066_v36 = vrot.slane %v1501_v18, %v8736_v24  ;;  %v1498_v44 = vrot.slane %v1470_v40, %v8721_v15 }
 0x3ab   : > { %v9309_v35 = vpop.permute.xlu1 %3173  ;;  %v9311_v61 = vpop.permute.xlu0 %3219  ;;  %v2838_v50 = vsel %vm2582_vm10, %v2454_v20, %v2710_v54  ;;  %v1450_v20 = vcombine.high %v1428_v45, %v1428_v45  ;;  %v2022_v54 = vrot.slane %v1428_v45, %v8736_v24  ;;  %v2861_v48 = vsel %vm2605_vm13, %v2477_v25, %v2733_v19 }
 0x3ac   : > { %vm2603_vm14 = vcmp.gt.f32.partialorder %v2475_v23, 0.0  ;;  %v2070_v45 = vrot.slane %v9284_v17, %v8736_v24  ;;  %v1421_v12 = vcombine.high %v1419_v47, %v1419_v47 }
 0x3ad   : > { %3321 = vrot.lane.b32.xlu1 %v2986_v10, %s8422_s24  ;;  %3301 = vrot.lane.b32.xlu0 %v2976_v31, %s8422_s24  ;;  %v2860_v10 = vsel %vm2604_vm11, %v2476_v46, %v2732_v34  ;;  %v2481_v31 = vadd.f32 %v9091_v56, %v2078_v37  ;;  %v2974_v34 = vmul.f32 %v8751_v30, %v2838_v50 }
 0x3ae   : > { %v2996_v13 = vmul.f32 %v8751_v30, %v2860_v10  ;;  %v2842_v37 = vsel %vm2586_vm12, %v2458_v60, %v2714_v1  ;;  %v2467_v40 = vadd.f32 %v9089_v5, %v2022_v54  ;;  %v1502_v50 = vcombine.high %v1498_v44, %v1498_v44 }
 0x3af   : > { %v9330_v33 = vpop.permute.xlu1 %3175  ;;  %v9332_v49 = vpop.permute.xlu0 %3221  ;;  %v2737_v18 = vmul.f32 0.2, %v2481_v31  ;;  %vm2609_vm15 = vcmp.gt.f32.partialorder %v2481_v31, 0.0  ;;  %v1435_v60 = vrot.slane %v1419_v47, %v8721_v15  ;;  %v2030_v1 = vrot.slane %v1450_v20, %v8736_v24 }
 0x3b0   : > { %v2978_v25 = vmul.f32 %v8751_v30, %v2842_v37  ;;  %v2723_v7 = vmul.f32 0.2, %v2467_v40  ;;  %v1420_v47 = vcombine.high %v9306_v39, %v9306_v39  ;;  %v9369_v20 = vrot.slane %v1421_v12, %v8721_v15 }
 0x3b1   : > { %3293 = vrot.lane.b32.xlu1 %v2972_v42, %s8422_s24  ;;  %3303 = vrot.lane.b32.xlu0 %v2977_v59, %s8422_s24  ;;  %v2731_v42 = vmul.f32 0.2, %v2475_v23  ;;  %v2478_v59 = vadd.f32 %v9091_v56, %v2066_v36  ;;  %v2997_v36 = vmul.f32 %v8751_v30, %v2861_v48  ;;  %v2469_v16 = vadd.f32 %v9089_v5, %v2030_v1 }
 0x3b2   : > { %vm2595_vm3 = vcmp.gt.f32.partialorder %v2467_v40, 0.0  ;;  %v2074_v48 = vrot.slane %v1498_v44, %v8736_v24  ;;  %v1559_v37 = vrot.slane %v8701_v58, %v8721_v15  ;;  %v2082_v39 = vrot.slane %v1502_v50, %v8736_v24 }
 0x3b3   : > { %v9345_v46 = vpop.permute.xlu1 %3211  ;;  %v9347_v29 = vpop.permute.xlu0 %3223  ;;  %v2859_v17 = vsel %vm2603_vm14, %v2475_v23, %v2731_v42  ;;  %vm2606_vm2 = vcmp.gt.f32.partialorder %v2478_v59, 0.0  ;;  %v2734_v54 = vmul.f32 0.2, %v2478_v59  ;;  %v2038_v23 = vrot.slane %v1435_v60, %v8736_v24 }
 0x3b4   : > { %v2480_v1 = vadd.f32 %v9091_v56, %v2074_v48  ;;  %v2725_v9 = vmul.f32 0.2, %v2469_v16  ;;  %vm2597_vm5 = vcmp.gt.f32.partialorder %v2469_v16, 0.0  ;;  %v2042_v50 = vrot.slane %v9369_v20, %v8736_v24 }
 0x3b5   : > { %3297 = vrot.lane.b32.xlu1 %v2974_v34, %s8422_s24  ;;  %3341 = vrot.lane.b32.xlu0 %v2996_v13, %s8422_s24  ;;  %v2865_v34 = vsel %vm2609_vm15, %v2481_v31, %v2737_v18  ;;  %v2479_v13 = vadd.f32 %v9091_v56, %v2070_v45  ;;  %v1552_v31 = vcombine.high %v8701_v58, %v8701_v58 }
 0x3b6   : > { %v2995_v18 = vmul.f32 %v8751_v30, %v2859_v17  ;;  %v3001_v45 = vmul.f32 %v8751_v30, %v2865_v34  ;;  %v2862_v44 = vsel %vm2606_vm2, %v2478_v59, %v2734_v54  ;;  %v2471_v14 = vadd.f32 %v9089_v5, %v2038_v23 }
 0x3b7   : > { %v9359_v10 = vpop.permute.xlu1 %3215  ;;  %v9361_v19 = vpop.permute.xlu0 %3197  ;;  %v1442_v58 = vrot.slane %v1420_v47, %v8721_v15  ;;  %vm2607_vm4 = vcmp.gt.f32.partialorder %v2479_v13, 0.0  ;;  %v1451_v17 = vcombine.high %v1435_v60, %v1435_v60  ;;  %v1567_v59 = vcombine.high %v1559_v37, %v1559_v37 }
 0x3b8   : > { %11323 = vst [vmem:[#allocation33_spill] sm:$0xff] %v9361_v19  ;;  %v2482_v54 = vadd.f32 %v9091_v56, %v2082_v39  ;;  %v2998_v34 = vmul.f32 %v8751_v30, %v2862_v44  ;;  %v2736_v48 = vmul.f32 0.2, %v2480_v1  ;;  %v2472_v23 = vadd.f32 %v9089_v5, %v2042_v50 }
 0x3b9   : > { %3305 = vrot.lane.b32.xlu1 %v2978_v25, %s8422_s24  ;;  %3343 = vrot.lane.b32.xlu0 %v2997_v36, %s8422_s24  ;;  %v2851_v25 = vsel %vm2595_vm3, %v2467_v40, %v2723_v7  ;;  %v2735_v36 = vmul.f32 0.2, %v2479_v13  ;;  %vm2608_vm6 = vcmp.gt.f32.partialorder %v2480_v1, 0.0  ;;  %v1452_v19 = vcombine.high %v1442_v58, %v1442_v58 }
 0x3ba   : > { %v2987_v47 = vmul.f32 %v8751_v30, %v2851_v25  ;;  %v2026_v60 = vrot.slane %v1442_v58, %v8736_v24  ;;  %v9404_v56 = vrot.slane %v1552_v31, %v8721_v15  ;;  %vm2599_vm7 = vcmp.gt.f32.partialorder %v2471_v14, 0.0 }
 0x3bb   : > { %v9380_v42 = vpop.permute.xlu1 %3225  ;;  %v9382_v12 = vpop.permute.xlu0 %3199  ;;  %v9409_v39 = vrot.slane %v1559_v37, %v8721_v15  ;;  %v9412_v44 = vrot.slane %v1567_v59, %v8721_v15  ;;  %vm2610_vm8 = vcmp.gt.f32.partialorder %v2482_v54, 0.0  ;;  %vm2600_vm9 = vcmp.gt.f32.partialorder %v2472_v23, 0.0 }
 0x3bc   : > { %11324 = vst [vmem:[#allocation34_spill] sm:$0xff] %v9382_v12  ;;  %v2727_v12 = vmul.f32 0.2, %v2471_v14  ;;  %v2468_v50 = vadd.f32 %v9089_v5, %v2026_v60 }
 0x3bd   : > { %3339 = vrot.lane.b32.xlu1 %v2995_v18, %s8422_s24  ;;  %3351 = vrot.lane.b32.xlu0 %v3001_v45, %s8422_s24  ;;  %v2863_v18 = vsel %vm2607_vm4, %v2479_v13, %v2735_v36  ;;  %v2853_v45 = vsel %vm2597_vm5, %v2469_v16, %v2725_v9  ;;  %v2738_v9 = vmul.f32 0.2, %v2482_v54  ;;  %v2046_v16 = vrot.slane %v1451_v17, %v8736_v24 }
 0x3be   : > { %v2999_v31 = vmul.f32 %v8751_v30, %v2863_v18  ;;  %v2989_v25 = vmul.f32 %v8751_v30, %v2853_v45  ;;  %v2864_v36 = vsel %vm2608_vm6, %v2480_v1, %v2736_v48  ;;  %v2855_v37 = vsel %vm2599_vm7, %v2471_v14, %v2727_v12 }
 0x3bf   : > { %v9395_v7 = vpop.permute.xlu1 %3195  ;;  %v9397_v40 = vpop.permute.xlu0 %3201  ;;  %v2473_v59 = vadd.f32 %v9089_v5, %v2046_v16  ;;  %v1453_v17 = vcombine.high %v9369_v20, %v9369_v20  ;;  %v9431_v1 = vrot.slane %v9404_v56, %v8721_v15  ;;  %v1597_v14 = vcombine.high %v9409_v39, %v9409_v39 }
 0x3c0   : > { %11325 = vst [vmem:[#allocation35_spill] sm:$0xff] %v9397_v40  ;;  %v2122_v12 = vrot.slane %v9412_v44, %v8736_v24  ;;  %v3000_v48 = vmul.f32 %v8751_v30, %v2864_v36  ;;  %v2991_v45 = vmul.f32 %v8751_v30, %v2855_v37  ;;  %v2866_v60 = vsel %vm2610_vm8, %v2482_v54, %v2738_v9 }
 0x3c1   : > { %3345 = vrot.lane.b32.xlu1 %v2998_v34, %s8422_s24  ;;  %3323 = vrot.lane.b32.xlu0 %v2987_v47, %s8422_s24  ;;  %v2728_v34 = vmul.f32 0.2, %v2472_v23  ;;  %v2034_v47 = vrot.slane %v1452_v19, %v8736_v24  ;;  %v2724_v19 = vmul.f32 0.2, %v2468_v50  ;;  %vm2596_vm10 = vcmp.gt.f32.partialorder %v2468_v50, 0.0 }
 0x3c2   : > { %vm2601_vm11 = vcmp.gt.f32.partialorder %v2473_v59, 0.0  ;;  %v2050_v36 = vrot.slane %v1453_v17, %v8736_v24  ;;  %v2126_v54 = vrot.slane %v1597_v14, %v8736_v24  ;;  %v9453_v9 = vrot.slane %v8699_v52, %v8721_v15 }
 0x3c3   : > { %v9415_v13 = vpop.permute.xlu1 %3203  ;;  %v9417_v58 = vpop.permute.xlu0 %3205  ;;  %v2470_v16 = vadd.f32 %v9089_v5, %v2034_v47  ;;  %v1568_v40 = vcombine.high %v9404_v56, %v9404_v56 }
 0x3c4   : > { %11326 = vst [vmem:[#allocation36_spill] sm:$0xff] %v9417_v58  ;;  %v2492_v58 = vadd.f32 %v9112_v6, %v2122_v12  ;;  %v2852_v12 = vsel %vm2596_vm10, %v2468_v50, %v2724_v19  ;;  %v2474_v17 = vadd.f32 %v9089_v5, %v2050_v36  ;;  %v2493_v14 = vadd.f32 %v9112_v6, %v2126_v54 }
 0x3c5   : > { %3347 = vrot.lane.b32.xlu1 %v2999_v31, %s8422_s24  ;;  %3327 = vrot.lane.b32.xlu0 %v2989_v25, %s8422_s24  ;;  %v2856_v31 = vsel %vm2600_vm9, %v2472_v23, %v2728_v34  ;;  %v2729_v25 = vmul.f32 0.2, %v2473_v59  ;;  %v3002_v23 = vmul.f32 %v8751_v30, %v2866_v60  ;;  %vm2598_vm12 = vcmp.gt.f32.partialorder %v2470_v16, 0.0 }
 0x3c6   : > { %v2992_v47 = vmul.f32 %v8751_v30, %v2856_v31  ;;  %v1599_v60 = vcombine.high %v9412_v44, %v9412_v44  ;;  %vm2620_vm13 = vcmp.gt.f32.partialorder %v2492_v58, 0.0  ;;  %v2118_v5 = vrot.slane %v9409_v39, %v8736_v24 }
 0x3c7   : > { %v9438_v20 = vpop.permute.xlu1 %3209  ;;  %v9440_v18 = vpop.permute.xlu0 %3207  ;;  %v1526_v50 = vrot.slane %v9453_v9, %v8721_v15  ;;  %vm2602_vm14 = vcmp.gt.f32.partialorder %v2474_v17, 0.0  ;;  %v2730_v36 = vmul.f32 0.2, %v2474_v17  ;;  %vm2621_vm15 = vcmp.gt.f32.partialorder %v2493_v14, 0.0 }
 0x3c8   : > { %11327 = vst [vmem:[#allocation37_spill] sm:$0xff] %v9438_v20  ;;  %11328 = vst [vmem:[#allocation38_spill] sm:$0xff] %v9440_v18  ;;  %v1598_v18 = vcombine.high %v9431_v1, %v9431_v1  ;;  %v2748_v20 = vmul.f32 0.2, %v2492_v58  ;;  %v2491_v39 = vadd.f32 %v9112_v6, %v2118_v5 }
 0x3c9   : > { %3349 = vrot.lane.b32.xlu1 %v3000_v48, %s8422_s24  ;;  %3331 = vrot.lane.b32.xlu0 %v2991_v45, %s8422_s24  ;;  %v2726_v48 = vmul.f32 0.2, %v2470_v16  ;;  %v2857_v45 = vsel %vm2601_vm11, %v2473_v59, %v2729_v25  ;;  %v2988_v59 = vmul.f32 %v8751_v30, %v2852_v12  ;;  %v9486_v12 = vrot.slane %v1568_v40, %v8721_v15 }
 0x3ca   : > { %v2142_v56 = vrot.slane %v1598_v18, %v8736_v24  ;;  %v2993_v31 = vmul.f32 %v8751_v30, %v2857_v45  ;;  %v2876_v54 = vsel %vm2620_vm13, %v2492_v58, %v2748_v20  ;;  %v2130_v18 = vrot.slane %v1599_v60, %v8736_v24 }
 0x3cb   : > { %v9456_v37 = vpop.permute.xlu1 %3243  ;;  %v9458_v34 = vpop.permute.xlu0 %3245  ;;  %v2854_v25 = vsel %vm2598_vm12, %v2470_v16, %v2726_v48  ;;  %v2134_v16 = vrot.slane %v9431_v1, %v8736_v24  ;;  %v1548_v20 = vcombine.high %v1526_v50, %v1526_v50  ;;  %v2086_v48 = vrot.slane %v1526_v50, %v8736_v24 }
 0x3cc   : > { %11329 = vst [vmem:[#allocation39_spill] sm:$0xff] %v9458_v34  ;;  %v1503_v34 = vcombine.high %v8699_v52, %v8699_v52  ;;  %v2990_v40 = vmul.f32 %v8751_v30, %v2854_v25  ;;  %v2494_v60 = vadd.f32 %v9112_v6, %v2130_v18  ;;  %v2747_v52 = vmul.f32 0.2, %v2491_v39 }
 0x3cd   : > { %3353 = vrot.lane.b32.xlu1 %v3002_v23, %s8422_s24  ;;  %3333 = vrot.lane.b32.xlu0 %v2992_v47, %s8422_s24  ;;  %v2749_v23 = vmul.f32 0.2, %v2493_v14  ;;  %v2497_v47 = vadd.f32 %v9112_v6, %v2142_v56  ;;  %v2858_v56 = vsel %vm2602_vm14, %v2474_v17, %v2730_v36  ;;  %v1600_v50 = vcombine.high %v9486_v12, %v9486_v12 }
 0x3ce   : > { %v1517_v58 = vrot.slane %v1503_v34, %v8721_v15  ;;  %v2483_v34 = vadd.f32 %v9110_v55, %v2086_v48  ;;  %vm2619_vm2 = vcmp.gt.f32.partialorder %v2491_v39, 0.0  ;;  %v2495_v36 = vadd.f32 %v9112_v6, %v2134_v16 }
 0x3cf   : > { %v9477_v19 = vpop.permute.xlu1 %3251  ;;  %v9479_v44 = vpop.permute.xlu0 %3247  ;;  %v2753_v1 = vmul.f32 0.2, %v2497_v47  ;;  %vm2625_vm3 = vcmp.gt.f32.partialorder %v2497_v47, 0.0  ;;  %v2994_v18 = vmul.f32 %v8751_v30, %v2858_v56  ;;  %vm2622_vm4 = vcmp.gt.f32.partialorder %v2494_v60, 0.0 }
 0x3d0   : > { %11330 = vst [vmem:[#allocation40_spill] sm:$0xff] %v9479_v44  ;;  %v1518_v44 = vcombine.high %v9453_v9, %v9453_v9  ;;  %v1519_v17 = vcombine.high %v1517_v58, %v1517_v58  ;;  %v1533_v25 = vrot.slane %v1517_v58, %v8721_v15  ;;  %v2750_v48 = vmul.f32 0.2, %v2494_v60 }
 0x3d1   : > { %3325 = vrot.lane.b32.xlu1 %v2988_v59, %s8422_s24  ;;  %3335 = vrot.lane.b32.xlu0 %v2993_v31, %s8422_s24  ;;  %v3012_v59 = vmul.f32 %v8751_v30, %v2876_v54  ;;  %v2877_v31 = vsel %vm2621_vm15, %v2493_v14, %v2749_v23  ;;  %v2094_v14 = vrot.slane %v1548_v20, %v8736_v24  ;;  %vm2611_vm5 = vcmp.gt.f32.partialorder %v2483_v34, 0.0 }
 0x3d2   : > { %v3013_v9 = vmul.f32 %v8751_v30, %v2877_v31  ;;  %v9521_v58 = vrot.slane %v1518_v44, %v8721_v15  ;;  %v1650_v16 = vcombine.high %v8709_v2, %v8709_v2  ;;  %v1657_v20 = vrot.slane %v8709_v2, %v8721_v15 }
 0x3d3   : > { %v9495_v45 = vpop.permute.xlu1 %3255  ;;  %v9497_v5 = vpop.permute.xlu0 %3249  ;;  %vm2623_vm6 = vcmp.gt.f32.partialorder %v2495_v36, 0.0  ;;  %v2138_v44 = vrot.slane %v9486_v12, %v8736_v24  ;;  %v2146_v12 = vrot.slane %v1600_v50, %v8736_v24 }
 0x3d4   : > { %11331 = vst [vmem:[#allocation41_spill] sm:$0xff] %v9495_v45  ;;  %11332 = vst [vmem:[#allocation42_spill] sm:$0xff] %v9497_v5  ;;  %v2739_v5 = vmul.f32 0.2, %v2483_v34  ;;  %v2485_v45 = vadd.f32 %v9110_v55, %v2094_v14  ;;  %v2878_v14 = vsel %vm2622_vm4, %v2494_v60, %v2750_v48  ;;  %v9550_v60 = vrot.slane %v1650_v16, %v8721_v15 }
 0x3d5   : > { %3329 = vrot.lane.b32.xlu1 %v2990_v40, %s8422_s24  ;;  %3373 = vrot.lane.b32.xlu0 %v3012_v59, %s8422_s24  ;;  %v2875_v40 = vsel %vm2619_vm2, %v2491_v39, %v2747_v52  ;;  %v2881_v59 = vsel %vm2625_vm3, %v2497_v47, %v2753_v1  ;;  %v9530_v52 = vrot.slane %v1519_v17, %v8721_v15 }
 0x3d6   : > { %v2102_v39 = vrot.slane %v1533_v25, %v8736_v24  ;;  %v3011_v31 = vmul.f32 %v8751_v30, %v2875_v40  ;;  %v3017_v1 = vmul.f32 %v8751_v30, %v2881_v59  ;;  %v2741_v17 = vmul.f32 0.2, %v2485_v45 }
 0x3d7   : > { %v9513_v54 = vpop.permute.xlu1 %3257  ;;  %v9515_v23 = vpop.permute.xlu0 %3253  ;;  %v2496_v2 = vadd.f32 %v9112_v6, %v2138_v44  ;;  %vm2613_vm7 = vcmp.gt.f32.partialorder %v2485_v45, 0.0  ;;  %v2090_v40 = vrot.slane %v9521_v58, %v8736_v24  ;;  %v3014_v59 = vmul.f32 %v8751_v30, %v2878_v14 }
 0x3d8   : > { %11333 = vst [vmem:[#allocation43_spill] sm:$0xff] %v9513_v54  ;;  %11334 = vst [vmem:[#allocation44_spill] sm:$0xff] %v9515_v23  ;;  %v2487_v23 = vadd.f32 %v9110_v55, %v2102_v39  ;;  %v1549_v54 = vcombine.high %v1533_v25, %v1533_v25  ;;  %v2498_v44 = vadd.f32 %v9112_v6, %v2146_v12 }
 0x3d9   : > { %3337 = vrot.lane.b32.xlu1 %v2994_v18, %s8422_s24  ;;  %3375 = vrot.lane.b32.xlu0 %v3013_v9, %s8422_s24  ;;  %v2751_v18 = vmul.f32 0.2, %v2495_v36  ;;  %v2867_v9 = vsel %vm2611_vm5, %v2483_v34, %v2739_v5  ;;  %v1665_v5 = vcombine.high %v1657_v20, %v1657_v20  ;;  %v2106_v34 = vrot.slane %v9530_v52, %v8736_v24 }
 0x3da   : > { %v3003_v39 = vmul.f32 %v8751_v30, %v2867_v9  ;;  %v2743_v16 = vmul.f32 0.2, %v2487_v23  ;;  %vm2624_vm8 = vcmp.gt.f32.partialorder %v2496_v2, 0.0  ;;  %vm2615_vm9 = vcmp.gt.f32.partialorder %v2487_v23, 0.0 }
 0x3db   : > { %v9535_v47 = vpop.permute.xlu1 %3227  ;;  %v9537_v56 = vpop.permute.xlu0 %3229  ;;  %v2879_v50 = vsel %vm2623_vm6, %v2495_v36, %v2751_v18  ;;  %v2110_v14 = vrot.slane %v1549_v54, %v8736_v24  ;;  %v1666_v36 = vcombine.high %v9550_v60, %v9550_v60  ;;  %v9571_v6 = vrot.slane %v1657_v20, %v8721_v15 }
 0x3dc   : > { %11335 = vst [vmem:[#allocation45_spill] sm:$0xff] %v9535_v47  ;;  %11336 = vst [vmem:[#allocation46_spill] sm:$0xff] %v9537_v56  ;;  %v2488_v56 = vadd.f32 %v9110_v55, %v2106_v34  ;;  %v1550_v47 = vcombine.high %v9521_v58, %v9521_v58  ;;  %v2484_v18 = vadd.f32 %v9110_v55, %v2090_v40  ;;  %v2754_v54 = vmul.f32 0.2, %v2498_v44 }
 0x3dd   : > { %3371 = vrot.lane.b32.xlu1 %v3011_v31, %s8422_s24  ;;  %3383 = vrot.lane.b32.xlu0 %v3017_v1, %s8422_s24  ;;  %v2869_v31 = vsel %vm2613_vm7, %v2485_v45, %v2741_v17  ;;  %v2752_v1 = vmul.f32 0.2, %v2496_v2  ;;  %v9574_v45 = vrot.slane %v1665_v5, %v8721_v15  ;;  %v3015_v17 = vmul.f32 %v8751_v30, %v2879_v50 }
 0x3de   : > { %v3005_v12 = vmul.f32 %v8751_v30, %v2869_v31  ;;  %v2489_v34 = vadd.f32 %v9110_v55, %v2110_v14  ;;  %vm2626_vm10 = vcmp.gt.f32.partialorder %v2498_v44, 0.0  ;;  %v2744_v20 = vmul.f32 0.2, %v2488_v56 }
 0x3df   : > { %v9554_v48 = vpop.permute.xlu1 %3231  ;;  %v9556_v25 = vpop.permute.xlu0 %3233  ;;  %v1551_v5 = vcombine.high %v9530_v52, %v9530_v52  ;;  %vm2616_vm11 = vcmp.gt.f32.partialorder %v2488_v56, 0.0  ;;  %v2098_v40 = vrot.slane %v1550_v47, %v8736_v24  ;;  %v9590_v50 = vrot.slane %v1666_v36, %v8721_v15 }
 0x3e0   : > { %11337 = vst [vmem:[#allocation47_spill] sm:$0xff] %v9556_v25  ;;  %v1695_v31 = vcombine.high %v9571_v6, %v9571_v6  ;;  %v2872_v36 = vsel %vm2616_vm11, %v2488_v56, %v2744_v20  ;;  %vm2612_vm12 = vcmp.gt.f32.partialorder %v2484_v18, 0.0  ;;  %vm2617_vm13 = vcmp.gt.f32.partialorder %v2489_v34, 0.0 }
 0x3e1   : > { %3377 = vrot.lane.b32.xlu1 %v3014_v59, %s8422_s24  ;;  %3355 = vrot.lane.b32.xlu0 %v3003_v39, %s8422_s24  ;;  %v2880_v59 = vsel %vm2624_vm8, %v2496_v2, %v2752_v1  ;;  %v2871_v39 = vsel %vm2615_vm9, %v2487_v23, %v2743_v16  ;;  %v2186_v2 = vrot.slane %v9574_v45, %v8736_v24  ;;  %v2740_v23 = vmul.f32 0.2, %v2484_v18 }
 0x3e2   : > { %v3016_v16 = vmul.f32 %v8751_v30, %v2880_v59  ;;  %v3007_v14 = vmul.f32 %v8751_v30, %v2871_v39  ;;  %v2486_v47 = vadd.f32 %v9110_v55, %v2098_v40  ;;  %v1698_v59 = vcombine.high %v9590_v50, %v9590_v50 }
 0x3e3   : > { %v9577_v58 = vpop.permute.xlu1 %3235  ;;  %v9579_v9 = vpop.permute.xlu0 %3237  ;;  %v2190_v39 = vrot.slane %v1695_v31, %v8736_v24  ;;  %v3008_v40 = vmul.f32 %v8751_v30, %v2872_v36  ;;  %v1697_v25 = vcombine.high %v9574_v45, %v9574_v45 }
 0x3e4   : > { %11338 = vst [vmem:[#allocation48_spill] sm:$0xff] %v9579_v9  ;;  %v2508_v9 = vadd.f32 %v9145_v22, %v2186_v2  ;;  %v2868_v2 = vsel %vm2612_vm12, %v2484_v18, %v2740_v23  ;;  %vm2614_vm14 = vcmp.gt.f32.partialorder %v2486_v47, 0.0  ;;  %v1601_v18 = vcombine.high %v8713_v4, %v8713_v4 }
 0x3e5   : > { %3379 = vrot.lane.b32.xlu1 %v3015_v17, %s8422_s24  ;;  %3359 = vrot.lane.b32.xlu0 %v3005_v12, %s8422_s24  ;;  %v2882_v17 = vsel %vm2626_vm10, %v2498_v44, %v2754_v54  ;;  %v2745_v12 = vmul.f32 0.2, %v2489_v34  ;;  %v9612_v44 = vrot.slane %v8713_v4, %v8721_v15  ;;  %v2509_v31 = vadd.f32 %v9145_v22, %v2190_v39 }
 0x3e6   : > { %v3018_v56 = vmul.f32 %v8751_v30, %v2882_v17  ;;  %v2182_v17 = vrot.slane %v9571_v6, %v8736_v24  ;;  %vm2636_vm15 = vcmp.gt.f32.partialorder %v2508_v9, 0.0  ;;  %v2210_v23 = vrot.slane %v1698_v59, %v8736_v24 }
 0x3e7   : > { %v9596_v1 = vpop.permute.xlu1 %3239  ;;  %v9598_v52 = vpop.permute.xlu0 %3277  ;;  %vm2637_vm3 = vcmp.gt.f32.partialorder %v2509_v31, 0.0  ;;  %v2194_v59 = vrot.slane %v1697_v25, %v8736_v24 }
 0x3e8   : > { %11339 = vst [vmem:[#allocation49_spill] sm:$0xff] %v9596_v1  ;;  %11340 = vst [vmem:[#allocation50_spill] sm:$0xff] %v9598_v52  ;;  %v2114_v1 = vrot.slane %v1551_v5, %v8736_v24  ;;  %v2764_v52 = vmul.f32 0.2, %v2508_v9  ;;  %v2507_v39 = vadd.f32 %v9145_v22, %v2182_v17  ;;  %v2514_v4 = vadd.f32 %v9145_v22, %v2210_v23 }
 0x3e9   : > { %3381 = vrot.lane.b32.xlu1 %v3016_v16, %s8422_s24  ;;  %3363 = vrot.lane.b32.xlu0 %v3007_v14, %s8422_s24  ;;  %v2742_v16 = vmul.f32 0.2, %v2486_v47  ;;  %v2873_v14 = vsel %vm2617_vm13, %v2489_v34, %v2745_v12  ;;  %v3004_v34 = vmul.f32 %v8751_v30, %v2868_v2  ;;  %v1680_v2 = vrot.slane %v9550_v60, %v8721_v15 }
 0x3ea   : > { %v2490_v5 = vadd.f32 %v9110_v55, %v2114_v1  ;;  %v1624_v55 = vrot.slane %v9612_v44, %v8721_v15  ;;  %v3009_v6 = vmul.f32 %v8751_v30, %v2873_v14  ;;  %vm2635_vm4 = vcmp.gt.f32.partialorder %v2507_v39, 0.0 }
 0x3eb   : > { %v9615_v54 = vpop.permute.xlu1 %3241  ;;  %v9617_v20 = vpop.permute.xlu0 %3287  ;;  %v2870_v36 = vsel %vm2614_vm14, %v2486_v47, %v2742_v16  ;;  %v1615_v47 = vrot.slane %v1601_v18, %v8721_v15  ;;  %v2770_v25 = vmul.f32 0.2, %v2514_v4  ;;  %vm2642_vm5 = vcmp.gt.f32.partialorder %v2514_v4, 0.0 }
 0x3ec   : > { %11341 = vst [vmem:[#allocation51_spill] sm:$0xff] %v9617_v20  ;;  %v2746_v12 = vmul.f32 0.2, %v2490_v5  ;;  %vm2618_vm2 = vcmp.gt.f32.partialorder %v2490_v5, 0.0  ;;  %v1646_v16 = vcombine.high %v1624_v55, %v1624_v55  ;;  %v2150_v14 = vrot.slane %v1624_v55, %v8736_v24 }
 0x3ed   : > { %3385 = vrot.lane.b32.xlu1 %v3018_v56, %s8422_s24  ;;  %3365 = vrot.lane.b32.xlu0 %v3008_v40, %s8422_s24  ;;  %v2892_v56 = vsel %vm2636_vm15, %v2508_v9, %v2764_v52  ;;  %v2765_v40 = vmul.f32 0.2, %v2509_v31  ;;  %v3006_v9 = vmul.f32 %v8751_v30, %v2870_v36  ;;  %v2198_v20 = vrot.slane %v1680_v2, %v8736_v24 }
 0x3ee   : > { %v3028_v60 = vmul.f32 %v8751_v30, %v2892_v56  ;;  %v2874_v23 = vsel %vm2618_vm2, %v2490_v5, %v2746_v12  ;;  %v2499_v18 = vadd.f32 %v9143_v21, %v2150_v14  ;;  %v1617_v55 = vcombine.high %v1615_v47, %v1615_v47 }
 0x3ef   : > { %v9634_v1 = vpop.permute.xlu1 %3275  ;;  %v9636_v45 = vpop.permute.xlu0 %3261  ;;  %v1631_v36 = vrot.slane %v1615_v47, %v8721_v15  ;;  %v2158_v5 = vrot.slane %v1646_v16, %v8736_v24  ;;  %v3010_v12 = vmul.f32 %v8751_v30, %v2874_v23  ;;  %v1696_v47 = vcombine.high %v1680_v2, %v1680_v2 }
 0x3f0   : > { %11342 = vst [vmem:[#allocation52_spill] sm:$0xff] %v9636_v45  ;;  %v2893_v45 = vsel %vm2637_vm3, %v2509_v31, %v2765_v40  ;;  %v1616_v16 = vcombine.high %v9612_v44, %v9612_v44  ;;  %vm2627_vm7 = vcmp.gt.f32.partialorder %v2499_v18, 0.0 }
 0x3f1   : > { %3357 = vrot.lane.b32.xlu1 %v3004_v34, %s8422_s24  ;;  %3367 = vrot.lane.b32.xlu0 %v3009_v6, %s8422_s24  ;;  %v2763_v34 = vmul.f32 0.2, %v2507_v39  ;;  %v2510_v6 = vadd.f32 %v9145_v22, %v2194_v59  ;;  %v3029_v40 = vmul.f32 %v8751_v30, %v2893_v45  ;;  %v2202_v45 = vrot.slane %v9590_v50, %v8736_v24 }
 0x3f3   : > { %v9649_v52 = vpop.permute.xlu1 %3279  ;;  %v9651_v17 = vpop.permute.xlu0 %3263  ;;  %v2891_v59 = vsel %vm2635_vm4, %v2507_v39, %v2763_v34  ;;  %v2766_v14 = vmul.f32 0.2, %v2510_v6  ;;  %vm2638_vm6 = vcmp.gt.f32.partialorder %v2510_v6, 0.0  ;;  %v1645_v39 = vrot.slane %v1617_v55, %v8721_v15 }
 0x3f4   : > { %11343 = vst [vmem:[#allocation53_spill] sm:$0xff] %v9649_v52  ;;  %11344 = vst [vmem:[#allocation54_spill] sm:$0xff] %v9651_v17  ;;  %v2898_v17 = vsel %vm2642_vm5, %v2514_v4, %v2770_v25  ;;  %v2501_v52 = vadd.f32 %v9143_v21, %v2158_v5  ;;  %v2166_v4 = vrot.slane %v1631_v36, %v8736_v24  ;;  %vm4624_vm4 = vcmask 1041409  }
 0x3f5   : > { %3361 = vrot.lane.b32.xlu1 %v3006_v9, %s8422_s24  ;;  %3405 = vrot.lane.b32.xlu0 %v3028_v60, %s8422_s24  ;;  %v2511_v9 = vadd.f32 %v9145_v22, %v2198_v20  ;;  %v2755_v60 = vmul.f32 0.2, %v2499_v18  ;;  %v3027_v20 = vmul.f32 %v8751_v30, %v2891_v59  ;;  %v3034_v44 = vmul.f32 %v8751_v30, %v2898_v17 }
 0x3f6   : > { %v2894_v34 = vsel %vm2638_vm6, %v2510_v6, %v2766_v14  ;;  %v2512_v5 = vadd.f32 %v9145_v22, %v2202_v45  ;;  %v2503_v50 = vadd.f32 %v9143_v21, %v2166_v4  ;;  %v1638_v55 = vrot.slane %v1616_v16, %v8721_v15 }
 0x3f7   : > { %v9662_v56 = vpop.permute.xlu1 %3281  ;;  %v9664_v31 = vpop.permute.xlu0 %3265  ;;  %v2767_v25 = vmul.f32 0.2, %v2511_v9  ;;  %vm2639_vm8 = vcmp.gt.f32.partialorder %v2511_v9, 0.0  ;;  %vm2629_vm9 = vcmp.gt.f32.partialorder %v2501_v52, 0.0  ;;  %v2206_v59 = vrot.slane %v1696_v47, %v8736_v24 }
 0x3f8   : > { %v3030_v17 = vmul.f32 %v8751_v30, %v2894_v34  ;;  %v2170_v6 = vrot.slane %v1645_v39, %v8736_v24  ;;  %v2768_v15 = vmul.f32 0.2, %v2512_v5  ;;  %vm2640_vm10 = vcmp.gt.f32.partialorder %v2512_v5, 0.0 }
 0x3f9   : > { %3369 = vrot.lane.b32.xlu1 %v3010_v12, %s8422_s24  ;;  %3407 = vrot.lane.b32.xlu0 %v3029_v40, %s8422_s24  ;;  %v2883_v12 = vsel %vm2627_vm7, %v2499_v18, %v2755_v60  ;;  %v2757_v40 = vmul.f32 0.2, %v2501_v52  ;;  %v2895_v45 = vsel %vm2639_vm8, %v2511_v9, %v2767_v25  ;;  %v2513_v16 = vadd.f32 %v9145_v22, %v2206_v59 }
 0x3fa   : > { %v3019_v60 = vmul.f32 %v8751_v30, %v2883_v12  ;;  %v2504_v47 = vadd.f32 %v9143_v21, %v2170_v6  ;;  %vm2631_vm11 = vcmp.gt.f32.partialorder %v2503_v50, 0.0  ;;  %v1649_v34 = vcombine.high %v1645_v39, %v1645_v39 }
 0x3fb   : > { %v9678_v23 = vpop.permute.xlu1 %3283  ;;  %v9680_v2 = vpop.permute.xlu0 %3267  ;;  %v2885_v4 = vsel %vm2629_vm9, %v2501_v52, %v2757_v40  ;;  %v3031_v12 = vmul.f32 %v8751_v30, %v2895_v45  ;;  %v2896_v40 = vsel %vm2640_vm10, %v2512_v5, %v2768_v15  ;;  %v2769_v59 = vmul.f32 0.2, %v2513_v16 }
 0x3fc   : > { %11345 = vst [vmem:[#allocation55_spill] sm:$0xff] %v9680_v2  ;;  %v1647_v2 = vcombine.high %v1631_v36, %v1631_v36  ;;  %v2154_v36 = vrot.slane %v1638_v55, %v8736_v24  ;;  %v3021_v52 = vmul.f32 %v8751_v30, %v2885_v4  ;;  %vm2641_vm12 = vcmp.gt.f32.partialorder %v2513_v16, 0.0 }
 0x3fd   : > { %3403 = vrot.lane.b32.xlu1 %v3027_v20, %s8422_s24  ;;  %3417 = vrot.lane.b32.xlu0 %v3034_v44, %s8422_s24  ;;  %v2759_v20 = vmul.f32 0.2, %v2503_v50  ;;  %v1648_v44 = vcombine.high %v1638_v55, %v1638_v55  ;;  %vm2632_vm13 = vcmp.gt.f32.partialorder %v2504_v47, 0.0  ;;  %v3032_v15 = vmul.f32 %v8751_v30, %v2896_v40 }
 0x3fe   : > { %v2174_v9 = vrot.slane %v1647_v2, %v8736_v24  ;;  %v2500_v6 = vadd.f32 %v9143_v21, %v2154_v36  ;;  %v2178_v2 = vrot.slane %v1649_v34, %v8736_v24  ;;  %v2897_v4 = vsel %vm2641_vm12, %v2513_v16, %v2769_v59 }
 0x3ff   : > { %v9691_v14 = vpop.permute.xlu1 %3285  ;;  %v9693_v18 = vpop.permute.xlu0 %3269  ;;  %v2162_v39 = vrot.slane %v1648_v44, %v8736_v24  ;;  %v3033_v34 = vmul.f32 %v8751_v30, %v2897_v4  ;;  %vm4626_vm5 = vcmask 1042434   ;;  %vm4628_vm6 = vcmask 1043459  }
 0x400   : > { %v2505_v55 = vadd.f32 %v9143_v21, %v2174_v9  ;;  %vm2628_vm14 = vcmp.gt.f32.partialorder %v2500_v6, 0.0  ;;  %vm4630_vm7 = vcmask 1044484   ;;  %vm4632_vm8 = vcmask 1045509  }
 0x401   : > { %3409 = vrot.lane.b32.xlu1 %v3030_v17, %s8422_s24  ;;  %3387 = vrot.lane.b32.xlu0 %v3019_v60, %s8422_s24  ;;  %v2887_v17 = vsel %vm2631_vm11, %v2503_v50, %v2759_v20  ;;  %v2760_v60 = vmul.f32 0.2, %v2504_v47  ;;  %v2756_v20 = vmul.f32 0.2, %v2500_v6  ;;  %vm4634_vm9 = vcmask 1046534  }
 0x402   : > { %v3023_v50 = vmul.f32 %v8751_v30, %v2887_v17  ;;  %v2761_v9 = vmul.f32 0.2, %v2505_v55  ;;  %vm2633_vm15 = vcmp.gt.f32.partialorder %v2505_v55, 0.0  ;;  %vm4636_vm10 = vcmask 1047559  }
 0x403   : > { %v9703_v25 = vpop.permute.xlu1 %3289  ;;  %v9705_v22 = vpop.permute.xlu0 %3271  ;;  %v2888_v36 = vsel %vm2632_vm13, %v2504_v47, %v2760_v60  ;;  %v2884_v47 = vsel %vm2628_vm14, %v2500_v6, %v2756_v20 }
 0x404   : > { %v3024_v16 = vmul.f32 %v8751_v30, %v2888_v36  ;;  %v2889_v40 = vsel %vm2633_vm15, %v2505_v55, %v2761_v9 }
 0x405   : > { %3411 = vrot.lane.b32.xlu1 %v3031_v12, %s8422_s24  ;;  %3391 = vrot.lane.b32.xlu0 %v3021_v52, %s8422_s24  ;;  %v2502_v12 = vadd.f32 %v9143_v21, %v2162_v39  ;;  %v2506_v52 = vadd.f32 %v9143_v21, %v2178_v2  ;;  %v3020_v39 = vmul.f32 %v8751_v30, %v2884_v47 }
 0x406   : > { %v3025_v2 = vmul.f32 %v8751_v30, %v2889_v40 }
 0x407   : > { %v9714_v45 = vpop.permute.xlu1 %3259  ;;  %v9716_v5 = vpop.permute.xlu0 %3309  ;;  %v2758_v59 = vmul.f32 0.2, %v2502_v12  ;;  %v2762_v17 = vmul.f32 0.2, %v2506_v52  ;;  %vm2630_vm2 = vcmp.gt.f32.partialorder %v2502_v12, 0.0  ;;  %vm2634_vm3 = vcmp.gt.f32.partialorder %v2506_v52, 0.0 }
 0x409   : > { %3413 = vrot.lane.b32.xlu1 %v3032_v15, %s8422_s24  ;;  %3395 = vrot.lane.b32.xlu0 %v3023_v50, %s8422_s24  ;;  %v2886_v15 = vsel %vm2630_vm2, %v2502_v12, %v2758_v59  ;;  %v2890_v50 = vsel %vm2634_vm3, %v2506_v52, %v2762_v17 }
 0x40a   : > { %v3022_v55 = vmul.f32 %v8751_v30, %v2886_v15  ;;  %v3026_v4 = vmul.f32 %v8751_v30, %v2890_v50  ;;  %v3571_v50 = vsel %vm486_vm1, %v9163_v57, 0.0  ;;  %v3586_v57 = vsel %vm486_vm1, %v9195_v28, 0.0 }
 0x40b   : > { %v9724_v24 = vpop.permute.xlu1 %3273  ;;  %v9726_v44 = vpop.permute.xlu0 %3311  ;;  %v3556_v28 = vsel %vm486_vm1, %v9233_v51, 0.0  ;;  %v3622_v51 = vsel %vm486_vm1, %v9272_v63, 0.0  ;;  %v3631_v63 = vsel %vm486_vm1, %v9311_v61, 0.0  ;;  %v3637_v61 = vsel %vm486_vm1, %v9347_v29, 0.0  ;;  %v11347_v29 = vld [vmem:[#allocation34_spill] sm:$0xff] }
 0x40d   : > { %3415 = vrot.lane.b32.xlu1 %v3033_v34, %s8422_s24  ;;  %3397 = vrot.lane.b32.xlu0 %v3024_v16, %s8422_s24 }
 0x40f   : > { %v9732_v21 = vpop.permute.xlu1 %3307  ;;  %v9734_v60 = vpop.permute.xlu0 %3319 }
 0x411   : > { %3389 = vrot.lane.b32.xlu1 %v3020_v39, %s8422_s24  ;;  %3399 = vrot.lane.b32.xlu0 %v3025_v2, %s8422_s24  ;;  %v3574_v39 = vsel %vm486_vm1, %v9161_v8, 0.0  ;;  %v3577_v2 = vsel %vm486_vm1, %v9182_v3, 0.0  ;;  %v3580_v8 = vsel %vm486_vm1, %v9180_v26, 0.0  ;;  %v3547_v26 = vsel %vm486_vm1, %v9214_v0, 0.0 }
 0x412   : > { %v3568_v0 = vsel %vm486_vm1, %v9249_v41, 0.0  ;;  %v3628_v41 = vsel %vm486_vm1, %v9293_v27, 0.0  ;;  %v3634_v27 = vsel %vm486_vm1, %v9332_v49, 0.0  ;;  %v11346_v49 = vld [vmem:[#allocation33_spill] sm:$0xff] }
 0x413   : > { %v9740_v6 = vpop.permute.xlu0 %3291  ;;  %v9744_v20 = vpop.permute.xlu1 %3313 }
 0x415   : > { %3393 = vrot.lane.b32.xlu1 %v3022_v55, %s8422_s24  ;;  %3401 = vrot.lane.b32.xlu0 %v3026_v4, %s8422_s24  ;;  %v3583_v4 = vsel %vm486_vm1, %v9197_v11, 0.0  ;;  %v3592_v11 = vsel %vm486_vm1, %v9231_v38, 0.0 }
 0x417   : > { %v9748_v36 = vpop.permute.xlu0 %3295  ;;  %v9750_v9 = vpop.permute.xlu1 %3315 }
 0x41b   : > { %v9752_v12 = vpop.permute.xlu0 %3299  ;;  %v9754_v52 = vpop.permute.xlu1 %3317 }
 0x41f   : > { %v9756_v34 = vpop.permute.xlu0 %3301  ;;  %v9758_v16 = vpop.permute.xlu1 %3321 }
 0x423   : > { %v9760_v47 = vpop.permute.xlu0 %3303  ;;  %v9762_v30 = vpop.permute.xlu1 %3293 }
 0x427   : > { %v9764_v40 = vpop.permute.xlu0 %3341  ;;  %v9766_v59 = vpop.permute.xlu1 %3297 }
 0x42b   : > { %v9768_v17 = vpop.permute.xlu0 %3343  ;;  %v9774_v15 = vpop.permute.xlu1 %3305 }
 0x42f   : > { %v9778_v55 = vpop.permute.xlu0 %3351 }
 0x433   : > { %v9786_v3 = vpop.permute.xlu0 %3323 }
 0x434   : > { %3575 = vadd.xlane.f32.xlu0 %v3574_v39  ;;  %v9784_v39 = vpop.permute.xlu1 %3339 }
 0x438   : > { %3578 = vadd.xlane.f32.xlu0 %v3577_v2  ;;  %v3589_v2 = vsel %vm486_vm1, %v9212_v53, 0.0  ;;  %v3550_v53 = vsel %vm486_vm1, %v9247_v43, 0.0  ;;  %v3559_v43 = vsel %vm486_vm1, %v9291_v32, 0.0 }
 0x439   : > { %3572 = vadd.xlane.f32.xlu1 %v3571_v50  ;;  %v9794_v50 = vpop.permute.xlu1 %3345 }
 0x43c   : > { %3584 = vadd.xlane.f32.xlu0 %v3583_v4  ;;  %v9798_v4 = vpop.permute.xlu0 %3327 }
 0x43d   : > { %3581 = vadd.xlane.f32.xlu1 %v3580_v8  ;;  %v9804_v8 = vpop.permute.xlu1 %3347 }
 0x440   : > { %3590 = vadd.xlane.f32.xlu0 %v3589_v2  ;;  %v9806_v38 = vpop.permute.xlu0 %3331  ;;  %v3553_v2 = vsel %vm486_vm1, %v9270_v62, 0.0  ;;  %v3562_v62 = vsel %vm486_vm1, %v9309_v35, 0.0  ;;  %v3619_v35 = vsel %vm486_vm1, %v9345_v46, 0.0 }
 0x441   : > { %3587 = vadd.xlane.f32.xlu1 %v3586_v57  ;;  %v9814_v57 = vpop.permute.xlu1 %3349 }
 0x444   : > { %3593 = vadd.xlane.f32.xlu0 %v3592_v11  ;;  %v9818_v11 = vpop.permute.xlu0 %3333 }
 0x445   : > { %3548 = vadd.xlane.f32.xlu1 %v3547_v26  ;;  %v9824_v26 = vpop.permute.xlu1 %3353 }
 0x448   : > { %3551 = vadd.xlane.f32.xlu0 %v3550_v53  ;;  %v9826_v32 = vpop.permute.xlu0 %3335  ;;  %v3565_v53 = vsel %vm486_vm1, %v9330_v33, 0.0  ;;  %v3625_v33 = vsel %vm486_vm1, %v9359_v10, 0.0  ;;  %v3595_v10 = vsel %vm486_vm1, %v9395_v7, 0.0 }
 0x449   : > { %3557 = vadd.xlane.f32.xlu1 %v3556_v28  ;;  %v9834_v28 = vpop.permute.xlu1 %3325 }
 0x44c   : > { %3554 = vadd.xlane.f32.xlu0 %v3553_v2  ;;  %v9838_v2 = vpop.permute.xlu0 %3373 }
 0x44d   : > { %3569 = vadd.xlane.f32.xlu1 %v3568_v0  ;;  %v9844_v0 = vpop.permute.xlu1 %3329 }
 0x450   : > { %3560 = vadd.xlane.f32.xlu0 %v3559_v43  ;;  %v9846_v46 = vpop.permute.xlu0 %3375  ;;  %v3640_v43 = vsel %vm486_vm1, %v9380_v42, 0.0  ;;  %v3607_v42 = vsel %vm486_vm1, %v9415_v13, 0.0  ;;  %v3667_v13 = vsel %vm486_vm1, %v9456_v37, 0.0 }
 0x451   : > { %3623 = vadd.xlane.f32.xlu1 %v3622_v51  ;;  %v3598_v51 = vsel %vm486_vm1, %v11346_v49, 0.0 }
 0x454   : > { %3563 = vadd.xlane.f32.xlu0 %v3562_v62  ;;  %v9854_v62 = vpop.permute.xlu1 %3337 }
 0x455   : > { %3629 = vadd.xlane.f32.xlu1 %v3628_v41  ;;  %v3601_v41 = vsel %vm486_vm1, %v11347_v29, 0.0 }
 0x458   : > { %3566 = vadd.xlane.f32.xlu0 %v3565_v53  ;;  %v9858_v53 = vpop.permute.xlu0 %3383 }
 0x459   : > { %3632 = vadd.xlane.f32.xlu1 %v3631_v63  ;;  %v11348_v63 = vld [vmem:[#allocation35_spill] sm:$0xff] }
 0x45c   : > { %3620 = vadd.xlane.f32.xlu0 %v3619_v35  ;;  %v3604_v35 = vsel %vm486_vm1, %v11348_v63, 0.0  ;;  %v9866_v7 = vpop.permute.xlu0 %3355  ;;  %v11352_v63 = vld [vmem:[#allocation39_spill] sm:$0xff] }
 0x45d   : > { %3635 = vadd.xlane.f32.xlu1 %v3634_v27  ;;  %v9864_v27 = vpop.permute.xlu1 %3371 }
 0x460   : > { %3626 = vadd.xlane.f32.xlu0 %v3625_v33  ;;  %v11349_v33 = vld [vmem:[#allocation37_spill] sm:$0xff] }
 0x461   : > { %3638 = vadd.xlane.f32.xlu1 %v3637_v61  ;;  %v3616_v61 = vsel %vm486_vm1, %v11349_v33, 0.0 }
 0x464   : > { %3641 = vadd.xlane.f32.xlu0 %v3640_v43  ;;  %v11350_v43 = vld [vmem:[#allocation36_spill] sm:$0xff] }
 0x465   : > { %3599 = vadd.xlane.f32.xlu1 %v3598_v51  ;;  %v3610_v49 = vsel %vm486_vm1, %v11350_v43, 0.0  ;;  %v9874_v51 = vpop.permute.xlu1 %3377 }
 0x468   : > { %3596 = vadd.xlane.f32.xlu0 %v3595_v10  ;;  %v11351_v10 = vld [vmem:[#allocation38_spill] sm:$0xff] }
 0x469   : > { %3602 = vadd.xlane.f32.xlu1 %v3601_v41  ;;  %v3613_v29 = vsel %vm486_vm1, %v11351_v10, 0.0  ;;  %v9878_v41 = vpop.permute.xlu0 %3359  ;;  %v9884_v33 = vpop.permute.xlu1 %3379  ;;  %v11356_v10 = vld [vmem:[#allocation43_spill] sm:$0xff] }
 0x46c   : > { %3608 = vadd.xlane.f32.xlu0 %v3607_v42  ;;  %v3679_v42 = vsel %vm486_vm1, %v9477_v19, 0.0  ;;  %v3688_v19 = vsel %vm486_vm1, %v11356_v10, 0.0 }
 0x46d   : > { %3605 = vadd.xlane.f32.xlu1 %v3604_v35  ;;  %v3670_v35 = vsel %vm486_vm1, %v11352_v63, 0.0  ;;  %v9886_v37 = vpop.permute.xlu0 %3363 }
 0x46e   : > { %11353 = vst [vmem:[#allocation33_spill] sm:$0xff] %v9886_v37  ;;  %v11359_v37 = vld [vmem:[#allocation45_spill] sm:$0xff] }
 0x470   : > { %3617 = vadd.xlane.f32.xlu0 %v3616_v61  ;;  %v11354_v61 = vld [vmem:[#allocation41_spill] sm:$0xff] }
 0x471   : > { %3611 = vadd.xlane.f32.xlu1 %v3610_v49  ;;  %v3685_v43 = vsel %vm486_vm1, %v11354_v61, 0.0  ;;  %v11355_v49 = vld [vmem:[#allocation40_spill] sm:$0xff]  ;;  %v3643_v61 = vsel %vm486_vm1, %v11359_v37, 0.0  ;;  %v3655_v37 = vsel %vm486_vm1, %v9577_v58, 0.0 }
 0x474   : > { %3668 = vadd.xlane.f32.xlu0 %v3667_v13  ;;  %v3673_v13 = vsel %vm486_vm1, %v11355_v49, 0.0 }
 0x475   : > { %3614 = vadd.xlane.f32.xlu1 %v3613_v29  ;;  %v9894_v29 = vpop.permute.xlu1 %3381 }
 0x478   : > { %3680 = vadd.xlane.f32.xlu0 %v3679_v42  ;;  %v11357_v42 = vld [vmem:[#allocation42_spill] sm:$0xff] }
 0x479   : > { %3671 = vadd.xlane.f32.xlu1 %v3670_v35  ;;  %v3676_v63 = vsel %vm486_vm1, %v11357_v42, 0.0  ;;  %v9898_v35 = vpop.permute.xlu0 %3365  ;;  %v11362_v42 = vld [vmem:[#allocation46_spill] sm:$0xff] }
 0x47a   : > { %11358 = vst [vmem:[#allocation34_spill] sm:$0xff] %v9898_v35  ;;  %v3646_v35 = vsel %vm486_vm1, %v11362_v42, 0.0 }
 0x47c   : > { %3686 = vadd.xlane.f32.xlu0 %v3685_v43  ;;  %v11360_v43 = vld [vmem:[#allocation44_spill] sm:$0xff] }
 0x47d   : > { %3674 = vadd.xlane.f32.xlu1 %v3673_v13  ;;  %v3682_v49 = vsel %vm486_vm1, %v11360_v43, 0.0  ;;  %v9904_v13 = vpop.permute.xlu1 %3385  ;;  %v9906_v10 = vpop.permute.xlu0 %3367 }
 0x47e   : > { %11361 = vst [vmem:[#allocation35_spill] sm:$0xff] %v9906_v10  ;;  %v11365_v10 = vld [vmem:[#allocation49_spill] sm:$0xff] }
 0x480   : > { %3689 = vadd.xlane.f32.xlu0 %v3688_v19  ;;  %v3649_v19 = vsel %vm486_vm1, %v9554_v48, 0.0  ;;  %v3661_v48 = vsel %vm486_vm1, %v11365_v10, 0.0  ;;  %v3715_v10 = vsel %vm486_vm1, %v9634_v1, 0.0 }
 0x481   : > { %3677 = vadd.xlane.f32.xlu1 %v3676_v63  ;;  %v9914_v63 = vpop.permute.xlu1 %3357 }
 0x484   : > { %3644 = vadd.xlane.f32.xlu0 %v3643_v61  ;;  %v11363_v61 = vld [vmem:[#allocation47_spill] sm:$0xff] }
 0x485   : > { %3683 = vadd.xlane.f32.xlu1 %v3682_v49  ;;  %v3652_v43 = vsel %vm486_vm1, %v11363_v61, 0.0  ;;  %v9918_v49 = vpop.permute.xlu0 %3405  ;;  %v11368_v61 = vld [vmem:[#allocation50_spill] sm:$0xff] }
 0x486   : > { %11364 = vst [vmem:[#allocation37_spill] sm:$0xff] %v9918_v49  ;;  %v3718_v49 = vsel %vm486_vm1, %v11368_v61, 0.0 }
 0x488   : > { %3650 = vadd.xlane.f32.xlu0 %v3649_v19  ;;  %v11366_v19 = vld [vmem:[#allocation48_spill] sm:$0xff] }
 0x489   : > { %3647 = vadd.xlane.f32.xlu1 %v3646_v35  ;;  %v3658_v42 = vsel %vm486_vm1, %v11366_v19, 0.0  ;;  %v9924_v35 = vpop.permute.xlu1 %3361  ;;  %v9926_v58 = vpop.permute.xlu0 %3407 }
 0x48a   : > { %11367 = vst [vmem:[#allocation36_spill] sm:$0xff] %v9926_v58  ;;  %v11371_v58 = vld [vmem:[#allocation53_spill] sm:$0xff] }
 0x48c   : > { %3656 = vadd.xlane.f32.xlu0 %v3655_v37  ;;  %v3664_v37 = vsel %vm486_vm1, %v9615_v54, 0.0  ;;  %v3721_v54 = vsel %vm486_vm1, %v11371_v58, 0.0  ;;  %v3727_v58 = vsel %vm486_vm1, %v9678_v23, 0.0 }
 0x48d   : > { %3653 = vadd.xlane.f32.xlu1 %v3652_v43  ;;  %v9934_v43 = vpop.permute.xlu1 %3369 }
 0x490   : > { %3662 = vadd.xlane.f32.xlu0 %v3661_v48  ;;  %v11369_v48 = vld [vmem:[#allocation51_spill] sm:$0xff] }
 0x491   : > { %3659 = vadd.xlane.f32.xlu1 %v3658_v42  ;;  %v3733_v19 = vsel %vm486_vm1, %v11369_v48, 0.0  ;;  %v9938_v42 = vpop.permute.xlu0 %3417  ;;  %v11373_v48 = vld [vmem:[#allocation54_spill] sm:$0xff] }
 0x492   : > { %11370 = vst [vmem:[#allocation38_spill] sm:$0xff] %v9938_v42  ;;  %v3697_v42 = vsel %vm486_vm1, %v11373_v48, 0.0  ;;  %v3736_v48 = vsel %vm486_vm1, %v9703_v25, 0.0  ;;  %v3712_v25 = vsel %vm486_vm1, %v9724_v24, 0.0  ;;  %v3772_v24 = vsel %vm486_vm1, %v9744_v20, 0.0 }
 0x494   : > { %3665 = vadd.xlane.f32.xlu0 %v3664_v37  ;;  %v11372_v37 = vld [vmem:[#allocation52_spill] sm:$0xff] }
 0x495   : > { %3719 = vadd.xlane.f32.xlu1 %v3718_v49  ;;  %v3694_v61 = vsel %vm486_vm1, %v11372_v37, 0.0  ;;  %v9944_v49 = vpop.permute.xlu1 %3403  ;;  %v9946_v1 = vpop.permute.xlu0 %3387 }
 0x498   : > { %3716 = vadd.xlane.f32.xlu0 %v3715_v10  ;;  %v3724_v10 = vsel %vm486_vm1, %v9662_v56, 0.0  ;;  %v3730_v56 = vsel %vm486_vm1, %v9691_v14, 0.0  ;;  %v3691_v14 = vsel %vm486_vm1, %v9714_v45, 0.0 }
 0x499   : > { %3734 = vadd.xlane.f32.xlu1 %v3733_v19  ;;  %v9954_v19 = vpop.permute.xlu1 %3409  ;;  %v9958_v37 = vpop.permute.xlu0 %3391 }
 0x49c   : > { %3722 = vadd.xlane.f32.xlu0 %v3721_v54  ;;  %v3700_v54 = vsel %vm486_vm1, %v9664_v31, 0.0  ;;  %v3706_v31 = vsel %vm486_vm1, %v9693_v18, 0.0  ;;  %v3766_v18 = vsel %vm486_vm1, %v9716_v5, 0.0  ;;  %v3781_v5 = vsel %vm486_vm1, %v9734_v60, 0.0 }
 0x49d   : > { %3695 = vadd.xlane.f32.xlu1 %v3694_v61  ;;  %v11374_v61 = vld [vmem:[#allocation55_spill] sm:$0xff]  ;;  %v9966_v23 = vpop.permute.xlu0 %3395 }
 0x4a0   : > { %3725 = vadd.xlane.f32.xlu0 %v3724_v10  ;;  %v3703_v10 = vsel %vm486_vm1, %v11374_v61, 0.0 }
 0x4a1   : > { %3698 = vadd.xlane.f32.xlu1 %v3697_v42  ;;  %v9964_v42 = vpop.permute.xlu1 %3411 }
 0x4a4   : > { %3728 = vadd.xlane.f32.xlu0 %v3727_v58 }
 0x4a5   : > { %3701 = vadd.xlane.f32.xlu1 %v3700_v54  ;;  %v9974_v58 = vpop.permute.xlu1 %3413  ;;  %v3709_v54 = vsel %vm486_vm1, %v9705_v22, 0.0  ;;  %v3769_v22 = vsel %vm486_vm1, %v9726_v44, 0.0  ;;  %v3739_v44 = vsel %vm486_vm1, %v9740_v6, 0.0 }
 0x4a8   : > { %3731 = vadd.xlane.f32.xlu0 %v3730_v56  ;;  %v9978_v56 = vpop.permute.xlu0 %3397 }
 0x4a9   : > { %3704 = vadd.xlane.f32.xlu1 %v3703_v10  ;;  %v9984_v61 = vpop.permute.xlu1 %3415  ;;  %v3763_v10 = vsel %vm486_vm1, %v9732_v21, 0.0  ;;  %v3775_v21 = vsel %vm486_vm1, %v9750_v9, 0.0  ;;  %v3745_v9 = vsel %vm486_vm1, %v9748_v36, 0.0 }
 0x4ac   : > { %3737 = vadd.xlane.f32.xlu0 %v3736_v48  ;;  %v9986_v45 = vpop.permute.xlu0 %3399 }
 0x4ad   : > { %3707 = vadd.xlane.f32.xlu1 %v3706_v31  ;;  %v9994_v48 = vpop.permute.xlu1 %3389 }
 0x4b0   : > { %3692 = vadd.xlane.f32.xlu0 %v3691_v14  ;;  %v9998_v31 = vpop.permute.xlu0 %3401  ;;  %v11375_v14 = vlaneseq }
 0x4b1   : > { %3710 = vadd.xlane.f32.xlu1 %v3709_v54 }
 0x4b2   : > { %v10003_v54 = vand.u32 127, %v11375_v14 }
 0x4b4   : > { %3713 = vadd.xlane.f32.xlu0 %v3712_v25  ;;  %v10007_v25 = vpop.permute.xlu1 %3393 }
 0x4b5   : > { %3767 = vadd.xlane.f32.xlu1 %v3766_v18  ;;  %v11376_v18 = vld [vmem:[#allocation32_spill] sm:$0xff] }
 0x4b6   : > { %v10011_v60 = vsub.s32 %v10003_v54, %v11376_v18  ;;  %vm10244_vm12 = vcmp.eq.s32.totalorder %v11376_v18, %v10003_v54 }
 0x4b8   : > { %3764 = vadd.xlane.f32.xlu0 %v3763_v10  ;;  %v3778_v10 = vsel %vm486_vm1, %v9754_v52, 0.0  ;;  %v3751_v52 = vsel %vm486_vm1, %v9752_v12, 0.0  ;;  %v3754_v12 = vsel %vm486_vm1, %v9756_v34, 0.0  ;;  %v3757_v34 = vsel %vm486_vm1, %v9760_v47, 0.0 }
 0x4b9   : > { %3770 = vadd.xlane.f32.xlu1 %v3769_v22 }
 0x4bc   : > { %3773 = vadd.xlane.f32.xlu0 %v3772_v24 }
 0x4bd   : > { %3782 = vadd.xlane.f32.xlu1 %v3781_v5 }
 0x4c0   : > { %3776 = vadd.xlane.f32.xlu0 %v3775_v21  ;;  %v3784_v21 = vsel %vm486_vm1, %v9758_v16, 0.0  ;;  %v3742_v16 = vsel %vm486_vm1, %v9762_v30, 0.0  ;;  %v3748_v30 = vsel %vm486_vm1, %v9766_v59, 0.0  ;;  %v3760_v59 = vsel %vm486_vm1, %v9774_v15, 0.0 }
 0x4c1   : > { %3740 = vadd.xlane.f32.xlu1 %v3739_v44  ;;  %v3576_v20 = vpop.xlane.xlu0 %3575  ;;  %v3817_v15 = vsel %vm486_vm1, %v9768_v17, 0.0 }
 0x4c2   : > { %v4151_v6 = vrot.slane %v3576_v20, %v10011_v60 }
 0x4c4   : > { %3779 = vadd.xlane.f32.xlu0 %v3778_v10 }
 0x4c5   : > { %3746 = vadd.xlane.f32.xlu1 %v3745_v9  ;;  %v3579_v22 = vpop.xlane.xlu0 %3578 }
 0x4c6   : > { %v3573_v24 = vpop.xlane.xlu1 %3572  ;;  %v4155_v14 = vrot.slane %v3579_v22, %v10011_v60 }
 0x4c7   : > { %v4147_v5 = vrot.slane %v3573_v24, %v10011_v60 }
 0x4c8   : > { %3785 = vadd.xlane.f32.xlu0 %v3784_v21 }
 0x4c9   : > { %v4638_v36 = vsel %vm4624_vm4, %v4151_v6, %v4147_v5  ;;  %3752 = vadd.xlane.f32.xlu1 %v3751_v52  ;;  %v3585_v44 = vpop.xlane.xlu0 %3584 }
 0x4ca   : > { %v3582_v10 = vpop.xlane.xlu1 %3581  ;;  %v4639_v20 = vsel %vm4626_vm5, %v4155_v14, %v4638_v36  ;;  %v4163_v22 = vrot.slane %v3585_v44, %v10011_v60 }
 0x4cb   : > { %v4159_v9 = vrot.slane %v3582_v10, %v10011_v60 }
 0x4cc   : > { %3743 = vadd.xlane.f32.xlu0 %v3742_v16  ;;  %v3814_v16 = vsel %vm486_vm1, %v9764_v40, 0.0 }
 0x4cd   : > { %v4640_v24 = vsel %vm4628_vm6, %v4159_v9, %v4639_v20  ;;  %3755 = vadd.xlane.f32.xlu1 %v3754_v12  ;;  %v3591_v6 = vpop.xlane.xlu0 %3590 }
 0x4ce   : > { %v3588_v5 = vpop.xlane.xlu1 %3587  ;;  %v4641_v21 = vsel %vm4630_vm7, %v4163_v22, %v4640_v24  ;;  %v4171_v52 = vrot.slane %v3591_v6, %v10011_v60 }
 0x4cf   : > { %v4167_v14 = vrot.slane %v3588_v5, %v10011_v60  ;;  %v3811_v5 = vsel %vm486_vm1, %v9784_v39, 0.0  ;;  %v3829_v39 = vsel %vm486_vm1, %v9778_v55, 0.0 }
 0x4d0   : > { %3749 = vadd.xlane.f32.xlu0 %v3748_v30 }
 0x4d1   : > { %v4642_v36 = vsel %vm4632_vm8, %v4167_v14, %v4641_v21  ;;  %3758 = vadd.xlane.f32.xlu1 %v3757_v34  ;;  %v3594_v44 = vpop.xlane.xlu0 %3593  ;;  %v3820_v34 = vsel %vm486_vm1, %v9794_v50, 0.0  ;;  %v3787_v50 = vsel %vm486_vm1, %v9786_v3, 0.0 }
 0x4d2   : > { %v4175_v10 = vrot.slane %v3594_v44, %v10011_v60  ;;  %v3549_v20 = vpop.xlane.xlu1 %3548  ;;  %v4643_v9 = vsel %vm4634_vm9, %v4171_v52, %v4642_v36 }
 0x4d3   : > { %v4115_v12 = vrot.slane %v3549_v20, %v10011_v60 }
 0x4d4   : > { %3761 = vadd.xlane.f32.xlu0 %v3760_v59  ;;  %v10048_v22 = vsel %vm4636_vm10, %v4175_v10, %v4643_v9  ;;  %v3823_v9 = vsel %vm486_vm1, %v9804_v8, 0.0  ;;  %v3793_v8 = vsel %vm486_vm1, %v9798_v4, 0.0 }
 0x4d5   : > { %3815 = vadd.xlane.f32.xlu1 %v3814_v16  ;;  %v3552_v47 = vpop.xlane.xlu0 %3551 }
 0x4d6   : > { %v4119_v24 = vrot.slane %v3552_v47, %v10011_v60  ;;  %v3558_v6 = vpop.xlane.xlu1 %3557 }
 0x4d7   : > { %v4127_v52 = vrot.slane %v3558_v6, %v10011_v60 }
 0x4d8   : > { %v4625_v21 = vsel %vm4624_vm4, %v4119_v24, %v4115_v12  ;;  %3812 = vadd.xlane.f32.xlu0 %v3811_v5  ;;  %v3826_v12 = vsel %vm486_vm1, %v9814_v57, 0.0  ;;  %v3799_v57 = vsel %vm486_vm1, %v9806_v38, 0.0  ;;  %v3802_v38 = vsel %vm486_vm1, %v9818_v11, 0.0 }
 0x4d9   : > { %3818 = vadd.xlane.f32.xlu1 %v3817_v15  ;;  %v3555_v40 = vpop.xlane.xlu0 %3554  ;;  %v3832_v15 = vsel %vm486_vm1, %v9824_v26, 0.0 }
 0x4da   : > { %v4123_v14 = vrot.slane %v3555_v40, %v10011_v60  ;;  %v3570_v30 = vpop.xlane.xlu1 %3569 }
 0x4db   : > { %v4143_v3 = vrot.slane %v3570_v30, %v10011_v60  ;;  %v3790_v30 = vsel %vm486_vm1, %v9834_v28, 0.0 }
 0x4dc   : > { %v4627_v36 = vsel %vm4626_vm5, %v4123_v14, %v4625_v21  ;;  %3821 = vadd.xlane.f32.xlu0 %v3820_v34 }
 0x4dd   : > { %3830 = vadd.xlane.f32.xlu1 %v3829_v39  ;;  %v4629_v44 = vsel %vm4628_vm6, %v4127_v52, %v4627_v36  ;;  %v3561_v17 = vpop.xlane.xlu0 %3560 }
 0x4de   : > { %v4131_v10 = vrot.slane %v3561_v17, %v10011_v60  ;;  %v3624_v20 = vpop.xlane.xlu1 %3623 }
 0x4df   : > { %v4215_v52 = vrot.slane %v3624_v20, %v10011_v60  ;;  %v3796_v20 = vsel %vm486_vm1, %v9844_v0, 0.0 }
 0x4e0   : > { %v4631_v59 = vsel %vm4630_vm7, %v4131_v10, %v4629_v44  ;;  %3824 = vadd.xlane.f32.xlu0 %v3823_v9 }
 0x4e1   : > { %3788 = vadd.xlane.f32.xlu1 %v3787_v50  ;;  %v3564_v16 = vpop.xlane.xlu0 %3563 }
 0x4e2   : > { %v4135_v55 = vrot.slane %v3564_v16, %v10011_v60  ;;  %v3630_v47 = vpop.xlane.xlu1 %3629 }
 0x4e3   : > { %v4223_v10 = vrot.slane %v3630_v47, %v10011_v60 }
 0x4e4   : > { %v4633_v24 = vsel %vm4632_vm8, %v4135_v55, %v4631_v59  ;;  %3827 = vadd.xlane.f32.xlu0 %v3826_v12  ;;  %v3805_v59 = vsel %vm486_vm1, %v9826_v32, 0.0  ;;  %v3862_v32 = vsel %vm486_vm1, %v9838_v2, 0.0 }
 0x4e5   : > { %3794 = vadd.xlane.f32.xlu1 %v3793_v8  ;;  %v3567_v6 = vpop.xlane.xlu0 %3566 }
 0x4e6   : > { %v4139_v5 = vrot.slane %v3567_v6, %v10011_v60  ;;  %v3633_v21 = vpop.xlane.xlu1 %3632 }
 0x4e7   : > { %v4227_v9 = vrot.slane %v3633_v21, %v10011_v60 }
 0x4e8   : > { %3833 = vadd.xlane.f32.xlu0 %v3832_v15  ;;  %v4635_v40 = vsel %vm4634_vm9, %v4139_v5, %v4633_v24  ;;  %v3808_v24 = vsel %vm486_vm1, %v9854_v62, 0.0  ;;  %v3859_v15 = vsel %vm486_vm1, %v9864_v27, 0.0  ;;  %v3865_v62 = vsel %vm486_vm1, %v9846_v46, 0.0 }
 0x4e9   : > { %3800 = vadd.xlane.f32.xlu1 %v3799_v57  ;;  %v3621_v14 = vpop.xlane.xlu0 %3620  ;;  %v10085_v4 = vsel %vm4636_vm10, %v4143_v3, %v4635_v40  ;;  %v3868_v40 = vsel %vm486_vm1, %v9874_v51, 0.0  ;;  %v3871_v46 = vsel %vm486_vm1, %v9884_v33, 0.0 }
 0x4ea   : > { %v4211_v34 = vrot.slane %v3621_v14, %v10011_v60  ;;  %v3636_v36 = vpop.xlane.xlu1 %3635  ;;  %v3877_v14 = vsel %vm486_vm1, %v9858_v53, 0.0  ;;  %v3874_v53 = vsel %vm486_vm1, %v9894_v29, 0.0 }
 0x4eb   : > { %v4231_v11 = vrot.slane %v3636_v36, %v10011_v60 }
 0x4ec   : > { %v4652_v26 = vsel %vm4624_vm4, %v4215_v52, %v4211_v34  ;;  %3791 = vadd.xlane.f32.xlu0 %v3790_v30  ;;  %v3835_v34 = vsel %vm486_vm1, %v9866_v7, 0.0  ;;  %v3841_v30 = vsel %vm486_vm1, %v9878_v41, 0.0  ;;  %v3880_v7 = vsel %vm486_vm1, %v9904_v13, 0.0 }
 0x4ed   : > { %3803 = vadd.xlane.f32.xlu1 %v3802_v38  ;;  %v3627_v39 = vpop.xlane.xlu0 %3626  ;;  %v11377_v38 = vld [vmem:[#allocation33_spill] sm:$0xff]  ;;  %v3838_v41 = vsel %vm486_vm1, %v9914_v63, 0.0  ;;  %v3856_v63 = vsel %vm486_vm1, %v9934_v43, 0.0  ;;  %v3916_v43 = vsel %vm486_vm1, %v9954_v19, 0.0 }
 0x4ee   : > { %v4219_v44 = vrot.slane %v3627_v39, %v10011_v60  ;;  %v3639_v17 = vpop.xlane.xlu1 %3638  ;;  %v3847_v39 = vsel %vm486_vm1, %v11377_v38, 0.0 }
 0x4ef   : > { %v4235_v55 = vrot.slane %v3639_v17, %v10011_v60  ;;  %v11378_v17 = vld [vmem:[#allocation34_spill] sm:$0xff] }
 0x4f0   : > { %v4653_v28 = vsel %vm4626_vm5, %v4219_v44, %v4652_v26  ;;  %3797 = vadd.xlane.f32.xlu0 %v3796_v20 }
 0x4f1   : > { %v4654_v50 = vsel %vm4628_vm6, %v4223_v10, %v4653_v28  ;;  %3806 = vadd.xlane.f32.xlu1 %v3805_v59  ;;  %v3642_v16 = vpop.xlane.xlu0 %3641  ;;  %v3850_v10 = vsel %vm486_vm1, %v11378_v17, 0.0  ;;  %v11379_v28 = vld [vmem:[#allocation35_spill] sm:$0xff] }
 0x4f2   : > { %v4239_v47 = vrot.slane %v3642_v16, %v10011_v60  ;;  %v10106_v12 = vpop.xlane.xlu1 %3599  ;;  %v4655_v0 = vsel %vm4630_vm7, %v4227_v9, %v4654_v50  ;;  %v3844_v9 = vsel %vm486_vm1, %v9924_v35, 0.0  ;;  %v3853_v59 = vsel %vm486_vm1, %v11379_v28, 0.0  ;;  %v11380_v16 = vld [vmem:[#allocation37_spill] sm:$0xff] }
 0x4f3   : > { %v4656_v8 = vsel %vm4632_vm8, %v4231_v11, %v4655_v0  ;;  %v3907_v35 = vsel %vm486_vm1, %v9944_v49, 0.0 }
 0x4f4   : > { %3809 = vadd.xlane.f32.xlu0 %v3808_v24  ;;  %v4657_v6 = vsel %vm4634_vm9, %v4235_v55, %v4656_v8  ;;  %v3910_v55 = vsel %vm486_vm1, %v11380_v16, 0.0  ;;  %v11381_v24 = vld [vmem:[#allocation36_spill] sm:$0xff]  ;;  %v3931_v16 = vld [vmem:[%s10211_s27] sm:$0xff] }
 0x4f5   : > { %3863 = vadd.xlane.f32.xlu1 %v3862_v32  ;;  %v10115_v5 = vpop.xlane.xlu0 %3596  ;;  %v10118_v21 = vsel %vm4636_vm10, %v4239_v47, %v4657_v6  ;;  %v3913_v8 = vsel %vm486_vm1, %v11381_v24, 0.0  ;;  %vm3951_vm14 = vcmp.ne.f32.partialorder %v3931_v16, 0.0 }
 0x4f6   : > { %v10120_v3 = vpop.xlane.xlu1 %3602  ;;  %v4179_v19 = vrot.slane %v10115_v5, %v10011_v60  ;;  %vm3968_vm2 = vmor %vm3951_vm14, %vm10244_vm12 }
 0x4f7   : > { %v4187_v5 = vrot.slane %v10120_v3, %v10011_v60  ;;  %v3886_v3 = vsel %vm486_vm1, %v9994_v48, 0.0 }
 0x4f8   : > { %3860 = vadd.xlane.f32.xlu0 %v3859_v15  ;;  %v3883_v15 = vsel %vm486_vm1, %v9946_v1, 0.0 }
 0x4f9   : > { %3866 = vadd.xlane.f32.xlu1 %v3865_v62  ;;  %v10126_v57 = vpop.xlane.xlu0 %3608 }
 0x4fa   : > { %v10128_v2 = vpop.xlane.xlu1 %3605  ;;  %v4195_v28 = vrot.slane %v10126_v57, %v10011_v60 }
 0x4fb   : > { %v4191_v38 = vrot.slane %v10128_v2, %v10011_v60  ;;  %v3892_v2 = vsel %vm486_vm1, %v10007_v25, 0.0 }
 0x4fc   : > { %3869 = vadd.xlane.f32.xlu0 %v3868_v40  ;;  %v3919_v40 = vsel %vm486_vm1, %v9964_v42, 0.0  ;;  %v3895_v42 = vsel %vm486_vm1, %v9966_v23, 0.0 }
 0x4fd   : > { %3878 = vadd.xlane.f32.xlu1 %v3877_v14  ;;  %v10134_v52 = vpop.xlane.xlu0 %3617  ;;  %v3889_v14 = vsel %vm486_vm1, %v9958_v37, 0.0  ;;  %v4183_v37 = vrot.slane %v10106_v12, %v10011_v60  ;;  %v3932_v12 = vld [vmem:[%s10211_s27 + $0x8] sm:$0xff] }
 0x4fe   : > { %v10136_v27 = vpop.xlane.xlu1 %3611  ;;  %vm3952_vm11 = vcmp.ne.f32.partialorder %v3932_v12, 0.0 }
 0x4ff   : > { %v4199_v25 = vrot.slane %v10136_v27, %v10011_v60  ;;  %v3933_v27 = vld [vmem:[%s10211_s27 + $0x10] sm:$0xff]  ;;  %vm3969_vm13 = vmor %vm3952_vm11, %vm10244_vm12 }
 0x500   : > { %3872 = vadd.xlane.f32.xlu0 %v3871_v46  ;;  %vm3953_vm15 = vcmp.ne.f32.partialorder %v3933_v27, 0.0 }
 0x501   : > { %3836 = vadd.xlane.f32.xlu1 %v3835_v34  ;;  %v10142_v36 = vpop.xlane.xlu0 %3668  ;;  %vm10317_vm3 = vmor %vm3953_vm15, %vm10244_vm12 }
 0x502   : > { %v10144_v51 = vpop.xlane.xlu1 %3614 }
 0x504   : > { %3875 = vadd.xlane.f32.xlu0 %v3874_v53  ;;  %v3922_v53 = vsel %vm486_vm1, %v9974_v58, 0.0 }
 0x505   : > { %3842 = vadd.xlane.f32.xlu1 %v3841_v30  ;;  %v10150_v26 = vpop.xlane.xlu0 %3680 }
 0x506   : > { %v10152_v33 = vpop.xlane.xlu1 %3671 }
 0x508   : > { %3881 = vadd.xlane.f32.xlu0 %v3880_v7  ;;  %v4645_v7 = vsel %vm4624_vm4, %v4183_v37, %v4179_v19 }
 0x509   : > { %3848 = vadd.xlane.f32.xlu1 %v3847_v39  ;;  %v10158_v44 = vpop.xlane.xlu0 %3686 }
 0x50a   : > { %v10160_v29 = vpop.xlane.xlu1 %3674 }
 0x50b   : > { %v4283_v54 = vrot.slane %v10160_v29, %v10011_v60 }
 0x50c   : > { %3839 = vadd.xlane.f32.xlu0 %v3838_v41 }
 0x50d   : > { %3851 = vadd.xlane.f32.xlu1 %v3850_v10  ;;  %v10166_v20 = vpop.xlane.xlu0 %3689  ;;  %v3898_v10 = vsel %vm486_vm1, %v9978_v56, 0.0 }
 0x50e   : > { %v10168_v13 = vpop.xlane.xlu1 %3677 }
 0x510   : > { %3845 = vadd.xlane.f32.xlu0 %v3844_v9  ;;  %v4646_v9 = vsel %vm4626_vm5, %v4187_v5, %v4645_v7  ;;  %v11384_v5 = vld [vmem:[#allocation38_spill] sm:$0xff] }
 0x511   : > { %3854 = vadd.xlane.f32.xlu1 %v3853_v59  ;;  %v3645_v11 = vpop.xlane.xlu0 %3644  ;;  %v4647_v56 = vsel %vm4628_vm6, %v4191_v38, %v4646_v9 }
 0x512   : > { %v10174_v50 = vpop.xlane.xlu1 %3683  ;;  %v4243_v30 = vrot.slane %v3645_v11, %v10011_v60  ;;  %v4279_v11 = vrot.slane %v10152_v33, %v10011_v60  ;;  %v4275_v33 = vrot.slane %v10142_v36, %v10011_v60  ;;  %v4648_v29 = vsel %vm4630_vm7, %v4195_v28, %v4647_v56 }
 0x513   : > { %v3925_v36 = vsel %vm486_vm1, %v9984_v61, 0.0  ;;  %v10289_v61 = vsel %vm3969_vm13, %v10048_v22, -1e+30  ;;  %v4295_v19 = vrot.slane %v10174_v50, %v10011_v60  ;;  %v4291_v22 = vrot.slane %v10150_v26, %v10011_v60 }
 0x514   : > { %3857 = vadd.xlane.f32.xlu0 %v3856_v63 }
 0x515   : > { %3911 = vadd.xlane.f32.xlu1 %v3910_v55  ;;  %v3651_v47 = vpop.xlane.xlu0 %3650  ;;  %v4203_v55 = vrot.slane %v10144_v51, %v10011_v60  ;;  %v3901_v51 = vsel %vm486_vm1, %v9986_v45, 0.0  ;;  %v4666_v45 = vsel %vm4624_vm4, %v4279_v11, %v4275_v33 }
 0x516   : > { %v3648_v0 = vpop.xlane.xlu1 %3647  ;;  %v4251_v17 = vrot.slane %v3651_v47, %v10011_v60 }
 0x517   : > { %v4247_v1 = vrot.slane %v3648_v0, %v10011_v60  ;;  %v4287_v0 = vrot.slane %v10168_v13, %v10011_v60  ;;  %v3904_v13 = vsel %vm486_vm1, %v9998_v31, 0.0 }
 0x518   : > { %3908 = vadd.xlane.f32.xlu0 %v3907_v35 }
 0x519   : > { %3914 = vadd.xlane.f32.xlu1 %v3913_v8  ;;  %v10184_v32 = vpop.xlane.xlu0 %3656  ;;  %v4659_v41 = vsel %vm4624_vm4, %v4247_v1, %v4243_v30  ;;  %v4649_v8 = vsel %vm4632_vm8, %v4199_v25, %v4648_v29 }
 0x51a   : > { %v3654_v6 = vpop.xlane.xlu1 %3653  ;;  %v4660_v57 = vsel %vm4626_vm5, %v4251_v17, %v4659_v41  ;;  %v4259_v35 = vrot.slane %v10184_v32, %v10011_v60  ;;  %v4650_v31 = vsel %vm4634_vm9, %v4203_v55, %v4649_v8  ;;  %v3936_v17 = vld [vmem:[%s10211_s27 + $0x28] sm:$0xff] }
 0x51b   : > { %v4255_v23 = vrot.slane %v3654_v6, %v10011_v60 }
 0x51c   : > { %3917 = vadd.xlane.f32.xlu0 %v3916_v43  ;;  %v4667_v43 = vsel %vm4626_vm5, %v4283_v54, %v4666_v45 }
 0x51d   : > { %3884 = vadd.xlane.f32.xlu1 %v3883_v15  ;;  %v10190_v62 = vpop.xlane.xlu0 %3662  ;;  %v4661_v18 = vsel %vm4628_vm6, %v4255_v23, %v4660_v57  ;;  %v4303_v57 = vrot.slane %v10166_v20, %v10011_v60 }
 0x51e   : > { %v10192_v49 = vpop.xlane.xlu1 %3659  ;;  %v4662_v32 = vsel %vm4630_vm7, %v4259_v35, %v4661_v18  ;;  %v4267_v1 = vrot.slane %v10190_v62, %v10011_v60  ;;  %v3938_v18 = vld [vmem:[%s10211_s27 + $0x38] sm:$0xff] }
 0x51f   : > { %v4263_v47 = vrot.slane %v10192_v49, %v10011_v60  ;;  %v3935_v49 = vld [vmem:[%s10211_s27 + $0x20] sm:$0xff] }
 0x520   : > { %3920 = vadd.xlane.f32.xlu0 %v3919_v40  ;;  %v4207_v40 = vrot.slane %v10134_v52, %v10011_v60  ;;  %v3928_v52 = vsel %vm486_vm1, %v11384_v5, 0.0  ;;  %vm3955_vm11 = vcmp.ne.f32.partialorder %v3935_v49, 0.0 }
 0x521   : > { %3890 = vadd.xlane.f32.xlu1 %v3889_v14  ;;  %v10198_v46 = vpop.xlane.xlu0 %3665  ;;  %v4663_v15 = vsel %vm4632_vm8, %v4263_v47, %v4662_v32  ;;  %v4668_v14 = vsel %vm4628_vm6, %v4287_v0, %v4667_v43  ;;  %vm3972_vm14 = vmor %vm3955_vm11, %vm10244_vm12  ;;  %vm3958_vm11 = vcmp.ne.f32.partialorder %v3938_v18, 0.0 }
 0x522   : > { %v10202_v34 = vpop.xlane.xlu1 %3719  ;;  %v4271_v37 = vrot.slane %v10198_v46, %v10011_v60  ;;  %v4651_v46 = vsel %vm4636_vm10, %v4207_v40, %v4650_v31  ;;  %v4664_v30 = vsel %vm4634_vm9, %v4267_v1, %v4663_v15  ;;  %v4669_v7 = vsel %vm4630_vm7, %v4291_v22, %v4668_v14  ;;  %v3937_v15 = vld [vmem:[%s10211_s27 + $0x30] sm:$0xff] }
 0x523   : > { %v4670_v12 = vsel %vm4632_vm8, %v4295_v19, %v4669_v7  ;;  %v4343_v41 = vrot.slane %v10202_v34, %v10011_v60  ;;  %v10341_v28 = vsel %vm10317_vm3, %v4651_v46, -1e+30 }
 0x524   : > { %3923 = vadd.xlane.f32.xlu0 %v3922_v53  ;;  %v3934_v53 = vld [vmem:[%s10211_s27 + $0x18] sm:$0xff]  ;;  %v4781_v55 = vsel %vm267_vm0, %v10341_v28, -inf }
 0x525   : > { %3896 = vadd.xlane.f32.xlu1 %v3895_v42  ;;  %v10220_v58 = vpop.xlane.xlu0 %3716  ;;  %vm3954_vm13 = vcmp.ne.f32.partialorder %v3934_v53, 0.0 }
 0x526   : > { %v10225_v39 = vpop.xlane.xlu1 %3734  ;;  %v4339_v50 = vrot.slane %v10220_v58, %v10011_v60  ;;  %v4778_v58 = vsel %vm267_vm0, %v10289_v61, -inf  ;;  %vm3971_vm15 = vmor %vm3954_vm13, %vm10244_vm12 }
 0x527   : > { %v10366_v33 = vsel %vm3971_vm15, %v10118_v21, -1e+30  ;;  %v4363_v29 = vrot.slane %v10225_v39, %v10011_v60  ;;  %vm3975_vm13 = vmor %vm3958_vm11, %vm10244_vm12 }
 0x528   : > { %3887 = vadd.xlane.f32.xlu0 %v3886_v3  ;;  %v10333_v3 = vsel %vm3968_vm2, %v10085_v4, -1e+30  ;;  %v4665_v4 = vsel %vm4636_vm10, %v4271_v37, %v4664_v30  ;;  %v4680_v34 = vsel %vm4624_vm4, %v4343_v41, %v4339_v50  ;;  %vm3956_vm2 = vcmp.ne.f32.partialorder %v3936_v17, 0.0 }
 0x529   : > { %3899 = vadd.xlane.f32.xlu1 %v3898_v10  ;;  %v10240_v59 = vpop.xlane.xlu0 %3722  ;;  %v4299_v10 = vrot.slane %v10158_v44, %v10011_v60  ;;  %v4775_v25 = vsel %vm267_vm0, %v10333_v3, -inf  ;;  %v10361_v54 = vsel %vm3972_vm14, %v4665_v4, -1e+30  ;;  %vm3973_vm3 = vmor %vm3956_vm2, %vm10244_vm12  ;;  %v4784_v21 = vsel %vm267_vm0, %v10366_v33, -inf }
 0x52a   : > { %v10254_v63 = vpop.xlane.xlu1 %3695  ;;  %v4347_v38 = vrot.slane %v10240_v59, %v10011_v60  ;;  %vm3957_vm14 = vcmp.ne.f32.partialorder %v3937_v15, 0.0 }
 0x52b   : > { %v4671_v11 = vsel %vm4634_vm9, %v4299_v10, %v4670_v12  ;;  %v4311_v45 = vrot.slane %v10254_v63, %v10011_v60  ;;  %vm3974_vm15 = vmor %vm3957_vm14, %vm10244_vm12 }
 0x52c   : > { %3893 = vadd.xlane.f32.xlu0 %v3892_v2  ;;  %v4681_v56 = vsel %vm4626_vm5, %v4347_v38, %v4680_v34 }
 0x52d   : > { %3902 = vadd.xlane.f32.xlu1 %v3901_v51  ;;  %v3726_v24 = vpop.xlane.xlu0 %3725  ;;  %v4672_v51 = vsel %vm4636_vm10, %v4303_v57, %v4671_v11 }
 0x52e   : > { %v10284_v6 = vpop.xlane.xlu1 %3698  ;;  %v4351_v23 = vrot.slane %v3726_v24, %v10011_v60  ;;  %v4787_v24 = vsel %vm267_vm0, %v10361_v54, -inf }
 0x52f   : > { %v4315_v31 = vrot.slane %v10284_v6, %v10011_v60 }
 0x530   : > { %3926 = vadd.xlane.f32.xlu0 %v3925_v36  ;;  %v4682_v16 = vsel %vm4628_vm6, %v4351_v23, %v4681_v56 }
 0x531   : > { %3905 = vadd.xlane.f32.xlu1 %v3904_v13  ;;  %v3729_v42 = vpop.xlane.xlu0 %3728  ;;  %v10380_v13 = vsel %vm3973_vm3, %v4672_v51, -1e+30 }
 0x532   : > { %v10312_v62 = vpop.xlane.xlu1 %3701  ;;  %v4355_v2 = vrot.slane %v3729_v42, %v10011_v60  ;;  %v4790_v63 = vsel %vm267_vm0, %v10380_v13, -inf }
 0x533   : > { %v4319_v49 = vrot.slane %v10312_v62, %v10011_v60 }
 0x534   : > { %4779 = vmax.xlane.f32.xlu0 %v4778_v58  ;;  %v4683_v47 = vsel %vm4630_vm7, %v4355_v2, %v4682_v16 }
 0x535   : > { %3929 = vadd.xlane.f32.xlu1 %v3928_v52  ;;  %v3732_v9 = vpop.xlane.xlu0 %3731 }
 0x536   : > { %v4359_v59 = vrot.slane %v3732_v9, %v10011_v60  ;;  %v3705_v44 = vpop.xlane.xlu1 %3704 }
 0x537   : > { %v4323_v14 = vrot.slane %v3705_v44, %v10011_v60  ;;  %v3940_v44 = vld [vmem:[%s10211_s27 + $0x48] sm:$0xff] }
 0x538   : > { %4776 = vmax.xlane.f32.xlu0 %v4775_v25  ;;  %v4684_v0 = vsel %vm4632_vm8, %v4359_v59, %v4683_v47  ;;  %vm3960_vm2 = vcmp.ne.f32.partialorder %v3940_v44, 0.0 }
 0x539   : > { %4782 = vmax.xlane.f32.xlu1 %v4781_v55  ;;  %v3738_v27 = vpop.xlane.xlu0 %3737  ;;  %v4685_v8 = vsel %vm4634_vm9, %v4363_v29, %v4684_v0  ;;  %vm3977_vm3 = vmor %vm3960_vm2, %vm10244_vm12 }
 0x53a   : > { %v4367_v20 = vrot.slane %v3738_v27, %v10011_v60  ;;  %v3708_v35 = vpop.xlane.xlu1 %3707 }
 0x53b   : > { %v4327_v22 = vrot.slane %v3708_v35, %v10011_v60 }
 0x53c   : > { %4788 = vmax.xlane.f32.xlu0 %v4787_v24  ;;  %v4686_v43 = vsel %vm4636_vm10, %v4367_v20, %v4685_v8 }
 0x53d   : > { %4785 = vmax.xlane.f32.xlu1 %v4784_v21  ;;  %v3693_v36 = vpop.xlane.xlu0 %3692  ;;  %v10399_v53 = vsel %vm3975_vm13, %v4686_v43, -1e+30 }
 0x53e   : > { %v4307_v32 = vrot.slane %v3693_v36, %v10011_v60  ;;  %v3711_v39 = vpop.xlane.xlu1 %3710  ;;  %v4796_v50 = vsel %vm267_vm0, %v10399_v53, -inf }
 0x53f   : > { %v4331_v42 = vrot.slane %v3711_v39, %v10011_v60  ;;  %v3939_v39 = vld [vmem:[%s10211_s27 + $0x40] sm:$0xff] }
 0x540   : > { %v4673_v40 = vsel %vm4624_vm4, %v4311_v45, %v4307_v32  ;;  %vm3959_vm11 = vcmp.ne.f32.partialorder %v3939_v39, 0.0 }
 0x541   : > { %v4674_v19 = vsel %vm4626_vm5, %v4315_v31, %v4673_v40  ;;  %4791 = vmax.xlane.f32.xlu1 %v4790_v63  ;;  %v3714_v1 = vpop.xlane.xlu0 %3713  ;;  %vm3976_vm13 = vmor %vm3959_vm11, %vm10244_vm12 }
 0x542   : > { %v4675_v6 = vsel %vm4628_vm6, %v4319_v49, %v4674_v19  ;;  %v3768_v37 = vpop.xlane.xlu1 %3767  ;;  %v4335_v52 = vrot.slane %v3714_v1, %v10011_v60 }
 0x543   : > { %v4676_v5 = vsel %vm4630_vm7, %v4323_v14, %v4675_v6  ;;  %v4407_v17 = vrot.slane %v3768_v37, %v10011_v60 }
 0x544   : > { %v4677_v62 = vsel %vm4632_vm8, %v4327_v22, %v4676_v5 }
 0x545   : > { %4797 = vmax.xlane.f32.xlu1 %v4796_v50  ;;  %v3765_v26 = vpop.xlane.xlu0 %3764  ;;  %v4678_v46 = vsel %vm4634_vm9, %v4331_v42, %v4677_v62 }
 0x546   : > { %v3771_v30 = vpop.xlane.xlu1 %3770  ;;  %v4679_v7 = vsel %vm4636_vm10, %v4335_v52, %v4678_v46  ;;  %v4403_v41 = vrot.slane %v3765_v26, %v10011_v60 }
 0x547   : > { %v10413_v38 = vsel %vm3974_vm15, %v4679_v7, -1e+30  ;;  %v4411_v10 = vrot.slane %v3771_v30, %v10011_v60 }
 0x548   : > { %v4793_v58 = vsel %vm267_vm0, %v10413_v38, -inf  ;;  %v4694_v9 = vsel %vm4624_vm4, %v4407_v17, %v4403_v41 }
 0x549   : > { %4794 = vmax.xlane.f32.xlu0 %v4793_v58  ;;  %v3774_v12 = vpop.xlane.xlu0 %3773  ;;  %v4695_v56 = vsel %vm4626_vm5, %v4411_v10, %v4694_v9 }
 0x54a   : > { %v3783_v23 = vpop.xlane.xlu1 %3782  ;;  %v4415_v4 = vrot.slane %v3774_v12, %v10011_v60 }
 0x54b   : > { %v4427_v47 = vrot.slane %v3783_v23, %v10011_v60 }
 0x54c   : > { %v4696_v11 = vsel %vm4628_vm6, %v4415_v4, %v4695_v56 }
 0x54d   : > { %v3777_v2 = vpop.xlane.xlu0 %3776 }
 0x54e   : > { %v3741_v34 = vpop.xlane.xlu1 %3740  ;;  %v4419_v59 = vrot.slane %v3777_v2, %v10011_v60 }
 0x54f   : > { %v4371_v21 = vrot.slane %v3741_v34, %v10011_v60  ;;  %v3942_v34 = vld [vmem:[%s10211_s27 + $0x58] sm:$0xff] }
 0x550   : > { %v4697_v55 = vsel %vm4630_vm7, %v4419_v59, %v4696_v11  ;;  %vm3962_vm14 = vcmp.ne.f32.partialorder %v3942_v34, 0.0  ;;  %v3944_v34 = vld [vmem:[%s10211_s27 + $0x68] sm:$0xff] }
 0x551   : > { %v3780_v25 = vpop.xlane.xlu0 %3779  ;;  %vm3979_vm15 = vmor %vm3962_vm14, %vm10244_vm12  ;;  %vm3964_vm11 = vcmp.ne.f32.partialorder %v3944_v34, 0.0 }
 0x552   : > { %v4423_v57 = vrot.slane %v3780_v25, %v10011_v60  ;;  %v3747_v16 = vpop.xlane.xlu1 %3746 }
 0x553   : > { %v4379_v43 = vrot.slane %v3747_v16, %v10011_v60 }
 0x554   : > { %v4698_v18 = vsel %vm4632_vm8, %v4423_v57, %v4697_v55 }
 0x555   : > { %v3786_v27 = vpop.xlane.xlu0 %3785  ;;  %v4699_v35 = vsel %vm4634_vm9, %v4427_v47, %v4698_v18 }
 0x556   : > { %v4431_v0 = vrot.slane %v3786_v27, %v10011_v60  ;;  %v3753_v20 = vpop.xlane.xlu1 %3752 }
 0x557   : > { %v4387_v40 = vrot.slane %v3753_v20, %v10011_v60 }
 0x558   : > { %v4700_v51 = vsel %vm4636_vm10, %v4431_v0, %v4699_v35 }
 0x559   : > { %v3744_v29 = vpop.xlane.xlu0 %3743  ;;  %v10435_v24 = vsel %vm3977_vm3, %v4700_v51, -1e+30 }
 0x55a   : > { %v4375_v36 = vrot.slane %v3744_v29, %v10011_v60  ;;  %v3756_v8 = vpop.xlane.xlu1 %3755  ;;  %v4802_v45 = vsel %vm267_vm0, %v10435_v24, -inf }
 0x55b   : > { %4803 = vmax.xlane.f32.xlu1 %v4802_v45  ;;  %v4391_v14 = vrot.slane %v3756_v8, %v10011_v60 }
 0x55c   : > { %v4687_v32 = vsel %vm4624_vm4, %v4375_v36, %v4371_v21 }
 0x55d   : > { %v3750_v15 = vpop.xlane.xlu0 %3749  ;;  %v4688_v63 = vsel %vm4626_vm5, %v4379_v43, %v4687_v32  ;;  %v3941_v32 = vld [vmem:[%s10211_s27 + $0x50] sm:$0xff] }
 0x55e   : > { %v4383_v31 = vrot.slane %v3750_v15, %v10011_v60  ;;  %v3759_v49 = vpop.xlane.xlu1 %3758  ;;  %vm3961_vm2 = vcmp.ne.f32.partialorder %v3941_v32, 0.0 }
 0x55f   : > { %v4395_v22 = vrot.slane %v3759_v49, %v10011_v60  ;;  %vm3978_vm3 = vmor %vm3961_vm2, %vm10244_vm12 }
 0x560   : > { %v4689_v19 = vsel %vm4628_vm6, %v4383_v31, %v4688_v63 }
 0x561   : > { %v4690_v1 = vsel %vm4630_vm7, %v4387_v40, %v4689_v19  ;;  %v3762_v6 = vpop.xlane.xlu0 %3761 }
 0x562   : > { %v4399_v37 = vrot.slane %v3762_v6, %v10011_v60  ;;  %v3816_v42 = vpop.xlane.xlu1 %3815  ;;  %v4691_v5 = vsel %vm4632_vm8, %v4391_v14, %v4690_v1 }
 0x563   : > { %v4692_v52 = vsel %vm4634_vm9, %v4395_v22, %v4691_v5  ;;  %v4471_v41 = vrot.slane %v3816_v42, %v10011_v60 }
 0x564   : > { %v4693_v50 = vsel %vm4636_vm10, %v4399_v37, %v4692_v52 }
 0x565   : > { %v3813_v62 = vpop.xlane.xlu0 %3812  ;;  %v10457_v26 = vsel %vm3976_vm13, %v4693_v50, -1e+30  ;;  %vm3981_vm13 = vmor %vm3964_vm11, %vm10244_vm12 }
 0x566   : > { %v3819_v46 = vpop.xlane.xlu1 %3818  ;;  %v4799_v30 = vsel %vm267_vm0, %v10457_v26, -inf  ;;  %v4467_v58 = vrot.slane %v3813_v62, %v10011_v60 }
 0x567   : > { %4800 = vmax.xlane.f32.xlu0 %v4799_v30  ;;  %v4475_v23 = vrot.slane %v3819_v46, %v10011_v60 }
 0x568   : > { %v4708_v10 = vsel %vm4624_vm4, %v4471_v41, %v4467_v58 }
 0x569   : > { %v3822_v7 = vpop.xlane.xlu0 %3821  ;;  %v4709_v59 = vsel %vm4626_vm5, %v4475_v23, %v4708_v10 }
 0x56a   : > { %v3831_v12 = vpop.xlane.xlu1 %3830  ;;  %v4479_v2 = vrot.slane %v3822_v7, %v10011_v60 }
 0x56b   : > { %v4491_v55 = vrot.slane %v3831_v12, %v10011_v60 }
 0x56c   : > { %v4710_v56 = vsel %vm4628_vm6, %v4479_v2, %v4709_v59 }
 0x56d   : > { %v3825_v17 = vpop.xlane.xlu0 %3824 }
 0x56e   : > { %v3789_v9 = vpop.xlane.xlu1 %3788  ;;  %v4483_v4 = vrot.slane %v3825_v17, %v10011_v60 }
 0x56f   : > { %v4435_v29 = vrot.slane %v3789_v9, %v10011_v60 }
 0x570   : > { %v4711_v57 = vsel %vm4630_vm7, %v4483_v4, %v4710_v56 }
 0x571   : > { %v3828_v44 = vpop.xlane.xlu0 %3827 }
 0x572   : > { %v4487_v25 = vrot.slane %v3828_v44, %v10011_v60  ;;  %v3795_v11 = vpop.xlane.xlu1 %3794 }
 0x573   : > { %v4443_v39 = vrot.slane %v3795_v11, %v10011_v60 }
 0x574   : > { %v4712_v16 = vsel %vm4632_vm8, %v4487_v25, %v4711_v57 }
 0x575   : > { %v3834_v18 = vpop.xlane.xlu0 %3833  ;;  %v4713_v0 = vsel %vm4634_vm9, %v4491_v55, %v4712_v16 }
 0x576   : > { %v4495_v47 = vrot.slane %v3834_v18, %v10011_v60  ;;  %v3801_v27 = vpop.xlane.xlu1 %3800 }
 0x577   : > { %v4451_v49 = vrot.slane %v3801_v27, %v10011_v60 }
 0x578   : > { %v4714_v20 = vsel %vm4636_vm10, %v4495_v47, %v4713_v0 }
 0x579   : > { %v3792_v35 = vpop.xlane.xlu0 %3791  ;;  %v10479_v51 = vsel %vm3979_vm15, %v4714_v20, -1e+30 }
 0x57a   : > { %v4439_v21 = vrot.slane %v3792_v35, %v10011_v60  ;;  %v3804_v36 = vpop.xlane.xlu1 %3803  ;;  %v4808_v8 = vsel %vm267_vm0, %v10479_v51, -inf }
 0x57b   : > { %4809 = vmax.xlane.f32.xlu1 %v4808_v8  ;;  %v4455_v63 = vrot.slane %v3804_v36, %v10011_v60 }
 0x57c   : > { %v4701_v45 = vsel %vm4624_vm4, %v4439_v21, %v4435_v29 }
 0x57d   : > { %v3798_v43 = vpop.xlane.xlu0 %3797  ;;  %v4702_v40 = vsel %vm4626_vm5, %v4443_v39, %v4701_v45  ;;  %v3943_v39 = vld [vmem:[%s10211_s27 + $0x60] sm:$0xff] }
 0x57e   : > { %v4447_v15 = vrot.slane %v3798_v43, %v10011_v60  ;;  %v3807_v31 = vpop.xlane.xlu1 %3806  ;;  %vm3963_vm14 = vcmp.ne.f32.partialorder %v3943_v39, 0.0  ;;  %v3946_v39 = vld [vmem:[%s10211_s27 + $0x78] sm:$0xff] }
 0x57f   : > { %v4459_v1 = vrot.slane %v3807_v31, %v10011_v60  ;;  %vm3980_vm15 = vmor %vm3963_vm14, %vm10244_vm12 }
 0x580   : > { %v4703_v14 = vsel %vm4628_vm6, %v4447_v15, %v4702_v40 }
 0x581   : > { %v4704_v19 = vsel %vm4630_vm7, %v4451_v49, %v4703_v14  ;;  %v3810_v22 = vpop.xlane.xlu0 %3809 }
 0x582   : > { %v4463_v6 = vrot.slane %v3810_v22, %v10011_v60  ;;  %v3864_v37 = vpop.xlane.xlu1 %3863  ;;  %v4705_v42 = vsel %vm4632_vm8, %v4455_v63, %v4704_v19 }
 0x583   : > { %v4706_v5 = vsel %vm4634_vm9, %v4459_v1, %v4705_v42  ;;  %v4535_v41 = vrot.slane %v3864_v37, %v10011_v60 }
 0x584   : > { %v4707_v52 = vsel %vm4636_vm10, %v4463_v6, %v4706_v5 }
 0x585   : > { %v3861_v50 = vpop.xlane.xlu0 %3860  ;;  %v10501_v62 = vsel %vm3978_vm3, %v4707_v52, -1e+30  ;;  %vm3966_vm3 = vcmp.ne.f32.partialorder %v3946_v39, 0.0 }
 0x586   : > { %v3867_v46 = vpop.xlane.xlu1 %3866  ;;  %v4805_v30 = vsel %vm267_vm0, %v10501_v62, -inf  ;;  %v4531_v58 = vrot.slane %v3861_v50, %v10011_v60 }
 0x587   : > { %4806 = vmax.xlane.f32.xlu0 %v4805_v30  ;;  %v4539_v23 = vrot.slane %v3867_v46, %v10011_v60 }
 0x588   : > { %v4722_v10 = vsel %vm4624_vm4, %v4535_v41, %v4531_v58 }
 0x589   : > { %v3870_v7 = vpop.xlane.xlu0 %3869  ;;  %v4723_v59 = vsel %vm4626_vm5, %v4539_v23, %v4722_v10 }
 0x58a   : > { %v3879_v12 = vpop.xlane.xlu1 %3878  ;;  %v4543_v2 = vrot.slane %v3870_v7, %v10011_v60 }
 0x58b   : > { %v4555_v55 = vrot.slane %v3879_v12, %v10011_v60 }
 0x58c   : > { %v4724_v56 = vsel %vm4628_vm6, %v4543_v2, %v4723_v59 }
 0x58d   : > { %v3873_v17 = vpop.xlane.xlu0 %3872 }
 0x58e   : > { %v3837_v9 = vpop.xlane.xlu1 %3836  ;;  %v4547_v4 = vrot.slane %v3873_v17, %v10011_v60 }
 0x58f   : > { %v4499_v21 = vrot.slane %v3837_v9, %v10011_v60 }
 0x590   : > { %v4725_v57 = vsel %vm4630_vm7, %v4547_v4, %v4724_v56 }
 0x591   : > { %v3876_v44 = vpop.xlane.xlu0 %3875 }
 0x592   : > { %v4551_v25 = vrot.slane %v3876_v44, %v10011_v60  ;;  %v3843_v11 = vpop.xlane.xlu1 %3842 }
 0x593   : > { %v4507_v43 = vrot.slane %v3843_v11, %v10011_v60 }
 0x594   : > { %v4726_v16 = vsel %vm4632_vm8, %v4551_v25, %v4725_v57  ;;  %v3945_v57 = vld [vmem:[%s10211_s27 + $0x70] sm:$0xff] }
 0x595   : > { %v3882_v18 = vpop.xlane.xlu0 %3881  ;;  %v4727_v0 = vsel %vm4634_vm9, %v4555_v55, %v4726_v16  ;;  %vm3965_vm2 = vcmp.ne.f32.partialorder %v3945_v57, 0.0 }
 0x596   : > { %v4559_v47 = vrot.slane %v3882_v18, %v10011_v60  ;;  %v3849_v27 = vpop.xlane.xlu1 %3848 }
 0x597   : > { %v4515_v40 = vrot.slane %v3849_v27, %v10011_v60 }
 0x598   : > { %v4728_v20 = vsel %vm4636_vm10, %v4559_v47, %v4727_v0 }
 0x599   : > { %v3840_v35 = vpop.xlane.xlu0 %3839  ;;  %v10523_v29 = vsel %vm3981_vm13, %v4728_v20, -1e+30 }
 0x59a   : > { %v4503_v36 = vrot.slane %v3840_v35, %v10011_v60  ;;  %v3852_v8 = vpop.xlane.xlu1 %3851  ;;  %v4814_v45 = vsel %vm267_vm0, %v10523_v29, -inf }
 0x59b   : > { %4815 = vmax.xlane.f32.xlu1 %v4814_v45  ;;  %v4519_v14 = vrot.slane %v3852_v8, %v10011_v60 }
 0x59c   : > { %v4715_v32 = vsel %vm4624_vm4, %v4503_v36, %v4499_v21 }
 0x59d   : > { %v3846_v15 = vpop.xlane.xlu0 %3845  ;;  %v4716_v63 = vsel %vm4626_vm5, %v4507_v43, %v4715_v32 }
 0x59e   : > { %v4511_v31 = vrot.slane %v3846_v15, %v10011_v60  ;;  %v3855_v49 = vpop.xlane.xlu1 %3854 }
 0x59f   : > { %v4523_v22 = vrot.slane %v3855_v49, %v10011_v60 }
 0x5a0   : > { %v4717_v19 = vsel %vm4628_vm6, %v4511_v31, %v4716_v63 }
 0x5a1   : > { %v4718_v1 = vsel %vm4630_vm7, %v4515_v40, %v4717_v19  ;;  %v3858_v6 = vpop.xlane.xlu0 %3857 }
 0x5a2   : > { %v4527_v37 = vrot.slane %v3858_v6, %v10011_v60  ;;  %v3912_v42 = vpop.xlane.xlu1 %3911  ;;  %v4719_v5 = vsel %vm4632_vm8, %v4519_v14, %v4718_v1 }
 0x5a3   : > { %v4720_v52 = vsel %vm4634_vm9, %v4523_v22, %v4719_v5  ;;  %v4599_v18 = vrot.slane %v3912_v42, %v10011_v60 }
 0x5a4   : > { %v4721_v50 = vsel %vm4636_vm10, %v4527_v37, %v4720_v52 }
 0x5a5   : > { %v3909_v46 = vpop.xlane.xlu0 %3908  ;;  %v10545_v30 = vsel %vm3980_vm15, %v4721_v50, -1e+30 }
 0x5a6   : > { %v3915_v7 = vpop.xlane.xlu1 %3914  ;;  %v4811_v58 = vsel %vm267_vm0, %v10545_v30, -inf  ;;  %v4595_v56 = vrot.slane %v3909_v46, %v10011_v60 }
 0x5a7   : > { %4812 = vmax.xlane.f32.xlu0 %v4811_v58  ;;  %v4603_v0 = vrot.slane %v3915_v7, %v10011_v60 }
 0x5a8   : > { %v4736_v21 = vsel %vm4624_vm4, %v4599_v18, %v4595_v56 }
 0x5a9   : > { %v3918_v12 = vpop.xlane.xlu0 %3917  ;;  %v4737_v14 = vsel %vm4626_vm5, %v4603_v0, %v4736_v21 }
 0x5aa   : > { %v3885_v41 = vpop.xlane.xlu1 %3884  ;;  %v4607_v36 = vrot.slane %v3918_v12, %v10011_v60 }
 0x5ab   : > { %v4563_v4 = vrot.slane %v3885_v41, %v10011_v60 }
 0x5ac   : > { %v4738_v1 = vsel %vm4628_vm6, %v4607_v36, %v4737_v14 }
 0x5ad   : > { %v3921_v23 = vpop.xlane.xlu0 %3920 }
 0x5ae   : > { %v3891_v17 = vpop.xlane.xlu1 %3890  ;;  %v4611_v43 = vrot.slane %v3921_v23, %v10011_v60 }
 0x5af   : > { %v4571_v25 = vrot.slane %v3891_v17, %v10011_v60 }
 0x5b0   : > { %v4739_v37 = vsel %vm4630_vm7, %v4611_v43, %v4738_v1 }
 0x5b1   : > { %v3924_v10 = vpop.xlane.xlu0 %3923 }
 0x5b2   : > { %v3897_v2 = vpop.xlane.xlu1 %3896  ;;  %v4615_v49 = vrot.slane %v3924_v10, %v10011_v60 }
 0x5b3   : > { %v4579_v47 = vrot.slane %v3897_v2, %v10011_v60 }
 0x5b4   : > { %v4740_v50 = vsel %vm4632_vm8, %v4615_v49, %v4739_v37 }
 0x5b5   : > { %v3888_v9 = vpop.xlane.xlu0 %3887 }
 0x5b6   : > { %v4567_v34 = vrot.slane %v3888_v9, %v10011_v60  ;;  %v3900_v59 = vpop.xlane.xlu1 %3899 }
 0x5b7   : > { %v4583_v20 = vrot.slane %v3900_v59, %v10011_v60 }
 0x5b8   : > { %v4729_v44 = vsel %vm4624_vm4, %v4567_v34, %v4563_v4  ;;  %vm3982_vm4 = vmor %vm3965_vm2, %vm10244_vm12 }
 0x5b9   : > { %v3894_v11 = vpop.xlane.xlu0 %3893  ;;  %v4730_v27 = vsel %vm4626_vm5, %v4571_v25, %v4729_v44  ;;  %vm3983_vm5 = vmor %vm3966_vm3, %vm10244_vm12 }
 0x5ba   : > { %v4575_v16 = vrot.slane %v3894_v11, %v10011_v60  ;;  %v3903_v55 = vpop.xlane.xlu1 %3902 }
 0x5bb   : > { %v4587_v45 = vrot.slane %v3903_v55, %v10011_v60 }
 0x5bc   : > { %v4731_v35 = vsel %vm4628_vm6, %v4575_v16, %v4730_v27  ;;  %vm8423_vm6 = vmmov 0  }
 0x5bd   : > { %v4732_v8 = vsel %vm4630_vm7, %v4579_v47, %v4731_v35  ;;  %v3927_v32 = vpop.xlane.xlu0 %3926 }
 0x5be   : > { %v4733_v15 = vsel %vm4632_vm8, %v4583_v20, %v4732_v8  ;;  %v3906_v31 = vpop.xlane.xlu1 %3905  ;;  %v4619_v19 = vrot.slane %v3927_v32, %v10011_v60 }
 0x5bf   : > { %v4734_v40 = vsel %vm4634_vm9, %v4587_v45, %v4733_v15  ;;  %v4591_v63 = vrot.slane %v3906_v31, %v10011_v60 }
 0x5c0   : > { %v4741_v58 = vsel %vm4634_vm9, %v4619_v19, %v4740_v50  ;;  %v11387_v19 = vmov 0.0  }
 0x5c1   : > { %v4780_v22 = vpop.xlane.xlu0 %4779  ;;  %v4735_v6 = vsel %vm4636_vm10, %v4591_v63, %v4734_v40  ;;  %8017 = vmatprep.mubr.msk.f32.mxu1 %vm8423_vm6, %v11387_v19  ;;  %8012 = vmatprep.mubr.msk.f32.mxu0 %vm8423_vm6, %v11387_v19 }
 0x5c2   : > { %v4824_v42 = vsub.f32 %v10289_v61, %v4780_v22  ;;  %v3930_v5 = vpop.xlane.xlu1 %3929  ;;  %v10580_v52 = vsel %vm3982_vm4, %v4735_v6, -1e+30 }
 0x5c3   : > { %v4623_v46 = vrot.slane %v3930_v5, %v10011_v60  ;;  %v4817_v7 = vsel %vm267_vm0, %v10580_v52, -inf }
 0x5c4   : > { %v4841_v12 = vmul.f32 1.442695, %v4824_v42  ;;  %4818 = vmax.xlane.f32.xlu0 %v4817_v7 }
 0x5c5   : > { %v4777_v41 = vpop.xlane.xlu0 %4776  ;;  %v4742_v61 = vsel %vm4636_vm10, %v4623_v46, %v4741_v58 }
 0x5c6   : > { %8347 = vpow2.f32 %v4841_v12  ;;  %v4823_v23 = vsub.f32 %v10333_v3, %v4777_v41  ;;  %v4783_v17 = vpop.xlane.xlu1 %4782  ;;  %v10591_v10 = vsel %vm3983_vm5, %v4742_v61, -1e+30 }
 0x5c7   : > { %v4825_v60 = vsub.f32 %v10341_v28, %v4783_v17  ;;  %v4820_v2 = vsel %vm267_vm0, %v10591_v10, -inf }
 0x5c8   : > { %v4839_v48 = vmul.f32 1.442695, %v4823_v23  ;;  %4821 = vmax.xlane.f32.xlu1 %v4820_v2 }
 0x5c9   : > { %v4843_v9 = vmul.f32 1.442695, %v4825_v60  ;;  %v4789_v4 = vpop.xlane.xlu0 %4788 }
 0x5ca   : > { %8349 = vpow2.f32 %v4839_v48  ;;  %v4827_v34 = vsub.f32 %v10361_v54, %v4789_v4  ;;  %v4786_v59 = vpop.xlane.xlu1 %4785 }
 0x5cb   : > { %8351 = vpow2.f32 %v4843_v9  ;;  %v4826_v44 = vsub.f32 %v10366_v33, %v4786_v59 }
 0x5cc   : > { %v4847_v3 = vmul.f32 1.442695, %v4827_v34 }
 0x5cd   : > { %v4845_v56 = vmul.f32 1.442695, %v4826_v44 }
 0x5ce   : > { %8353 = vpow2.f32 %v4847_v3  ;;  %v4792_v25 = vpop.xlane.xlu1 %4791 }
 0x5cf   : > { %8355 = vpow2.f32 %v4845_v56  ;;  %v4828_v28 = vsub.f32 %v10380_v13, %v4792_v25 }
 0x5d0   : > { %v10599_v11 = vpop.eup %8347 }
 0x5d1   : > { %v4849_v57 = vmul.f32 1.442695, %v4828_v28  ;;  %v4874_v16 = vsel %vm267_vm0, %v10599_v11, 0.0 }
 0x5d2   : > { %v4798_v55 = vpop.xlane.xlu1 %4797  ;;  %4875 = vadd.xlane.f32.xlu0 %v4874_v16 }
 0x5d3   : > { %8357 = vpow2.f32 %v4849_v57  ;;  %v4830_v54 = vsub.f32 %v10399_v53, %v4798_v55 }
 0x5d4   : > { %v10604_v18 = vpop.eup %8349 }
 0x5d5   : > { %v10606_v33 = vpop.eup %8351  ;;  %v4853_v47 = vmul.f32 1.442695, %v4830_v54  ;;  %v4871_v27 = vsel %vm267_vm0, %v10604_v18, 0.0 }
 0x5d6   : > { %4872 = vadd.xlane.f32.xlu0 %v4871_v27  ;;  %v4795_v13 = vpop.xlane.xlu0 %4794  ;;  %v4877_v0 = vsel %vm267_vm0, %v10606_v33, 0.0 }
 0x5d7   : > { %8359 = vpow2.f32 %v4853_v47  ;;  %v4829_v20 = vsub.f32 %v10413_v38, %v4795_v13  ;;  %4878 = vadd.xlane.f32.xlu1 %v4877_v0 }
 0x5d8   : > { %v10613_v35 = vpop.eup %8353 }
 0x5d9   : > { %v10615_v53 = vpop.eup %8355  ;;  %v4851_v21 = vmul.f32 1.442695, %v4829_v20  ;;  %v4883_v36 = vsel %vm267_vm0, %v10613_v35, 0.0 }
 0x5da   : > { %4884 = vadd.xlane.f32.xlu0 %v4883_v36  ;;  %v4880_v8 = vsel %vm267_vm0, %v10615_v53, 0.0 }
 0x5db   : > { %8361 = vpow2.f32 %v4851_v21  ;;  %4881 = vadd.xlane.f32.xlu1 %v4880_v8  ;;  %v11388_v21 = vld [vmem:[#allocation19_spill] sm:$0xff] }
 0x5dd   : > { %v10621_v45 = vpop.eup %8357 }
 0x5de   : > { %v4886_v38 = vsel %vm267_vm0, %v10621_v45, 0.0 }
 0x5df   : > { %4887 = vadd.xlane.f32.xlu1 %v4886_v38 }
 0x5e1   : > { %v10625_v32 = vpop.eup %8359 }
 0x5e2   : > { %v4892_v39 = vsel %vm267_vm0, %v10625_v32, 0.0 }
 0x5e3   : > { %4893 = vadd.xlane.f32.xlu1 %v4892_v39 }
 0x5e5   : > { %v10629_v43 = vpop.eup %8361 }
 0x5e6   : > { %v4889_v15 = vsel %vm267_vm0, %v10629_v43, 0.0 }
 0x5e7   : > { %4890 = vadd.xlane.f32.xlu0 %v4889_v15 }
 0x5e8   : > { %v4804_v31 = vpop.xlane.xlu1 %4803 }
 0x5e9   : > { %v4832_v49 = vsub.f32 %v10435_v24, %v4804_v31  ;;  %v11390_v31 = vld [vmem:[#allocation18_spill] sm:$0xff] }
 0x5eb   : > { %v4857_v40 = vmul.f32 1.442695, %v4832_v49 }
 0x5ed   : > { %8363 = vpow2.f32 %v4857_v40  ;;  %v11391_v40 = vld [vmem:[#allocation20_spill] sm:$0xff] }
 0x5f4   : > { %v4801_v63 = vpop.xlane.xlu0 %4800 }
 0x5f5   : > { %v4831_v14 = vsub.f32 %v10457_v26, %v4801_v63 }
 0x5f7   : > { %v10639_v1 = vpop.eup %8363  ;;  %v4855_v22 = vmul.f32 1.442695, %v4831_v14 }
 0x5f8   : > { %v4898_v6 = vsel %vm267_vm0, %v10639_v1, 0.0 }
 0x5f9   : > { %8365 = vpow2.f32 %v4855_v22  ;;  %4899 = vadd.xlane.f32.xlu1 %v4898_v6  ;;  %v11392_v22 = vld [vmem:[#allocation21_spill] sm:$0xff] }
 0x603   : > { %v10643_v24 = vpop.eup %8365 }
 0x604   : > { %v4895_v26 = vsel %vm267_vm0, %v10643_v24, 0.0 }
 0x605   : > { %4896 = vadd.xlane.f32.xlu0 %v4895_v26 }
 0x608   : > { %v4810_v37 = vpop.xlane.xlu1 %4809 }
 0x609   : > { %v4834_v42 = vsub.f32 %v10479_v51, %v4810_v37  ;;  %v11393_v37 = vld [vmem:[#allocation23_spill] sm:$0xff] }
 0x60b   : > { %v4861_v5 = vmul.f32 1.442695, %v4834_v42  ;;  %v11394_v42 = vld [vmem:[#allocation24_spill] sm:$0xff] }
 0x60d   : > { %8367 = vpow2.f32 %v4861_v5 }
 0x614   : > { %v4807_v50 = vpop.xlane.xlu0 %4806 }
 0x615   : > { %v4833_v46 = vsub.f32 %v10501_v62, %v4807_v50 }
 0x617   : > { %v10649_v7 = vpop.eup %8367  ;;  %v4859_v58 = vmul.f32 1.442695, %v4833_v46 }
 0x618   : > { %v4904_v12 = vsel %vm267_vm0, %v10649_v7, 0.0 }
 0x619   : > { %8369 = vpow2.f32 %v4859_v58  ;;  %4905 = vadd.xlane.f32.xlu1 %v4904_v12  ;;  %v11396_v58 = vld [vmem:[#allocation26_spill] sm:$0xff] }
 0x623   : > { %v10653_v41 = vpop.eup %8369 }
 0x624   : > { %v4901_v61 = vsel %vm267_vm0, %v10653_v41, 0.0 }
 0x625   : > { %4902 = vadd.xlane.f32.xlu0 %v4901_v61 }
 0x628   : > { %v4816_v51 = vpop.xlane.xlu1 %4815 }
 0x629   : > { %v4836_v23 = vsub.f32 %v10523_v29, %v4816_v51  ;;  %v11397_v51 = vld [vmem:[#allocation27_spill] sm:$0xff] }
 0x62b   : > { %v4865_v17 = vmul.f32 1.442695, %v4836_v23 }
 0x62d   : > { %8371 = vpow2.f32 %v4865_v17 }
 0x634   : > { %v4813_v62 = vpop.xlane.xlu0 %4812 }
 0x635   : > { %v4835_v60 = vsub.f32 %v10545_v30, %v4813_v62 }
 0x637   : > { %v10659_v2 = vpop.eup %8371  ;;  %v4863_v48 = vmul.f32 1.442695, %v4835_v60  ;;  %v11398_v60 = vld [vmem:[#allocation29_spill] sm:$0xff] }
 0x638   : > { %v4910_v9 = vsel %vm267_vm0, %v10659_v2, 0.0 }
 0x639   : > { %8373 = vpow2.f32 %v4863_v48  ;;  %4911 = vadd.xlane.f32.xlu1 %v4910_v9  ;;  %v11399_v9 = vld [vmem:[#allocation28_spill] sm:$0xff] }
 0x643   : > { %v10663_v4 = vpop.eup %8373 }
 0x644   : > { %v4907_v34 = vsel %vm267_vm0, %v10663_v4, 0.0 }
 0x645   : > { %4908 = vadd.xlane.f32.xlu0 %v4907_v34  ;;  %v6378_v34 = vld [vmem:[%s11239_s3 + $0x88] sm:$0xff] }
 0x651   : > { %v4819_v29 = vpop.xlane.xlu0 %4818 }
 0x652   : > { %v4837_v59 = vsub.f32 %v10580_v52, %v4819_v29  ;;  %v6379_v29 = vld [vmem:[%s11239_s3 + $0x90] sm:$0xff] }
 0x654   : > { %v4867_v44 = vmul.f32 1.442695, %v4837_v59 }
 0x655   : > { %v4822_v3 = vpop.xlane.xlu1 %4821 }
 0x656   : > { %8375 = vpow2.f32 %v4867_v44  ;;  %v4838_v30 = vsub.f32 %v10591_v10, %v4822_v3  ;;  %v8274_v3 = vpack.c.bf16 %v6379_v29, %v6378_v34 }
 0x658   : > { %v4869_v56 = vmul.f32 1.442695, %v4838_v30  ;;  %v11400_v30 = vld [vmem:[#allocation30_spill] sm:$0xff] }
 0x65a   : > { %8377 = vpow2.f32 %v4869_v56  ;;  %v6156_v56 = vld [vmem:[%s11239_s3 + $0x48] sm:$0xff] }
 0x65f   : > { %v4876_v25 = vpop.xlane.xlu0 %4875 }
 0x660   : > { %v10669_v28 = vpop.eup %8375  ;;  %8379 = vrcp.f32 %v4876_v25  ;;  %v6157_v25 = vld [vmem:[%s11239_s3 + $0x50] sm:$0xff] }
 0x661   : > { %v4913_v57 = vsel %vm267_vm0, %v10669_v28, 0.0 }
 0x662   : > { %4914 = vadd.xlane.f32.xlu0 %v4913_v57 }
 0x663   : > { %v4873_v16 = vpop.xlane.xlu0 %4872 }
 0x664   : > { %v10673_v55 = vpop.eup %8377  ;;  %8381 = vrcp.f32 %v4873_v16  ;;  %v4879_v52 = vpop.xlane.xlu1 %4878  ;;  %v8266_v16 = vpack.c.bf16 %v6157_v25, %v6156_v56 }
 0x665   : > { %8383 = vrcp.f32 %v4879_v52  ;;  %v4916_v54 = vsel %vm267_vm0, %v10673_v55, 0.0  ;;  %v11401_v52 = vld [vmem:[#allocation31_spill] sm:$0xff] }
 0x666   : > { %4917 = vadd.xlane.f32.xlu1 %v4916_v54 }
 0x667   : > { %v4885_v10 = vpop.xlane.xlu0 %4884 }
 0x668   : > { %v4882_v47 = vpop.xlane.xlu1 %4881 }
 0x669   : > { %8385 = vrcp.f32 %v4882_v47  ;;  %v6158_v47 = vld [vmem:[%s11239_s3 + $0x58] sm:$0xff] }
 0x66a   : > { %v8380_v27 = vpop.eup %8379  ;;  %8387 = vrcp.f32 %v4885_v10 }
 0x66b   : > { %v4922_v13 = vmul.f32 %v8380_v27, %v10599_v11  ;;  %v11389_v11 = vld [vmem:[#allocation22_spill] sm:$0xff] }
 0x66c   : > { %v4888_v0 = vpop.xlane.xlu1 %4887 }
 0x66d   : > { %8018 = vmatmul.mubr.msk.f32.vlgmr.msra.gmra.mrb[10].mxu1 %vm267_vm0, %v4922_v13  ;;  %8389 = vrcp.f32 %v4888_v0 }
 0x66e   : > { %v8382_v20 = vpop.eup %8381  ;;  %8021 = vmatpush3.msra.mxu1 %v11388_v21  ;;  %8022 = vmatprep.mubr.msk.f32.mxu1 %vm8423_vm6, %v11387_v19 }
 0x66f   : > { %v8384_v36 = vpop.eup %8383  ;;  %v4920_v8 = vmul.f32 %v8382_v20, %v10604_v18  ;;  %8025 = vmatprep.subr.mxu1 %v11387_v19  ;;  %v6381_v20 = vld [vmem:[%s11239_s3 + $0xa0] sm:$0xff] }
 0x670   : > { %v4924_v38 = vmul.f32 %v8384_v36, %v10606_v33  ;;  %v4894_v39 = vpop.xlane.xlu1 %4893 }
 0x671   : > { %8391 = vrcp.f32 %v4894_v39  ;;  %8013 = vmatmul.mubr.msk.f32.vlgmr.msra.gmra.mrb[38].mxu0 %vm267_vm0, %v4920_v8  ;;  %v11404_v39 = vld [vmem:[#allocation2_spill] sm:$0xff] }
 0x672   : > { %8046 = vmatpush3.msra.mxu0 %v11389_v11  ;;  %8023 = vmatmul.mubr.msk.f32.vlgmr.msra.gmra.mrb[12].mxu1 %vm267_vm0, %v4924_v38  ;;  %v11405_v11 = vmax.f32 %v11404_v39, 0.0  ;;  %v6375_v39 = vld [vmem:[%s11239_s3 + $0x70] sm:$0xff] }
 0x673   : > { %v8386_v15 = vpop.eup %8385  ;;  %8026 = vmatpush3.msra.mxu1 %v11390_v31  ;;  %8027 = vmatprep.mubr.msk.f32.mxu1 %vm8423_vm6, %v11387_v19 }
 0x674   : > { %v4926_v18 = vmul.f32 %v8386_v15, %v10615_v53  ;;  %v4891_v49 = vpop.xlane.xlu0 %4890  ;;  %8030 = vmatprep.subr.mxu1 %v11387_v19  ;;  %8047 = vmatprep.mubr.msk.f32.mxu0 %vm8423_vm6, %v11387_v19  ;;  %v8388_v33 = vpop.eup %8387  ;;  %v11406_v15 = vld [vmem:[#allocation5_spill] sm:$0xff] }
 0x675   : > { %8393 = vrcp.f32 %v4891_v49  ;;  %8055 = vmatprep.subr.mxu0 %v11387_v19  ;;  %v4928_v63 = vmul.f32 %v8388_v33, %v10613_v35  ;;  %v11407_v31 = vmax.f32 %v11406_v15, 0.0  ;;  %v11410_v49 = vld [vmem:[#allocation7_spill] sm:$0xff] }
 0x676   : > { %8028 = vmatmul.mubr.msk.f32.vlgmr.msra.gmra.mrb[14].mxu1 %vm267_vm0, %v4926_v18  ;;  %v11411_v33 = vmax.f32 %v11410_v49, 0.0 }
 0x677   : > { %8031 = vmatpush3.msra.mxu1 %v11391_v40  ;;  %8032 = vmatprep.mubr.msk.f32.mxu1 %vm8423_vm6, %v11387_v19  ;;  %v8390_v53 = vpop.eup %8389  ;;  %v11412_v40 = vld [vmem:[#allocation6_spill] sm:$0xff] }
 0x678   : > { %8035 = vmatprep.subr.mxu1 %v11387_v19  ;;  %v4930_v6 = vmul.f32 %v8390_v53, %v10621_v45  ;;  %v11395_v45 = vld [vmem:[#allocation25_spill] sm:$0xff] }
 0x679   : > { %v11414_v53 = vld [vmem:[#allocation9_spill] sm:$0xff] }
 0x67a   : > { %8033 = vmatmul.mubr.msk.f32.vlgmr.msra.gmra.mrb[16].mxu1 %vm267_vm0, %v4928_v63  ;;  %v11413_v63 = vmax.f32 %v11412_v40, 0.0 }
 0x67b   : > { %v8392_v14 = vpop.eup %8391  ;;  %8036 = vmatpush3.msra.mxu1 %v11392_v22  ;;  %8037 = vmatprep.mubr.msk.f32.mxu1 %vm8423_vm6, %v11387_v19  ;;  %v11416_v22 = vld [vmem:[#allocation8_spill] sm:$0xff] }
 0x67c   : > { %v4934_v26 = vmul.f32 %v8392_v14, %v10625_v32  ;;  %8040 = vmatprep.subr.mxu1 %v11387_v19  ;;  %v11415_v14 = vmax.f32 %v11414_v53, 0.0 }
 0x67e   : > { %8038 = vmatmul.mubr.msk.f32.vlgmr.msra.gmra.mrb[18].mxu1 %vm267_vm0, %v4930_v6  ;;  %8048 = vmatmul.mubr.msk.f32.vlgmr.msra.gmra.mrb[40].mxu0 %vm267_vm0, %v4934_v26  ;;  %v11417_v6 = vmax.f32 %v11416_v22, 0.0  ;;  %v11418_v26 = vld [vmem:[#allocation11_spill] sm:$0xff] }
 0x67f   : > { %v8394_v35 = vpop.eup %8393  ;;  %8041 = vmatpush3.msra.mxu1 %v11393_v37  ;;  %8056 = vmatpush3.msra.mxu0 %v11394_v42  ;;  %v11420_v37 = vld [vmem:[#allocation10_spill] sm:$0xff] }
 0x680   : > { %v4932_v5 = vmul.f32 %v8394_v35, %v10629_v43  ;;  %8042 = vmatprep.mubr.msk.f32.mxu1 %vm8423_vm6, %v11387_v19  ;;  %8050 = vmatprep.subr.mxu1 %v11387_v19  ;;  %v11419_v35 = vmax.f32 %v11418_v26, 0.0  ;;  %v11421_v42 = vmax.f32 %v11420_v37, 0.0 }
 0x681   : > { %8057 = vmatprep.mubr.msk.f32.mxu0 %vm8423_vm6, %v11387_v19  ;;  %8065 = vmatprep.subr.mxu0 %v11387_v19 }
 0x682   : > { %8043 = vmatmul.mubr.msk.f32.vlgmr.msra.gmra.mrb[20].mxu1 %vm267_vm0, %v4932_v5  ;;  %v11422_v5 = vld [vmem:[#allocation13_spill] sm:$0xff] }
 0x683   : > { %8051 = vmatpush3.msra.mxu1 %v11395_v45  ;;  %8052 = vmatprep.mubr.msk.f32.mxu1 %vm8423_vm6, %v11387_v19  ;;  %v11423_v45 = vmax.f32 %v11422_v5, 0.0 }
 0x684   : > { %8060 = vmatprep.subr.mxu1 %v11387_v19 }
 0x686   : > { %v4900_v32 = vpop.xlane.xlu1 %4899 }
 0x687   : > { %8395 = vrcp.f32 %v4900_v32  ;;  %v11424_v32 = vld [vmem:[#allocation12_spill] sm:$0xff] }
 0x691   : > { %v8396_v43 = vpop.eup %8395 }
 0x692   : > { %v4938_v50 = vmul.f32 %v8396_v43, %v10639_v1  ;;  %v4897_v46 = vpop.xlane.xlu0 %4896  ;;  %v11425_v43 = vmax.f32 %v11424_v32, 0.0 }
 0x693   : > { %8397 = vrcp.f32 %v4897_v46 }
 0x694   : > { %8058 = vmatmul.mubr.msk.f32.vlgmr.msra.gmra.mrb[42].mxu0 %vm267_vm0, %v4938_v50  ;;  %v11426_v50 = vld [vmem:[#allocation15_spill] sm:$0xff] }
 0x695   : > { %8066 = vmatpush3.msra.mxu0 %v11396_v58  ;;  %8067 = vmatprep.mubr.msk.f32.mxu0 %vm8423_vm6, %v11387_v19  ;;  %v11427_v46 = vmax.f32 %v11426_v50, 0.0  ;;  %v11428_v58 = vld [vmem:[#allocation14_spill] sm:$0xff] }
 0x696   : > { %8075 = vmatprep.subr.mxu0 %v11387_v19 }
 0x69d   : > { %v8398_v12 = vpop.eup %8397 }
 0x69e   : > { %v4936_v61 = vmul.f32 %v8398_v12, %v10643_v24  ;;  %v11429_v12 = vmax.f32 %v11428_v58, 0.0 }
 0x6a0   : > { %8053 = vmatmul.mubr.msk.f32.vlgmr.msra.gmra.mrb[22].mxu1 %vm267_vm0, %v4936_v61  ;;  %v11430_v61 = vld [vmem:[#allocation17_spill] sm:$0xff] }
 0x6a1   : > { %8061 = vmatpush3.msra.mxu1 %v11397_v51  ;;  %8062 = vmatprep.mubr.msk.f32.mxu1 %vm8423_vm6, %v11387_v19  ;;  %v11431_v51 = vmax.f32 %v11430_v61, 0.0 }
 0x6a2   : > { %8070 = vmatprep.subr.mxu1 %v11387_v19 }
 0x6a6   : > { %v4906_v1 = vpop.xlane.xlu1 %4905 }
 0x6a7   : > { %8399 = vrcp.f32 %v4906_v1  ;;  %v11432_v1 = vld [vmem:[#allocation16_spill] sm:$0xff] }
 0x6b1   : > { %v8400_v23 = vpop.eup %8399 }
 0x6b2   : > { %v4942_v17 = vmul.f32 %v8400_v23, %v10649_v7  ;;  %v4903_v62 = vpop.xlane.xlu0 %4902  ;;  %v11433_v23 = vmax.f32 %v11432_v1, 0.0 }
 0x6b3   : > { %8401 = vrcp.f32 %v4903_v62  ;;  %v10838_v62 = vld [vmem:[%s11239_s3 + $0xeb] ss:$0 sm:$0xff] }
 0x6b4   : > { %8068 = vmatmul.mubr.msk.f32.vlgmr.msra.gmra.mrb[44].mxu0 %vm267_vm0, %v4942_v17 }
 0x6b5   : > { %8076 = vmatpush3.msra.mxu0 %v11398_v60  ;;  %8077 = vmatprep.mubr.msk.f32.mxu0 %vm8423_vm6, %v11387_v19 }
 0x6b6   : > { %8085 = vmatprep.subr.mxu0 %v11387_v19 }
 0x6bd   : > { %v8402_v24 = vpop.eup %8401 }
 0x6be   : > { %v4940_v48 = vmul.f32 %v8402_v24, %v10653_v41 }
 0x6c0   : > { %8063 = vmatmul.mubr.msk.f32.vlgmr.msra.gmra.mrb[24].mxu1 %vm267_vm0, %v4940_v48 }
 0x6c1   : > { %8071 = vmatpush3.msra.mxu1 %v11399_v9  ;;  %8072 = vmatprep.mubr.msk.f32.mxu1 %vm8423_vm6, %v11387_v19 }
 0x6c2   : > { %8080 = vmatprep.subr.mxu1 %v11387_v19 }
 0x6c6   : > { %v4912_v7 = vpop.xlane.xlu1 %4911 }
 0x6c7   : > { %8403 = vrcp.f32 %v4912_v7 }
 0x6d1   : > { %v8404_v41 = vpop.eup %8403 }
 0x6d2   : > { %v4946_v59 = vmul.f32 %v8404_v41, %v10659_v2  ;;  %v4909_v44 = vpop.xlane.xlu0 %4908 }
 0x6d3   : > { %8405 = vrcp.f32 %v4909_v44 }
 0x6d4   : > { %8078 = vmatmul.mubr.msk.f32.vlgmr.msra.gmra.mrb[46].mxu0 %vm267_vm0, %v4946_v59 }
 0x6d5   : > { %8086 = vmatpush3.msra.mxu0 %v11400_v30  ;;  %8087 = vmatprep.mubr.msk.f32.mxu0 %vm8423_vm6, %v11387_v19 }
 0x6d6   : > { %8275 = vmatprep.subr.bf16.mxu0 %v8274_v3 }
 0x6dd   : > { %v8406_v2 = vpop.eup %8405 }
 0x6de   : > { %v4944_v57 = vmul.f32 %v8406_v2, %v10663_v4  ;;  %v6159_v4 = vld [vmem:[%s11239_s3 + $0x60] sm:$0xff] }
 0x6df   : > { %v8270_v0 = vpack.c.bf16 %v6159_v4, %v6158_v47 }
 0x6e0   : > { %8073 = vmatmul.mubr.msk.f32.vlgmr.msra.gmra.mrb[26].mxu1 %vm267_vm0, %v4944_v57 }
 0x6e1   : > { %8081 = vmatpush3.msra.mxu1 %v11401_v52  ;;  %8082 = vmatprep.mubr.msk.f32.mxu1 %vm8423_vm6, %v11387_v19  ;;  %v6380_v19 = vld [vmem:[%s11239_s3 + $0x98] sm:$0xff] }
 0x6e2   : > { %8267 = vmatprep.subr.bf16.mxu1 %v8266_v16  ;;  %v8278_v8 = vpack.c.bf16 %v6381_v20, %v6380_v19 }
 0x6ef   : > { %v4915_v54 = vpop.xlane.xlu0 %4914 }
 0x6f0   : > { %8407 = vrcp.f32 %v4915_v54 }
 0x6f3   : > { %v4918_v10 = vpop.xlane.xlu1 %4917 }
 0x6f4   : > { %8409 = vrcp.f32 %v4918_v10 }
 0x6fa   : > { %v8408_v27 = vpop.eup %8407 }
 0x6fb   : > { %v4948_v13 = vmul.f32 %v8408_v27, %v10669_v28  ;;  %v11402_v28 = vld [vmem:[#allocation3_spill] sm:$0xff] }
 0x6fc   : > { %v11403_v38 = vmax.f32 %v11402_v28, 0.0 }
 0x6fd   : > { %8083 = vmatmul.mubr.msk.f32.vlgmr.msra.gmra.mrb[28].mxu1 %vm267_vm0, %v4948_v13 }
 0x6fe   : > { %v8410_v21 = vpop.eup %8409  ;;  %8269 = vmatpush3.bf16.msra.mxu1 %v8266_v16 }
 0x6ff   : > { %v4950_v36 = vmul.f32 %v8410_v21, %v10673_v55  ;;  %8271 = vmatprep.subr.bf16.mxu1 %v8270_v0  ;;  %v11408_v55 = vld [vmem:[#allocation4_spill] sm:$0xff] }
 0x700   : > { %v11409_v18 = vmax.f32 %v11408_v55, 0.0 }
 0x701   : > { %8088 = vmatmul.mubr.msk.f32.vlgmr.msra.gmra.mrb[48].mxu0 %vm267_vm0, %v4950_v36  ;;  %vm7273_vm0 = vcmask 31744  }
 0x702   : > { %8277 = vmatpush3.bf16.msra.mxu0 %v8274_v3  ;;  %8130 = vmatprep.mubr.msk.f32.mxu0 %vm486_vm1, %v11403_v38  ;;  %v6374_v38 = vld [vmem:[%s11239_s3 + $0x68] sm:$0xff] }
 0x703   : > { %8279 = vmatprep.subr.bf16.mxu0 %v8278_v8  ;;  %8273 = vmatpush3.bf16.msra.mxu1 %v8270_v0  ;;  %v8282_v15 = vpack.c.bf16 %v6375_v39, %v6374_v38  ;;  %v6758_v38 = vld [vmem:[%s11239_s3 + $0xb0] sm:$0xff]  ;;  %v6759_v39 = vld [vmem:[%s11239_s3 + $0xb8] sm:$0xff] }
 0x706   : > { %8281 = vmatpush3.bf16.msra.mxu0 %v8278_v8 }
 0x707   : > { %8283 = vmatprep.subr.bf16.mxu0 %v8282_v15 }
 0x709   : > { %8131 = vmatmul.mubr.msk.f32.vlgmr.msra.gmra.mrb[50].mxu0 %vm486_vm1, %v11405_v11  ;;  %v6376_v11 = vld [vmem:[%s11239_s3 + $0x78] sm:$0xff] }
 0x70a   : > { %8133 = vmatprep.mubr.msk.f32.mxu0 %vm486_vm1, %v11407_v31  ;;  %v6377_v31 = vld [vmem:[%s11239_s3 + $0x80] sm:$0xff]  ;;  %8285 = vmatpush3.bf16.msra.mxu0 %v8282_v15 }
 0x70b   : > { %v8286_v55 = vpack.c.bf16 %v6377_v31, %v6376_v11  ;;  %v6760_v15 = vld [vmem:[%s11239_s3 + $0xc0] sm:$0xff] }
 0x70c   : > { %v8294_v31 = vpack.c.bf16 %v6760_v15, %v6759_v39 }
 0x70d   : > { %8134 = vmatmul.mubr.msk.f32.gmra.mrb[52].mxu0 %vm486_vm1, %v11409_v18  ;;  %8287 = vmatprep.subr.bf16.mxu0 %v8286_v55 }
 0x70e   : > { %8136 = vmatprep.mubr.msk.f32.mxu0 %vm486_vm1, %v11411_v33  ;;  %8289 = vmatpush3.bf16.msra.mxu0 %v8286_v55 }
 0x711   : > { %8137 = vmatmul.mubr.msk.f32.gmra.mrb[54].mxu0 %vm486_vm1, %v11413_v63 }
 0x712   : > { %8139 = vmatprep.mubr.msk.f32.mxu0 %vm486_vm1, %v11415_v14 }
 0x715   : > { %8140 = vmatmul.mubr.msk.f32.gmra.mrb[56].mxu0 %vm486_vm1, %v11417_v6 }
 0x716   : > { %8142 = vmatprep.mubr.msk.f32.mxu0 %vm486_vm1, %v11419_v35 }
 0x719   : > { %8143 = vmatmul.mubr.msk.f32.gmra.mrb[58].mxu0 %vm486_vm1, %v11421_v42 }
 0x71a   : > { %8145 = vmatprep.mubr.msk.f32.mxu0 %vm486_vm1, %v11423_v45 }
 0x71d   : > { %8146 = vmatmul.mubr.msk.f32.gmra.mrb[60].mxu0 %vm486_vm1, %v11425_v43 }
 0x71e   : > { %8148 = vmatprep.mubr.msk.f32.mxu0 %vm486_vm1, %v11427_v46 }
 0x721   : > { %8149 = vmatmul.mubr.msk.f32.gmra.mrb[62].mxu0 %vm486_vm1, %v11429_v12 }
 0x722   : > { %8151 = vmatprep.mubr.msk.f32.mxu0 %vm486_vm1, %v11431_v51 }
 0x725   : > { %8152 = vmatmul.mubr.msk.f32.gmra.mrb[64].mxu0 %vm486_vm1, %v11433_v23 }
 0x740   : > { %v5093_v17 = vpop.f32.mrb[10].mxu1 }
 0x741   : > { %v8019_v60 = vpop.f32.mrb[11].mxu1  ;;  %v6125_v24 = vadd.f32 %v10838_v62, %v5093_v17 }
 0x743   : > { %v6141_v44 = vmax.f32 %v6125_v24, 0.0 }
 0x744   : > { %v5020_v48 = vpop.f32.mrb[38].mxu0 }
 0x745   : > { %v6124_v9 = vadd.f32 %v10838_v62, %v5020_v48  ;;  %v8014_v7 = vpop.f32.mrb[39].mxu0  ;;  %v5166_v34 = vpop.f32.mrb[12].mxu1 }
 0x746   : > { %v6126_v29 = vadd.f32 %v10838_v62, %v5166_v34  ;;  %v8024_v41 = vpop.f32.mrb[13].mxu1 }
 0x747   : > { %v6140_v59 = vmax.f32 %v6124_v9, 0.0 }
 0x748   : > { %v6142_v3 = vmax.f32 %v6126_v29, 0.0  ;;  %v10887_v29 = vld [vmem:[%s11239_s3 + $0xec] ss:$0 sm:$0xff] }
 0x749   : > { %v5239_v30 = vpop.f32.mrb[14].mxu1  ;;  %8098 = vmatprep.mubr.msk.f32.mxu1 %vm486_vm1, %v6140_v59 }
 0x74a   : > { %v6127_v56 = vadd.f32 %v10838_v62, %v5239_v30  ;;  %v8029_v25 = vpop.f32.mrb[15].mxu1  ;;  %8099 = vmatmul.mubr.msk.f32.vlgmr.msra.gmra.mrb[30].mxu1 %vm486_vm1, %v6141_v44 }
 0x74b   : > { %8101 = vmatprep.mubr.msk.f32.mxu1 %vm486_vm1, %v6142_v3 }
 0x74c   : > { %v6143_v2 = vmax.f32 %v6127_v56, 0.0 }
 0x74d   : > { %v5312_v57 = vpop.f32.mrb[16].mxu1 }
 0x74e   : > { %v6128_v16 = vadd.f32 %v10838_v62, %v5312_v57  ;;  %v8034_v52 = vpop.f32.mrb[17].mxu1  ;;  %8102 = vmatmul.mubr.msk.f32.gmra.mrb[32].mxu1 %vm486_vm1, %v6143_v2 }
 0x750   : > { %v6144_v54 = vmax.f32 %v6128_v16, 0.0 }
 0x751   : > { %v5385_v10 = vpop.f32.mrb[18].mxu1  ;;  %v5531_v47 = vpop.f32.mrb[40].mxu0 }
 0x752   : > { %v6129_v4 = vadd.f32 %v10838_v62, %v5385_v10  ;;  %v8039_v27 = vpop.f32.mrb[19].mxu1  ;;  %v8049_v13 = vpop.f32.mrb[41].mxu0  ;;  %8104 = vmatprep.mubr.msk.f32.mxu1 %vm486_vm1, %v6144_v54  ;;  %v6131_v19 = vadd.f32 %v10838_v62, %v5531_v47 }
 0x754   : > { %v6145_v0 = vmax.f32 %v6129_v4, 0.0  ;;  %v6147_v28 = vmax.f32 %v6131_v19, 0.0 }
 0x755   : > { %v5458_v20 = vpop.f32.mrb[20].mxu1 }
 0x756   : > { %v6130_v21 = vadd.f32 %v10838_v62, %v5458_v20  ;;  %v8044_v36 = vpop.f32.mrb[21].mxu1  ;;  %8105 = vmatmul.mubr.msk.f32.gmra.mrb[34].mxu1 %vm486_vm1, %v6145_v0 }
 0x758   : > { %v6146_v8 = vmax.f32 %v6130_v21, 0.0 }
 0x75a   : > { %8107 = vmatprep.mubr.msk.f32.mxu1 %vm486_vm1, %v6146_v8 }
 0x75b   : > { %8108 = vmatmul.mubr.msk.f32.gmra.mrb[36].mxu1 %vm486_vm1, %v6147_v28  ;;  %v6757_v28 = vld [vmem:[%s11239_s3 + $0xa8] sm:$0xff] }
 0x75c   : > { %v8290_v11 = vpack.c.bf16 %v6758_v38, %v6757_v28 }
 0x75e   : > { %8291 = vmatprep.subr.bf16.mxu1 %v8290_v11 }
 0x75f   : > { %8293 = vmatpush3.bf16.msra.mxu1 %v8290_v11 }
 0x760   : > { %8295 = vmatprep.subr.bf16.mxu1 %v8294_v31 }
 0x763   : > { %8297 = vmatpush3.bf16.msra.mxu1 %v8294_v31 }
 0x767   : > { %v5677_v18 = vpop.f32.mrb[42].mxu0 }
 0x768   : > { %v8059_v49 = vpop.f32.mrb[43].mxu0  ;;  %v6133_v33 = vadd.f32 %v10838_v62, %v5677_v18 }
 0x76a   : > { %v6149_v22 = vmax.f32 %v6133_v33, 0.0 }
 0x773   : > { %v5604_v40 = vpop.f32.mrb[22].mxu1 }
 0x774   : > { %v6132_v63 = vadd.f32 %v10838_v62, %v5604_v40  ;;  %v8054_v53 = vpop.f32.mrb[23].mxu1 }
 0x776   : > { %v6148_v14 = vmax.f32 %v6132_v63, 0.0 }
 0x778   : > { %8110 = vmatprep.mubr.msk.f32.mxu1 %vm486_vm1, %v6148_v14 }
 0x779   : > { %8111 = vmatmul.mubr.msk.f32.gmra.mrb[38].mxu1 %vm486_vm1, %v6149_v22 }
 0x787   : > { %v5823_v6 = vpop.f32.mrb[44].mxu0 }
 0x788   : > { %v8069_v26 = vpop.f32.mrb[45].mxu0  ;;  %v6135_v35 = vadd.f32 %v10838_v62, %v5823_v6 }
 0x78a   : > { %v6151_v32 = vmax.f32 %v6135_v35, 0.0 }
 0x793   : > { %v5750_v37 = vpop.f32.mrb[24].mxu1 }
 0x794   : > { %v6134_v42 = vadd.f32 %v10838_v62, %v5750_v37  ;;  %v8064_v5 = vpop.f32.mrb[25].mxu1 }
 0x796   : > { %v6150_v45 = vmax.f32 %v6134_v42, 0.0 }
 0x798   : > { %8113 = vmatprep.mubr.msk.f32.mxu1 %vm486_vm1, %v6150_v45 }
 0x799   : > { %8114 = vmatmul.mubr.msk.f32.gmra.mrb[40].mxu1 %vm486_vm1, %v6151_v32 }
 0x7a7   : > { %v5969_v43 = vpop.f32.mrb[46].mxu0 }
 0x7a8   : > { %v8079_v50 = vpop.f32.mrb[47].mxu0  ;;  %v6137_v46 = vadd.f32 %v10838_v62, %v5969_v43 }
 0x7aa   : > { %v6153_v1 = vmax.f32 %v6137_v46, 0.0 }
 0x7b3   : > { %v5896_v58 = vpop.f32.mrb[26].mxu1 }
 0x7b4   : > { %v6136_v12 = vadd.f32 %v10838_v62, %v5896_v58  ;;  %v8074_v61 = vpop.f32.mrb[27].mxu1 }
 0x7b6   : > { %v6152_v51 = vmax.f32 %v6136_v12, 0.0 }
 0x7b8   : > { %8116 = vmatprep.mubr.msk.f32.mxu1 %vm486_vm1, %v6152_v51 }
 0x7b9   : > { %8117 = vmatmul.mubr.msk.f32.gmra.mrb[42].mxu1 %vm486_vm1, %v6153_v1  ;;  %v10936_v1 = vld [vmem:[%s11239_s3 + $0xed] ss:$0 sm:$0xff] }
 0x7d0   : > { %v6042_v23 = vpop.f32.mrb[28].mxu1 }
 0x7d1   : > { %v6138_v17 = vadd.f32 %v10838_v62, %v6042_v23  ;;  %v8084_v60 = vpop.f32.mrb[29].mxu1 }
 0x7d3   : > { %v6154_v24 = vmax.f32 %v6138_v17, 0.0 }
 0x7d4   : > { %v6115_v48 = vpop.f32.mrb[48].mxu0 }
 0x7d5   : > { %v6139_v9 = vadd.f32 %v10838_v62, %v6115_v48  ;;  %v8089_v7 = vpop.f32.mrb[49].mxu0  ;;  %8119 = vmatprep.mubr.msk.f32.mxu1 %vm486_vm1, %v6154_v24 }
 0x7d7   : > { %v6155_v34 = vmax.f32 %v6139_v9, 0.0 }
 0x7d9   : > { %8120 = vmatmul.mubr.msk.f32.gmra.mrb[44].mxu1 %vm486_vm1, %v6155_v34 }
 0x81d   : > { %v8100_v41 = vpop.f32.mrb[30].mxu1 }
 0x81e   : > { %v6285_v59 = vadd.f32 %v8100_v41, %v10887_v29  ;;  %v6279_v44 = vpop.f32.mrb[31].mxu1 }
 0x81f   : > { %v6280_v3 = vadd.f32 %v10887_v29, %v6279_v44 }
 0x820   : > { %v6359_v62 = vmax.f32 %v6285_v59, 0.0 }
 0x821   : > { %v6358_v30 = vmax.f32 %v6280_v3, 0.0  ;;  %v8103_v56 = vpop.f32.mrb[32].mxu1 }
 0x822   : > { %v6295_v25 = vadd.f32 %v8103_v56, %v10887_v29  ;;  %v6289_v2 = vpop.f32.mrb[33].mxu1 }
 0x823   : > { %v6290_v57 = vadd.f32 %v10887_v29, %v6289_v2  ;;  %8162 = vmatprep.mubr.msk.f32.mxu0 %vm486_vm1, %v6358_v30 }
 0x824   : > { %8163 = vmatmul.mubr.msk.f32.vlgmr.msra.gmra.mrb[50].mxu0 %vm486_vm1, %v6359_v62  ;;  %v6361_v52 = vmax.f32 %v6295_v25, 0.0 }
 0x825   : > { %v6360_v16 = vmax.f32 %v6290_v57, 0.0 }
 0x827   : > { %8165 = vmatprep.mubr.msk.f32.mxu0 %vm486_vm1, %v6360_v16 }
 0x828   : > { %8166 = vmatmul.mubr.msk.f32.gmra.mrb[52].mxu0 %vm486_vm1, %v6361_v52 }
 0x829   : > { %v8106_v54 = vpop.f32.mrb[34].mxu1 }
 0x82a   : > { %v6305_v10 = vadd.f32 %v8106_v54, %v10887_v29  ;;  %v6299_v47 = vpop.f32.mrb[35].mxu1 }
 0x82b   : > { %v6300_v4 = vadd.f32 %v10887_v29, %v6299_v47 }
 0x82c   : > { %v6363_v13 = vmax.f32 %v6305_v10, 0.0 }
 0x82d   : > { %v6362_v27 = vmax.f32 %v6300_v4, 0.0  ;;  %v6975_v4 = vld [vmem:[%s11239_s3 + $0xc8] sm:$0xff] }
 0x82e   : > { %v8109_v0 = vpop.f32.mrb[36].mxu1 }
 0x82f   : > { %v6315_v19 = vadd.f32 %v8109_v0, %v10887_v29  ;;  %v6309_v20 = vpop.f32.mrb[37].mxu1  ;;  %8168 = vmatprep.mubr.msk.f32.mxu0 %vm486_vm1, %v6362_v27  ;;  %v6976_v27 = vld [vmem:[%s11239_s3 + $0xd0] sm:$0xff] }
 0x830   : > { %v6310_v21 = vadd.f32 %v10887_v29, %v6309_v20  ;;  %8169 = vmatmul.mubr.msk.f32.gmra.mrb[54].mxu0 %vm486_vm1, %v6363_v13  ;;  %v6977_v13 = vld [vmem:[%s11239_s3 + $0xd8] sm:$0xff]  ;;  %v8298_v0 = vpack.c.bf16 %v6976_v27, %v6975_v4  ;;  %v7367_v4 = vld [vmem:[%s11005_s5 + $0x60] sm:$0xff]  ;;  %v7361_v27 = vld [vmem:[%s11005_s5 + $0x30] sm:$0xff] }
 0x831   : > { %v6365_v8 = vmax.f32 %v6315_v19, 0.0  ;;  %v6978_v19 = vld [vmem:[%s11239_s3 + $0xe0] sm:$0xff] }
 0x832   : > { %v6364_v36 = vmax.f32 %v6310_v21, 0.0  ;;  %v8302_v20 = vpack.c.bf16 %v6978_v19, %v6977_v13  ;;  %8299 = vmatprep.subr.bf16.mxu1 %v8298_v0  ;;  %v7362_v13 = vld [vmem:[%s11005_s5 + $0x38] sm:$0xff] }
 0x834   : > { %8171 = vmatprep.mubr.msk.f32.mxu0 %vm486_vm1, %v6364_v36 }
 0x835   : > { %8172 = vmatmul.mubr.msk.f32.gmra.mrb[56].mxu0 %vm486_vm1, %v6365_v8 }
 0x84c   : > { %v8112_v55 = vpop.f32.mrb[38].mxu1 }
 0x84d   : > { %v6325_v18 = vadd.f32 %v8112_v55, %v10887_v29  ;;  %v6319_v49 = vpop.f32.mrb[39].mxu1 }
 0x84e   : > { %v6320_v33 = vadd.f32 %v10887_v29, %v6319_v49 }
 0x84f   : > { %v6367_v63 = vmax.f32 %v6325_v18, 0.0 }
 0x850   : > { %v6366_v40 = vmax.f32 %v6320_v33, 0.0 }
 0x852   : > { %8174 = vmatprep.mubr.msk.f32.mxu0 %vm486_vm1, %v6366_v40 }
 0x853   : > { %8175 = vmatmul.mubr.msk.f32.gmra.mrb[58].mxu0 %vm486_vm1, %v6367_v63 }
 0x86c   : > { %v8115_v53 = vpop.f32.mrb[40].mxu1 }
 0x86d   : > { %v6335_v14 = vadd.f32 %v8115_v53, %v10887_v29  ;;  %v6329_v22 = vpop.f32.mrb[41].mxu1 }
 0x86e   : > { %v6330_v6 = vadd.f32 %v10887_v29, %v6329_v22 }
 0x86f   : > { %v6369_v35 = vmax.f32 %v6335_v14, 0.0 }
 0x870   : > { %v6368_v26 = vmax.f32 %v6330_v6, 0.0 }
 0x872   : > { %8177 = vmatprep.mubr.msk.f32.mxu0 %vm486_vm1, %v6368_v26 }
 0x873   : > { %8178 = vmatmul.mubr.msk.f32.gmra.mrb[60].mxu0 %vm486_vm1, %v6369_v35 }
 0x88c   : > { %v8118_v37 = vpop.f32.mrb[42].mxu1 }
 0x88d   : > { %v6345_v42 = vadd.f32 %v8118_v37, %v10887_v29  ;;  %v6339_v5 = vpop.f32.mrb[43].mxu1 }
 0x88e   : > { %v6340_v45 = vadd.f32 %v10887_v29, %v6339_v5 }
 0x88f   : > { %v6371_v43 = vmax.f32 %v6345_v42, 0.0 }
 0x890   : > { %v6370_v32 = vmax.f32 %v6340_v45, 0.0  ;;  %v8424_v45 = vmov 0  }
 0x891   : > { %8342 = vset.pattern.permute.xlu1 %v8424_v45  ;;  %8341 = vset.pattern.permute.xlu0 %v8424_v45 }
 0x892   : > { %8180 = vmatprep.mubr.msk.f32.mxu0 %vm486_vm1, %v6370_v32  ;;  %v10987_v32 = vld [vmem:[%s11239_s3 + $0xee] ss:$0 sm:$0xff] }
 0x893   : > { %8181 = vmatmul.mubr.msk.f32.gmra.mrb[62].mxu0 %vm486_vm1, %v6371_v43 }
 0x8ac   : > { %v8121_v50 = vpop.f32.mrb[44].mxu1 }
 0x8ad   : > { %v6355_v46 = vadd.f32 %v8121_v50, %v10887_v29  ;;  %v6349_v58 = vpop.f32.mrb[45].mxu1 }
 0x8ae   : > { %v6350_v12 = vadd.f32 %v10887_v29, %v6349_v58 }
 0x8af   : > { %v6373_v51 = vmax.f32 %v6355_v46, 0.0 }
 0x8b0   : > { %v6372_v61 = vmax.f32 %v6350_v12, 0.0 }
 0x8b2   : > { %8183 = vmatprep.mubr.msk.f32.mxu0 %vm486_vm1, %v6372_v61 }
 0x8b3   : > { %8184 = vmatmul.mubr.msk.f32.gmra.mrb[64].mxu0 %vm486_vm1, %v6373_v51 }
 0x8f7   : > { %v8164_v23 = vpop.f32.mrb[50].mxu0 }
 0x8f8   : > { %v6726_v17 = vadd.f32 %v8164_v23, %v10936_v1  ;;  %v6641_v60 = vpop.f32.mrb[51].mxu0 }
 0x8f9   : > { %v6725_v24 = vadd.f32 %v10936_v1, %v6641_v60 }
 0x8fa   : > { %v6742_v7 = vmax.f32 %v6726_v17, 0.0 }
 0x8fb   : > { %v6741_v48 = vmax.f32 %v6725_v24, 0.0  ;;  %v8167_v9 = vpop.f32.mrb[52].mxu0 }
 0x8fc   : > { %v6728_v34 = vadd.f32 %v8167_v9, %v10936_v1  ;;  %v6651_v29 = vpop.f32.mrb[53].mxu0 }
 0x8fd   : > { %v6727_v41 = vadd.f32 %v10936_v1, %v6651_v29  ;;  %8194 = vmatprep.mubr.msk.f32.mxu1 %vm486_vm1, %v6741_v48 }
 0x8fe   : > { %8195 = vmatmul.mubr.msk.f32.vlgmr.msra.gmra.mrb[46].mxu1 %vm486_vm1, %v6742_v7  ;;  %v6744_v44 = vmax.f32 %v6728_v34, 0.0 }
 0x8ff   : > { %v6743_v59 = vmax.f32 %v6727_v41, 0.0  ;;  %8301 = vmatpush3.bf16.msra.mxu1 %v8298_v0  ;;  %v7364_v0 = vld [vmem:[%s11005_s5 + $0x48] sm:$0xff] }
 0x900   : > { %8303 = vmatprep.subr.bf16.mxu1 %v8302_v20 }
 0x901   : > { %8197 = vmatprep.mubr.msk.f32.mxu1 %vm486_vm1, %v6743_v59 }
 0x902   : > { %8198 = vmatmul.mubr.msk.f32.gmra.mrb[48].mxu1 %vm486_vm1, %v6744_v44 }
 0x903   : > { %v8170_v3 = vpop.f32.mrb[54].mxu0  ;;  %8305 = vmatpush3.bf16.msra.mxu1 %v8302_v20 }
 0x904   : > { %v6730_v30 = vadd.f32 %v8170_v3, %v10936_v1  ;;  %v6661_v56 = vpop.f32.mrb[55].mxu0 }
 0x905   : > { %v6729_v62 = vadd.f32 %v10936_v1, %v6661_v56  ;;  %v7356_v56 = vld [vmem:[%s11005_s5 + $0x8] sm:$0xff] }
 0x906   : > { %v6746_v2 = vmax.f32 %v6730_v30, 0.0  ;;  %7378 = vperm.xlu1 %8342, %v7356_v56  }
 0x907   : > { %v6745_v25 = vmax.f32 %v6729_v62, 0.0 }
 0x908   : > { %v8173_v57 = vpop.f32.mrb[56].mxu0 }
 0x909   : > { %v6732_v16 = vadd.f32 %v8173_v57, %v10936_v1  ;;  %v6671_v52 = vpop.f32.mrb[57].mxu0  ;;  %8200 = vmatprep.mubr.msk.f32.mxu1 %vm486_vm1, %v6745_v25  ;;  %v7357_v25 = vld [vmem:[%s11005_s5 + $0x10] sm:$0xff]  ;;  %v7355_v57 = vld [vmem:[%s11005_s5] sm:$0xff] }
 0x90a   : > { %v6731_v54 = vadd.f32 %v10936_v1, %v6671_v52  ;;  %8201 = vmatmul.mubr.msk.f32.gmra.mrb[50].mxu1 %vm486_vm1, %v6746_v2  ;;  %7383 = vperm.xlu1 %8342, %v7357_v25   ;;  %v7363_v52 = vld [vmem:[%s11005_s5 + $0x40] sm:$0xff] }
 0x90b   : > { %v6748_v47 = vmax.f32 %v6732_v16, 0.0  ;;  %v7358_v16 = vld [vmem:[%s11005_s5 + $0x18] sm:$0xff]  ;;  %7373 = vperm.xlu0 %8341, %v7355_v57  }
 0x90c   : > { %v6747_v10 = vmax.f32 %v6731_v54, 0.0  ;;  %v7359_v54 = vld [vmem:[%s11005_s5 + $0x20] sm:$0xff] }
 0x90e   : > { %8203 = vmatprep.mubr.msk.f32.mxu1 %vm486_vm1, %v6747_v10  ;;  %7388 = vperm.xlu1 %8342, %v7358_v16   ;;  %v7365_v10 = vld [vmem:[%s11005_s5 + $0x50] sm:$0xff] }
 0x90f   : > { %8204 = vmatmul.mubr.msk.f32.gmra.mrb[52].mxu1 %vm486_vm1, %v6748_v47  ;;  %7413 = vperm.xlu0 %8341, %v7363_v52   ;;  %v7360_v47 = vld [vmem:[%s11005_s5 + $0x28] sm:$0xff] }
 0x912   : > { %7393 = vperm.xlu1 %8342, %v7359_v54  }
 0x913   : > { %7423 = vperm.xlu0 %8341, %v7365_v10  }
 0x916   : > { %7398 = vperm.xlu1 %8342, %v7360_v47  }
 0x917   : > { %7433 = vperm.xlu0 %8341, %v7367_v4  }
 0x91a   : > { %7403 = vperm.xlu1 %8342, %v7361_v27  }
 0x91e   : > { %7408 = vperm.xlu1 %8342, %v7362_v13  }
 0x922   : > { %7418 = vperm.xlu1 %8342, %v7364_v0  }
 0x926   : > { %v8176_v21 = vpop.f32.mrb[58].mxu0 }
 0x927   : > { %v6734_v36 = vadd.f32 %v8176_v21, %v10936_v1  ;;  %v6681_v8 = vpop.f32.mrb[59].mxu0 }
 0x928   : > { %v6733_v28 = vadd.f32 %v10936_v1, %v6681_v8  ;;  %v7366_v8 = vld [vmem:[%s11005_s5 + $0x58] sm:$0xff] }
 0x929   : > { %v6750_v39 = vmax.f32 %v6734_v36, 0.0  ;;  %7428 = vperm.xlu1 %8342, %v7366_v8  }
 0x92a   : > { %v6749_v38 = vmax.f32 %v6733_v28, 0.0 }
 0x92c   : > { %8206 = vmatprep.mubr.msk.f32.mxu1 %vm486_vm1, %v6749_v38 }
 0x92d   : > { %8207 = vmatmul.mubr.msk.f32.gmra.mrb[54].mxu1 %vm486_vm1, %v6750_v39  ;;  %v7368_v39 = vld [vmem:[%s11005_s5 + $0x68] sm:$0xff] }
 0x92e   : > { %7438 = vperm.xlu1 %8342, %v7368_v39  }
 0x946   : > { %v8179_v11 = vpop.f32.mrb[60].mxu0 }
 0x947   : > { %v6736_v15 = vadd.f32 %v8179_v11, %v10936_v1  ;;  %v6691_v31 = vpop.f32.mrb[61].mxu0 }
 0x948   : > { %v6735_v55 = vadd.f32 %v10936_v1, %v6691_v31 }
 0x949   : > { %v6752_v49 = vmax.f32 %v6736_v15, 0.0 }
 0x94a   : > { %v6751_v18 = vmax.f32 %v6735_v55, 0.0 }
 0x94c   : > { %8209 = vmatprep.mubr.msk.f32.mxu1 %vm486_vm1, %v6751_v18 }
 0x94d   : > { %8210 = vmatmul.mubr.msk.f32.gmra.mrb[56].mxu1 %vm486_vm1, %v6752_v49 }
 0x966   : > { %v8182_v33 = vpop.f32.mrb[62].mxu0 }
 0x967   : > { %v6738_v40 = vadd.f32 %v8182_v33, %v10936_v1  ;;  %v6701_v63 = vpop.f32.mrb[63].mxu0  ;;  %v8425_v33 = vmov 4  }
 0x968   : > { %v6737_v53 = vadd.f32 %v10936_v1, %v6701_v63  ;;  %8343 = vset.pattern.permute.xlu1 %v8425_v33  ;;  %8344 = vset.pattern.permute.xlu0 %v8425_v33 }
 0x969   : > { %v6754_v22 = vmax.f32 %v6738_v40, 0.0 }
 0x96a   : > { %v6753_v14 = vmax.f32 %v6737_v53, 0.0 }
 0x96c   : > { %8212 = vmatprep.mubr.msk.f32.mxu1 %vm486_vm1, %v6753_v14 }
 0x96d   : > { %8213 = vmatmul.mubr.msk.f32.gmra.mrb[58].mxu1 %vm486_vm1, %v6754_v22 }
 0x985   : > { %v7379_v47 = vpop.permute.xlu1 %7378 }
 0x986   : > { %v8185_v6 = vpop.f32.mrb[64].mxu0 }
 0x987   : > { %v6740_v26 = vadd.f32 %v8185_v6, %v10936_v1  ;;  %v6711_v35 = vpop.f32.mrb[65].mxu0 }
 0x988   : > { %v6739_v37 = vadd.f32 %v10936_v1, %v6711_v35 }
 0x989   : > { %v6756_v5 = vmax.f32 %v6740_v26, 0.0  ;;  %v7384_v27 = vpop.permute.xlu1 %7383 }
 0x98a   : > { %v6755_v42 = vmax.f32 %v6739_v37, 0.0 }
 0x98c   : > { %8215 = vmatprep.mubr.msk.f32.mxu1 %vm486_vm1, %v6755_v42 }
 0x98d   : > { %8216 = vmatmul.mubr.msk.f32.gmra.mrb[60].mxu1 %vm486_vm1, %v6756_v5  ;;  %v7389_v13 = vpop.permute.xlu1 %7388 }
 0x991   : > { %v11098_v0 = vpop.permute.xlu1 %7393 }
 0x9d1   : > { %v8196_v43 = vpop.f32.mrb[46].mxu1 }
 0x9d2   : > { %v6886_v50 = vadd.f32 %v8196_v43, %v10987_v32  ;;  %v6880_v46 = vpop.f32.mrb[47].mxu1 }
 0x9d3   : > { %v6881_v58 = vadd.f32 %v10987_v32, %v6880_v46 }
 0x9d4   : > { %v6960_v51 = vmax.f32 %v6886_v50, 0.0  ;;  %v11044_v50 = vld [vmem:[%s11239_s3 + $0xef] ss:$0 sm:$0xff] }
 0x9d5   : > { %v6959_v12 = vmax.f32 %v6881_v58, 0.0  ;;  %v8199_v61 = vpop.f32.mrb[48].mxu1 }
 0x9d6   : > { %v6896_v1 = vadd.f32 %v8199_v61, %v10987_v32  ;;  %v6890_v23 = vpop.f32.mrb[49].mxu1 }
 0x9d7   : > { %v6891_v17 = vadd.f32 %v10987_v32, %v6890_v23  ;;  %8226 = vmatprep.mubr.msk.f32.mxu1 %vm486_vm1, %v6959_v12 }
 0x9d8   : > { %8227 = vmatmul.mubr.msk.f32.vlgmr.msra.gmra.mrb[62].mxu1 %vm486_vm1, %v6960_v51  ;;  %v6962_v24 = vmax.f32 %v6896_v1, 0.0 }
 0x9d9   : > { %v6961_v60 = vmax.f32 %v6891_v17, 0.0 }
 0x9db   : > { %8229 = vmatprep.mubr.msk.f32.mxu1 %vm486_vm1, %v6961_v60 }
 0x9dc   : > { %8230 = vmatmul.mubr.msk.f32.gmra.mrb[64].mxu1 %vm486_vm1, %v6962_v24 }
 0x9dd   : > { %v8202_v48 = vpop.f32.mrb[50].mxu1 }
 0x9de   : > { %v6906_v9 = vadd.f32 %v8202_v48, %v10987_v32  ;;  %v6900_v7 = vpop.f32.mrb[51].mxu1 }
 0x9df   : > { %v6901_v34 = vadd.f32 %v10987_v32, %v6900_v7 }
 0x9e0   : > { %v6964_v41 = vmax.f32 %v6906_v9, 0.0 }
 0x9e1   : > { %v6963_v29 = vmax.f32 %v6901_v34, 0.0 }
 0x9e2   : > { %v8205_v59 = vpop.f32.mrb[52].mxu1 }
 0x9e3   : > { %v6916_v44 = vadd.f32 %v8205_v59, %v10987_v32  ;;  %v6910_v3 = vpop.f32.mrb[53].mxu1  ;;  %8232 = vmatprep.mubr.msk.f32.mxu1 %vm486_vm1, %v6963_v29 }
 0x9e4   : > { %v6911_v30 = vadd.f32 %v10987_v32, %v6910_v3  ;;  %8233 = vmatmul.mubr.msk.f32.gmra.mrb[66].mxu1 %vm486_vm1, %v6964_v41 }
 0x9e5   : > { %v6966_v2 = vmax.f32 %v6916_v44, 0.0 }
 0x9e6   : > { %v6965_v62 = vmax.f32 %v6911_v30, 0.0 }
 0x9e8   : > { %8235 = vmatprep.mubr.msk.f32.mxu1 %vm486_vm1, %v6965_v62 }
 0x9e9   : > { %8236 = vmatmul.mubr.msk.f32.gmra.mrb[68].mxu1 %vm486_vm1, %v6966_v2 }
 0xa00   : > { %v8208_v19 = vpop.f32.mrb[54].mxu1 }
 0xa01   : > { %v6926_v20 = vadd.f32 %v8208_v19, %v10987_v32  ;;  %v6920_v21 = vpop.f32.mrb[55].mxu1  ;;  %v11100_v19 = vpop.permute.xlu1 %7398 }
 0xa02   : > { %v6921_v36 = vadd.f32 %v10987_v32, %v6920_v21 }
 0xa03   : > { %v6968_v38 = vmax.f32 %v6926_v20, 0.0 }
 0xa04   : > { %v6967_v28 = vmax.f32 %v6921_v36, 0.0 }
 0xa05   : > { %v11104_v36 = vpop.permute.xlu1 %7403 }
 0xa06   : > { %8238 = vmatprep.mubr.msk.f32.mxu1 %vm486_vm1, %v6967_v28  ;;  %v7374_v28 = vpop.permute.xlu0 %7373 }
 0xa07   : > { %8239 = vmatmul.mubr.msk.f32.gmra.mrb[70].mxu1 %vm486_vm1, %v6968_v38 }
 0xa09   : > { %v11109_v38 = vpop.permute.xlu1 %7408 }
 0xa20   : > { %v8211_v11 = vpop.f32.mrb[56].mxu1 }
 0xa21   : > { %v6936_v15 = vadd.f32 %v8211_v11, %v10987_v32  ;;  %v6930_v31 = vpop.f32.mrb[57].mxu1 }
 0xa22   : > { %v6931_v55 = vadd.f32 %v10987_v32, %v6930_v31  ;;  %v11117_v31 = vpop.permute.xlu1 %7418 }
 0xa23   : > { %v6970_v49 = vmax.f32 %v6936_v15, 0.0  ;;  %v11115_v15 = vpop.permute.xlu0 %7413 }
 0xa24   : > { %v6969_v18 = vmax.f32 %v6931_v55, 0.0 }
 0xa26   : > { %8241 = vmatprep.mubr.msk.f32.mxu1 %vm486_vm1, %v6969_v18  ;;  %v11121_v18 = vpop.permute.xlu1 %7428 }
 0xa27   : > { %8242 = vmatmul.mubr.msk.f32.gmra.mrb[72].mxu1 %vm486_vm1, %v6970_v49  ;;  %v11119_v55 = vpop.permute.xlu0 %7423 }
 0xa2b   : > { %v11123_v49 = vpop.permute.xlu0 %7433 }
 0xa40   : > { %v8214_v40 = vpop.f32.mrb[58].mxu1 }
 0xa41   : > { %v6946_v63 = vadd.f32 %v8214_v40, %v10987_v32  ;;  %v6940_v53 = vpop.f32.mrb[59].mxu1  ;;  %v11128_v40 = vpop.permute.xlu1 %7438 }
 0xa42   : > { %v6941_v14 = vadd.f32 %v10987_v32, %v6940_v53 }
 0xa43   : > { %v6972_v6 = vmax.f32 %v6946_v63, 0.0 }
 0xa44   : > { %v6971_v22 = vmax.f32 %v6941_v14, 0.0 }
 0xa46   : > { %8244 = vmatprep.mubr.msk.f32.mxu1 %vm486_vm1, %v6971_v22 }
 0xa47   : > { %8245 = vmatmul.mubr.msk.f32.gmra.mrb[74].mxu1 %vm486_vm1, %v6972_v6 }
 0xa60   : > { %v8217_v26 = vpop.f32.mrb[60].mxu1 }
 0xa61   : > { %v6956_v35 = vadd.f32 %v8217_v26, %v10987_v32  ;;  %v6950_v37 = vpop.f32.mrb[61].mxu1 }
 0xa62   : > { %v6951_v42 = vadd.f32 %v10987_v32, %v6950_v37 }
 0xa63   : > { %v6974_v43 = vmax.f32 %v6956_v35, 0.0 }
 0xa64   : > { %v6973_v5 = vmax.f32 %v6951_v42, 0.0 }
 0xa66   : > { %8247 = vmatprep.mubr.msk.f32.mxu1 %vm486_vm1, %v6973_v5 }
 0xa67   : > { %8248 = vmatmul.mubr.msk.f32.gmra.mrb[76].mxu1 %vm486_vm1, %v6974_v43 }
 0xaab   : > { %v8228_v46 = vpop.f32.mrb[62].mxu1 }
 0xaac   : > { %v11047_v58 = vadd.f32 %v8228_v46, %v11044_v50  ;;  %v7098_v12 = vpop.f32.mrb[63].mxu1 }
 0xaad   : > { %v11050_v61 = vadd.f32 %v11044_v50, %v7098_v12 }
 0xaae   : > { %7184 = vperm.xlu1 %8343, %v11047_v58   ;;  %v7277_v48 = vsel %vm7273_vm0, %v11047_v58, 0.0 }
 0xaaf   : > { %v8231_v32 = vpop.f32.mrb[64].mxu1  ;;  %7179 = vperm.xlu0 %8344, %v11050_v61   ;;  %v7274_v34 = vsel %vm7273_vm0, %v11050_v61, 0.0 }
 0xab0   : > { %v7108_v51 = vpop.f32.mrb[65].mxu1  ;;  %v11074_v30 = vadd.f32 %v8231_v32, %v11044_v50 }
 0xab1   : > { %v11055_v24 = vadd.f32 %v11044_v50, %v7108_v51 }
 0xab2   : > { %v7283_v57 = vsel %vm7273_vm0, %v11074_v30, 0.0 }
 0xab3   : > { %v7280_v7 = vsel %vm7273_vm0, %v11055_v24, 0.0 }
 0xab7   : > { %v8234_v1 = vpop.f32.mrb[66].mxu1 }
 0xab8   : > { %v7118_v23 = vpop.f32.mrb[67].mxu1  ;;  %v11090_v52 = vadd.f32 %v8234_v1, %v11044_v50 }
 0xab9   : > { %v11060_v9 = vadd.f32 %v11044_v50, %v7118_v23 }
 0xaba   : > { %v7289_v11 = vsel %vm7273_vm0, %v11090_v52, 0.0 }
 0xabb   : > { %v7286_v41 = vsel %vm7273_vm0, %v11060_v9, 0.0 }
 0xabc   : > { %v8237_v17 = vpop.f32.mrb[68].mxu1 }
 0xabd   : > { %v7128_v60 = vpop.f32.mrb[69].mxu1  ;;  %v11126_v33 = vadd.f32 %v8237_v17, %v11044_v50 }
 0xabe   : > { %v11067_v29 = vadd.f32 %v11044_v50, %v7128_v60 }
 0xac0   : > { %v7292_v59 = vsel %vm7273_vm0, %v11067_v29, 0.0 }
 0xace   : > { %7278 = vadd.xlane.f32.xlu0 %v7277_v48 }
 0xad2   : > { %7281 = vadd.xlane.f32.xlu0 %v7280_v7  ;;  %7275 = vadd.xlane.f32.xlu1 %v7274_v34  ;;  %v7295_v7 = vsel %vm7273_vm0, %v11126_v33, 0.0 }
 0xad6   : > { %7287 = vadd.xlane.f32.xlu0 %v7286_v41 }
 0xada   : > { %v8240_v44 = vpop.f32.mrb[70].mxu1  ;;  %7293 = vadd.xlane.f32.xlu0 %v7292_v59 }
 0xadb   : > { %v7138_v3 = vpop.f32.mrb[71].mxu1  ;;  %v11079_v56 = vadd.f32 %v8240_v44, %v11044_v50 }
 0xadc   : > { %v11083_v2 = vadd.f32 %v11044_v50, %v7138_v3 }
 0xade   : > { %v7298_v16 = vsel %vm7273_vm0, %v11083_v2, 0.0 }
 0xae3   : > { %7194 = vperm.xlu1 %8343, %v11074_v30  }
 0xae7   : > { %7189 = vperm.xlu1 %8343, %v11055_v24  }
 0xaf0   : > { %7224 = vperm.xlu0 %8344, %v11079_v56  }
 0xafa   : > { %v8243_v62 = vpop.f32.mrb[72].mxu1 }
 0xafb   : > { %v7148_v25 = vpop.f32.mrb[73].mxu1  ;;  %v11095_v4 = vadd.f32 %v8243_v62, %v11044_v50 }
 0xafc   : > { %v11107_v8 = vadd.f32 %v11044_v50, %v7148_v25 }
 0xafe   : > { %v7304_v39 = vsel %vm7273_vm0, %v11107_v8, 0.0 }
 0xb0b   : > { %7284 = vadd.xlane.f32.xlu1 %v7283_v57 }
 0xb0f   : > { %7299 = vadd.xlane.f32.xlu0 %v7298_v16 }
 0xb1a   : > { %v8246_v54 = vpop.f32.mrb[74].mxu1 }
 0xb1b   : > { %v7158_v10 = vpop.f32.mrb[75].mxu1  ;;  %v11132_v53 = vadd.f32 %v8246_v54, %v11044_v50 }
 0xb1c   : > { %7204 = vperm.xlu1 %8343, %v11090_v52  }
 0xb20   : > { %7199 = vperm.xlu1 %8343, %v11060_v9  }
 0xb25   : > { %7234 = vperm.xlu0 %8344, %v11095_v4  }
 0xb2d   : > { %v7185_v14 = vpop.permute.xlu1 %7184 }
 0xb2e   : > { %v7180_v63 = vpop.permute.xlu0 %7179  ;;  %v7258_v6 = vadd.f32 %v7185_v14, %v11047_v58 }
 0xb2f   : > { %v7257_v42 = vadd.f32 %v7180_v63, %v11050_v61  ;;  %v11152_v61 = vadd.f32 %v11044_v50, %v7158_v10 }
 0xb31   : > { %v7310_v48 = vsel %vm7273_vm0, %v11152_v61, 0.0 }
 0xb3a   : > { %v8249_v20 = vpop.f32.mrb[76].mxu1 }
 0xb3b   : > { %v11102_v21 = vpop.f32.mrb[77].mxu1  ;;  %v11159_v34 = vadd.f32 %v8249_v20, %v11044_v50  ;;  %v7369_v20 = vld [vmem:[%s11005_s5 + $0x70] sm:$0xff] }
 0xb44   : > { %7305 = vadd.xlane.f32.xlu0 %v7304_v39  ;;  %7290 = vadd.xlane.f32.xlu1 %v7289_v11 }
 0xb55   : > { %7214 = vperm.xlu1 %8343, %v11126_v33  }
 0xb59   : > { %7209 = vperm.xlu1 %8343, %v11067_v29  }
 0xb5a   : > { %7244 = vperm.xlu0 %8344, %v11132_v53  }
 0xb5b   : > { %v7279_v22 = vpop.xlane.xlu0 %7278 }
 0xb5c   : > { %v7324_v26 = vmul.f32 0.25, %v7279_v22 }
 0xb5e   : > { %v7340_v35 = vsub.f32 %v7258_v6, %v7324_v26 }
 0xb5f   : > { %v7276_v37 = vpop.xlane.xlu1 %7275  ;;  %v7282_v32 = vpop.xlane.xlu0 %7281 }
 0xb60   : > { %v7452_v5 = vmul.f32 %v7379_v47, %v7340_v35  ;;  %v7323_v43 = vmul.f32 0.25, %v7276_v37  ;;  %v7325_v1 = vmul.f32 0.25, %v7282_v32 }
 0xb62   : > { %7468 = vst.msk [vmem:[%s11141_s10 + $0x8] sm:$0xff] %vm7273_vm0, %v7452_v5  ;;  %v7339_v46 = vsub.f32 %v7257_v42, %v7323_v43 }
 0xb63   : > { %v7195_v12 = vpop.permute.xlu1 %7194  ;;  %v7288_v25 = vpop.xlane.xlu0 %7287 }
 0xb64   : > { %v7451_v58 = vmul.f32 %v7374_v28, %v7339_v46  ;;  %v7260_v41 = vadd.f32 %v7195_v12, %v11074_v30  ;;  %v7327_v16 = vmul.f32 0.25, %v7288_v25  ;;  %v11173_v30 = vadd.f32 %v11044_v50, %v11102_v21 }
 0xb66   : > { %7467 = vst.msk [vmem:[%s11141_s10] sm:$0xff] %vm7273_vm0, %v7451_v58 }
 0xb67   : > { %v7190_v51 = vpop.permute.xlu1 %7189  ;;  %v7294_v11 = vpop.xlane.xlu0 %7293 }
 0xb68   : > { %v7259_v23 = vadd.f32 %v7190_v51, %v11055_v24  ;;  %v7329_v14 = vmul.f32 0.25, %v7294_v11 }
 0xb6a   : > { %v7341_v17 = vsub.f32 %v7259_v23, %v7325_v1 }
 0xb6c   : > { %v7453_v60 = vmul.f32 %v7384_v27, %v7341_v17  ;;  %v7316_v27 = vsel %vm7273_vm0, %v11173_v30, 0.0 }
 0xb6e   : > { %7469 = vst.msk [vmem:[%s11141_s10 + $0x10] sm:$0xff] %vm7273_vm0, %v7453_v60 }
 0xb79   : > { %7311 = vadd.xlane.f32.xlu0 %v7310_v48 }
 0xb7d   : > { %7296 = vadd.xlane.f32.xlu1 %v7295_v7 }
 0xb8e   : > { %7219 = vperm.xlu1 %8343, %v11083_v2  }
 0xb8f   : > { %7254 = vperm.xlu0 %8344, %v11159_v34  }
 0xb93   : > { %8345 = vset.pattern.permute.xlu0 %v8424_v45 }
 0xb98   : > { %v7285_v24 = vpop.xlane.xlu1 %7284 }
 0xb99   : > { %v7326_v59 = vmul.f32 0.25, %v7285_v24 }
 0xb9b   : > { %v7342_v44 = vsub.f32 %v7260_v41, %v7326_v59 }
 0xb9c   : > { %v7205_v3 = vpop.permute.xlu1 %7204 }
 0xb9d   : > { %v7454_v62 = vmul.f32 %v7389_v13, %v7342_v44  ;;  %v7301_v13 = vsel %vm7273_vm0, %v11079_v56, 0.0 }
 0xb9f   : > { %7470 = vst.msk [vmem:[%s11141_s10 + $0x18] sm:$0xff] %vm7273_vm0, %v7454_v62 }
 0xba0   : > { %v7200_v57 = vpop.permute.xlu1 %7199 }
 0xba1   : > { %v7261_v54 = vadd.f32 %v7200_v57, %v11060_v9 }
 0xba3   : > { %v7343_v10 = vsub.f32 %v7261_v54, %v7327_v16 }
 0xba5   : > { %v7455_v47 = vmul.f32 %v11098_v0, %v7343_v10  ;;  %v7262_v0 = vadd.f32 %v7205_v3, %v11090_v52  ;;  %v7307_v52 = vsel %vm7273_vm0, %v11095_v4, 0.0 }
 0xba7   : > { %7471 = vst.msk [vmem:[%s11141_s10 + $0x20] sm:$0xff] %vm7273_vm0, %v7455_v47 }
 0xbae   : > { %7317 = vadd.xlane.f32.xlu0 %v7316_v27 }
 0xbb2   : > { %7302 = vadd.xlane.f32.xlu1 %v7301_v13 }
 0xbc3   : > { %7229 = vperm.xlu1 %8343, %v11107_v8  }
 0xbc4   : > { %7443 = vperm.xlu0 %8345, %v7369_v20  }
 0xbd1   : > { %v7291_v9 = vpop.xlane.xlu1 %7290 }
 0xbd2   : > { %v7328_v28 = vmul.f32 0.25, %v7291_v9 }
 0xbd4   : > { %v7344_v39 = vsub.f32 %v7262_v0, %v7328_v28 }
 0xbd5   : > { %v7215_v50 = vpop.permute.xlu1 %7214 }
 0xbd6   : > { %v7456_v21 = vmul.f32 %v11100_v19, %v7344_v39  ;;  %v7225_v19 = vpop.permute.xlu0 %7224  ;;  %v7264_v37 = vadd.f32 %v7215_v50, %v11126_v33  ;;  %v7313_v33 = vsel %vm7273_vm0, %v11132_v53, 0.0 }
 0xbd7   : > { %v7266_v51 = vadd.f32 %v7225_v19, %v11079_v56  ;;  %v7370_v56 = vld [vmem:[%s11005_s5 + $0x78] sm:$0xff] }
 0xbd8   : > { %7472 = vst.msk [vmem:[%s11141_s10 + $0x28] sm:$0xff] %vm7273_vm0, %v7456_v21 }
 0xbd9   : > { %v7210_v63 = vpop.permute.xlu1 %7209 }
 0xbda   : > { %v7263_v22 = vadd.f32 %v7210_v63, %v11067_v29  ;;  %v7300_v5 = vpop.xlane.xlu0 %7299 }
 0xbdb   : > { %v7331_v46 = vmul.f32 0.25, %v7300_v5 }
 0xbdc   : > { %v7345_v6 = vsub.f32 %v7263_v22, %v7329_v14 }
 0xbde   : > { %v7457_v26 = vmul.f32 %v11104_v36, %v7345_v6 }
 0xbe0   : > { %7473 = vst.msk [vmem:[%s11141_s10 + $0x30] sm:$0xff] %vm7273_vm0, %v7457_v26 }
 0xbe7   : > { %7308 = vadd.xlane.f32.xlu1 %v7307_v52 }
 0xbf8   : > { %7239 = vperm.xlu1 %8343, %v11152_v61  }
 0xc0a   : > { %v7297_v35 = vpop.xlane.xlu1 %7296 }
 0xc0b   : > { %v7330_v42 = vmul.f32 0.25, %v7297_v35 }
 0xc0d   : > { %v7346_v29 = vsub.f32 %v7264_v37, %v7330_v42 }
 0xc0e   : > { %v7220_v43 = vpop.permute.xlu1 %7219 }
 0xc0f   : > { %v7458_v36 = vmul.f32 %v11109_v38, %v7346_v29  ;;  %v7265_v12 = vadd.f32 %v7220_v43, %v11083_v2  ;;  %v7235_v38 = vpop.permute.xlu0 %7234 }
 0xc11   : > { %7474 = vst.msk [vmem:[%s11141_s10 + $0x38] sm:$0xff] %vm7273_vm0, %v7458_v36  ;;  %v7347_v58 = vsub.f32 %v7265_v12, %v7331_v46 }
 0xc13   : > { %v7459_v32 = vmul.f32 %v11115_v15, %v7347_v58  ;;  %v7306_v23 = vpop.xlane.xlu0 %7305 }
 0xc14   : > { %v7333_v60 = vmul.f32 0.25, %v7306_v23 }
 0xc15   : > { %7475 = vst.msk [vmem:[%s11141_s10 + $0x40] sm:$0xff] %vm7273_vm0, %v7459_v32 }
 0xc17   : > { %v7245_v59 = vpop.permute.xlu0 %7244 }
 0xc18   : > { %v7270_v27 = vadd.f32 %v7245_v59, %v11132_v53 }
 0xc1b   : > { %v7312_v3 = vpop.xlane.xlu0 %7311 }
 0xc1c   : > { %7314 = vadd.xlane.f32.xlu1 %v7313_v33  ;;  %v7335_v57 = vmul.f32 0.25, %v7312_v3 }
 0xc1f   : > { %v7255_v47 = vpop.permute.xlu0 %7254 }
 0xc20   : > { %v7272_v53 = vadd.f32 %v7255_v47, %v11159_v34 }
 0xc2d   : > { %7249 = vperm.xlu1 %8343, %v11173_v30  }
 0xc31   : > { %8346 = vset.pattern.permute.xlu1 %v8424_v45  ;;  %v7319_v45 = vsel %vm7273_vm0, %v11159_v34, 0.0 }
 0xc3b   : > { %v7318_v20 = vpop.xlane.xlu0 %7317 }
 0xc3c   : > { %v7337_v0 = vmul.f32 0.25, %v7318_v20 }
 0xc3f   : > { %v7303_v2 = vpop.xlane.xlu1 %7302 }
 0xc40   : > { %v7332_v1 = vmul.f32 0.25, %v7303_v2 }
 0xc42   : > { %v7348_v15 = vsub.f32 %v7266_v51, %v7332_v1 }
 0xc43   : > { %v7230_v17 = vpop.permute.xlu1 %7229  ;;  %v7444_v39 = vpop.permute.xlu0 %7443 }
 0xc44   : > { %v7460_v48 = vmul.f32 %v11117_v31, %v7348_v15  ;;  %v7267_v7 = vadd.f32 %v7230_v17, %v11107_v8  ;;  %v7268_v31 = vadd.f32 %v7235_v38, %v11095_v4 }
 0xc46   : > { %7476 = vst.msk [vmem:[%s11141_s10 + $0x48] sm:$0xff] %vm7273_vm0, %v7460_v48  ;;  %v7349_v24 = vsub.f32 %v7267_v7, %v7333_v60 }
 0xc48   : > { %v7461_v41 = vmul.f32 %v11119_v55, %v7349_v24 }
 0xc4a   : > { %7477 = vst.msk [vmem:[%s11141_s10 + $0x50] sm:$0xff] %vm7273_vm0, %v7461_v41 }
 0xc51   : > { %7320 = vadd.xlane.f32.xlu1 %v7319_v45 }
 0xc62   : > { %7448 = vperm.xlu1 %8346, %v7370_v56  }
 0xc74   : > { %v7309_v44 = vpop.xlane.xlu1 %7308 }
 0xc75   : > { %v7334_v8 = vmul.f32 0.25, %v7309_v44 }
 0xc77   : > { %v7350_v62 = vsub.f32 %v7268_v31, %v7334_v8 }
 0xc78   : > { %v7240_v25 = vpop.permute.xlu1 %7239 }
 0xc79   : > { %v7462_v55 = vmul.f32 %v11121_v18, %v7350_v62  ;;  %v7269_v16 = vadd.f32 %v7240_v25, %v11152_v61 }
 0xc7b   : > { %7478 = vst.msk [vmem:[%s11141_s10 + $0x58] sm:$0xff] %vm7273_vm0, %v7462_v55  ;;  %v7351_v54 = vsub.f32 %v7269_v16, %v7335_v57 }
 0xc7d   : > { %v7463_v10 = vmul.f32 %v11123_v49, %v7351_v54 }
 0xc7f   : > { %7479 = vst.msk [vmem:[%s11141_s10 + $0x60] sm:$0xff] %vm7273_vm0, %v7463_v10 }
 0xca9   : > { %v7315_v4 = vpop.xlane.xlu1 %7314 }
 0xcaa   : > { %v7336_v13 = vmul.f32 0.25, %v7315_v4 }
 0xcac   : > { %v7352_v9 = vsub.f32 %v7270_v27, %v7336_v13 }
 0xcad   : > { %v7250_v18 = vpop.permute.xlu1 %7249 }
 0xcae   : > { %v7464_v61 = vmul.f32 %v11128_v40, %v7352_v9  ;;  %v7271_v28 = vadd.f32 %v7250_v18, %v11173_v30 }
 0xcb0   : > { %7480 = vst.msk [vmem:[%s11141_s10 + $0x68] sm:$0xff] %vm7273_vm0, %v7464_v61  ;;  %v7353_v49 = vsub.f32 %v7271_v28, %v7337_v0 }
 0xcb2   : > { %v7465_v50 = vmul.f32 %v7444_v39, %v7353_v49 }
 0xcb4   : > { %7481 = vst.msk [vmem:[%s11141_s10 + $0x70] sm:$0xff] %vm7273_vm0, %v7465_v50 }
 0xcde   : > { %v7321_v21 = vpop.xlane.xlu1 %7320 }
 0xcdf   : > { %v7338_v11 = vmul.f32 0.25, %v7321_v21 }
 0xce1   : > { %v7354_v63 = vsub.f32 %v7272_v53, %v7338_v11 }
 0xce2   : > { %v7449_v14 = vpop.permute.xlu1 %7448 }
 0xce3   : > { %v7466_v22 = vmul.f32 %v7449_v14, %v7354_v63 }
 0xce5   : > { %7482 = vst.msk [vmem:[%s11141_s10 + $0x78] sm:$0xff] %vm7273_vm0, %v7466_v22 }
 0xce6 PF: > { %s14_s15 = sadd.s32 1, %s8417_s15  }
 0xce7   : > { %p11_p4 = scmp.ge.s32.totalorder %s14_s15, 4  }
 0xce9   :  { %13 = sbr.rel (!%p11_p4) target bundleno = 1 (0x1), region = 72 }

</bundles_post_ra>
